<compile_context>
chip_gen: v7x
topology: tpu7x:2x2x1
jax: 0.10.0
libtpu: 0.0.40
codegen_flags: <defaults>
</compile_context>

<pallas_src>
import functools

import jax
import jax.numpy as jnp
from jax.experimental import pallas as pl
from jax.experimental.pallas import tpu as pltpu

EPS = 1e-5
COMPUTE_DTYPE = jnp.bfloat16      # MXU input / intermediate-activation dtype
LANES = 128                       # lane width; Cout padded to a multiple of it
CHUNK_ROWS = 512                  # in-kernel row tile for the matmul
EPILOGUE_ROWS = 512               # row tile of the fused epilogue
VMEM_LIMIT = 48 * 1024 * 1024     # explicit scoped-VMEM cap (above v5e default)


def _round_up(x, m):
    return (x + m - 1) // m * m


# ----------------------------- Pallas kernels ------------------------------

def _conv_kernel(xp_ref, w_ref, y_ref, stat_ref, *,
                 taps, cin, cop, m_full, wb, wo, chunk, fold):
    """One image: direct conv over a phase-decomposed flattened input.
    Emits the raw conv output (bf16) plus fused per-channel sum/sum-of-squares
    over the valid output columns (f32) for training-mode BatchNorm."""
    n_taps = len(taps)
    s_acc = jnp.zeros((1, cop), jnp.float32)
    q_acc = jnp.zeros((1, cop), jnp.float32)
    for c0 in range(0, m_full, chunk):
        m = min(chunk, m_full - c0)
        if n_taps == 1:
            ph, r = taps[0]
            acc = jnp.dot(xp_ref[0, ph, c0 + r:c0 + r + m, :], w_ref[...],
                          preferred_element_type=jnp.float32)
        elif fold:
            # cin is a multiple of 128 here, so the lane concat is vreg-aligned
            # and the single dot gets a full K = n_taps*cin contraction.
            lhs = jnp.concatenate(
                [xp_ref[0, ph, c0 + r:c0 + r + m, :] for ph, r in taps], axis=1)
            acc = jnp.dot(lhs, w_ref[...], preferred_element_type=jnp.float32)
        else:
            acc = jnp.zeros((m, cop), jnp.float32)
            for t, (ph, r) in enumerate(taps):
                acc = acc + jnp.dot(xp_ref[0, ph, c0 + r:c0 + r + m, :],
                                    w_ref[t * cin:(t + 1) * cin, :],
                                    preferred_element_type=jnp.float32)
        y_ref[0, c0:c0 + m, :] = acc.astype(y_ref.dtype)
        col = (jax.lax.broadcasted_iota(jnp.int32, (m, 1), 0) + c0) % wb
        valid = jnp.where(col < wo, acc, 0.0)
        s_acc = s_acc + jnp.sum(valid, axis=0, keepdims=True)
        q_acc = q_acc + jnp.sum(valid * valid, axis=0, keepdims=True)
    stat_ref[0, 0:1, :] = s_acc
    stat_ref[0, 1:2, :] = q_acc


def _conv2_kernel(y1_ref, w_ref, sc_ref, sh_ref, y_ref, stat_ref, pad_ref, *,
                  cop, wo, wp, m_full, chunk):
    """One image of conv2 (3x3, stride 1, pad 1): applies the stage-1 BN affine
    + ReLU to the raw conv1 output while building the zero-padded LHS in VMEM
    scratch (one masked bulk store + two halo clears), then a folded K=9*cop
    MXU dot per row chunk with fused BN2 statistics."""
    halo = wp + 1                             # zero rows before the data region
    rows = pad_ref.shape[0]
    col = jax.lax.broadcasted_iota(jnp.int32, (m_full, 1), 0) % wp
    a = y1_ref[0].astype(jnp.float32) * sc_ref[...] + sh_ref[...]
    a = jnp.where(col < wo, jnp.maximum(a, 0.0), 0.0).astype(pad_ref.dtype)
    pad_ref[0:halo, :] = jnp.zeros((halo, cop), pad_ref.dtype)
    pad_ref[halo:halo + m_full, :] = a
    pad_ref[halo + m_full:rows, :] = jnp.zeros((rows - halo - m_full, cop),
                                               pad_ref.dtype)
    taps = [ki * wp + kj for ki in range(3) for kj in range(3)]
    s_acc = jnp.zeros((1, cop), jnp.float32)
    q_acc = jnp.zeros((1, cop), jnp.float32)
    for c0 in range(0, m_full, chunk):
        m = min(chunk, m_full - c0)
        lhs = jnp.concatenate([pad_ref[c0 + r:c0 + r + m, :] for r in taps],
                              axis=1)
        acc = jnp.dot(lhs, w_ref[...], preferred_element_type=jnp.float32)
        y_ref[0, c0:c0 + m, :] = acc.astype(y_ref.dtype)
        colc = (jax.lax.broadcasted_iota(jnp.int32, (m, 1), 0) + c0) % wp
        valid = jnp.where(colc < wo, acc, 0.0)
        s_acc = s_acc + jnp.sum(valid, axis=0, keepdims=True)
        q_acc = q_acc + jnp.sum(valid * valid, axis=0, keepdims=True)
    stat_ref[0, 0:1, :] = s_acc
    stat_ref[0, 1:2, :] = q_acc


def _final_kernel(y_ref, s2_ref, b2_ref, i_ref, si_ref, bi_ref, o_ref):
    """out = relu(y*s2 + b2 + ident*si + bi) on lane-dense (rows, Cop) blocks."""
    o_ref[...] = jnp.maximum(
        y_ref[...].astype(jnp.float32) * s2_ref[...] + b2_ref[...]
        + i_ref[...].astype(jnp.float32) * si_ref[...] + bi_ref[...], 0.0)


# ----------------------------- pallas wrappers ------------------------------

def conv2d_phased(xp, w_mat, taps, cin, cop, m_full, wb, wo):
    """Direct conv over a phase-decomposed, flattened bf16 input.  Returns
    (y (N, m_full, cop) bf16, stats (N, 2, cop) f32 = per-image [sum; sum_sq])."""
    N, P, R, _ = xp.shape
    T = len(taps)
    assert w_mat.shape == (T * cin, cop)
    chunk = min(m_full, CHUNK_ROWS)
    fold = (cin % LANES == 0)
    kern = functools.partial(_conv_kernel, taps=tuple(taps), cin=cin, cop=cop,
                             m_full=m_full, wb=wb, wo=wo, chunk=chunk, fold=fold)
    cost = pl.CostEstimate(
        flops=2 * N * m_full * T * cin * cop, transcendentals=0,
        bytes_accessed=int(xp.size * xp.dtype.itemsize + w_mat.size * 2
                           + N * m_full * cop * 2 + 2 * N * cop * 4))
    return pl.pallas_call(
        kern,
        out_shape=(jax.ShapeDtypeStruct((N, m_full, cop), COMPUTE_DTYPE),
                   jax.ShapeDtypeStruct((N, 2, cop), jnp.float32)),
        grid=(N,),
        in_specs=[pl.BlockSpec((1, P, R, cin), lambda n: (n, 0, 0, 0)),
                  pl.BlockSpec((T * cin, cop), lambda n: (0, 0))],
        out_specs=(pl.BlockSpec((1, m_full, cop), lambda n: (n, 0, 0)),
                   pl.BlockSpec((1, 2, cop), lambda n: (n, 0, 0))),
        compiler_params=pltpu.CompilerParams(
            dimension_semantics=("parallel",), vmem_limit_bytes=VMEM_LIMIT),
        cost_estimate=cost,
    )(xp, w_mat)


def conv2d_fused_bn_in(y1, w_mat, scale, shift, cop, ho, wo, wp):
    """conv2: 3x3 / stride 1 / pad 1, with fused input BN-affine+ReLU and fused
    BN2 statistics.  y1 is conv1's raw bf16 output at flattened width wp."""
    N, M, _ = y1.shape
    m_full = ho * wp
    assert M == m_full and w_mat.shape == (9 * cop, cop)
    rows = _round_up((ho + 2) * wp + 2, 8)
    chunk = min(m_full, CHUNK_ROWS)
    kern = functools.partial(_conv2_kernel, cop=cop, wo=wo, wp=wp,
                             m_full=m_full, chunk=chunk)
    cost = pl.CostEstimate(
        flops=2 * N * m_full * 9 * cop * cop, transcendentals=0,
        bytes_accessed=int(y1.size * 2 + w_mat.size * 2
                           + N * m_full * cop * 2 + 2 * N * cop * 4))
    return pl.pallas_call(
        kern,
        out_shape=(jax.ShapeDtypeStruct((N, m_full, cop), COMPUTE_DTYPE),
                   jax.ShapeDtypeStruct((N, 2, cop), jnp.float32)),
        grid=(N,),
        in_specs=[pl.BlockSpec((1, m_full, cop), lambda n: (n, 0, 0)),
                  pl.BlockSpec((9 * cop, cop), lambda n: (0, 0)),
                  pl.BlockSpec((1, cop), lambda n: (0, 0)),
                  pl.BlockSpec((1, cop), lambda n: (0, 0))],
        out_specs=(pl.BlockSpec((1, m_full, cop), lambda n: (n, 0, 0)),
                   pl.BlockSpec((1, 2, cop), lambda n: (n, 0, 0))),
        scratch_shapes=[pltpu.VMEM((rows, cop), COMPUTE_DTYPE)],
        compiler_params=pltpu.CompilerParams(
            dimension_semantics=("parallel",), vmem_limit_bytes=VMEM_LIMIT),
        cost_estimate=cost,
    )(y1, w_mat, scale, shift)


def bn_add_relu(y2, s2, b2, ident, si, bi):
    """out = relu(y2*s2 + b2 + ident*si + bi), elementwise on a lane-dense
    (rows, Cop) view with a fixed 8-aligned row tile and a pl.cdiv grid."""
    assert ident.shape == y2.shape
    N, M, C = y2.shape
    R = N * M                                 # multiple of 8 by construction
    yf = y2.reshape(R, C)
    idf = ident.reshape(R, C)
    tr = min(EPILOGUE_ROWS, R)
    out = pl.pallas_call(
        _final_kernel,
        out_shape=jax.ShapeDtypeStruct((R, C), jnp.float32),
        grid=(pl.cdiv(R, tr),),
        in_specs=[pl.BlockSpec((tr, C), lambda i: (i, 0)),
                  pl.BlockSpec((1, C), lambda i: (0, 0)),
                  pl.BlockSpec((1, C), lambda i: (0, 0)),
                  pl.BlockSpec((tr, C), lambda i: (i, 0)),
                  pl.BlockSpec((1, C), lambda i: (0, 0)),
                  pl.BlockSpec((1, C), lambda i: (0, 0))],
        out_specs=pl.BlockSpec((tr, C), lambda i: (i, 0)),
        compiler_params=pltpu.CompilerParams(
            dimension_semantics=("parallel",), vmem_limit_bytes=VMEM_LIMIT),
    )(yf, s2, b2, idf, si, bi)
    return out


# ------------------------------- JAX glue ----------------------------------

def _w_to_mat(w_oihw, cin_pad, cout_pad):
    """PyTorch OIHW conv weight -> (KH*KW*cin_pad, cout_pad) bf16 matrix, rows
    in (kh, kw, cin) order with the channel padding interleaved per tap."""
    cout, cin, kh, kw = w_oihw.shape
    w = jnp.transpose(w_oihw, (2, 3, 1, 0))
    w = jnp.pad(w, ((0, 0), (0, 0), (0, cin_pad - cin), (0, cout_pad - cout)))
    return w.reshape(kh * kw * cin_pad, cout_pad).astype(COMPUTE_DTYPE)


def _prep_phased(x_nhwc, kh, kw, stride, pad, wb):
    """Zero-pad, phase-decompose (stride>1) and flatten an NHWC activation so
    every conv tap becomes a contiguous row window of a (rows, Cin) matrix,
    with the flattened width forced to `wb` (a multiple of 8, shared with the
    downstream conv2 geometry).  Returns (prep, taps=[(phase, row_off)], meta)."""
    N, H, W, C = x_nhwc.shape
    s = stride
    Ho = (H + 2 * pad - kh) // s + 1
    Wo = (W + 2 * pad - kw) // s + 1
    Hb = -(-(H + 2 * pad) // s)
    assert wb % 8 == 0 and wb >= -(-(W + 2 * pad) // s)
    n_pi, n_pj = min(s, kh), min(s, kw)
    # One merged pad: conv zero-padding plus phase / forced-width fill.
    xp = jnp.pad(x_nhwc, ((0, 0), (pad, Hb * s - H - pad),
                          (pad, wb * s - W - pad), (0, 0)))
    if s == 1:
        prep = xp.reshape(N, 1, Hb * wb, C)                  # no phase copy
    else:
        phases = [xp[:, pi::s, pj::s, :].reshape(N, Hb * wb, C)
                  for pi in range(n_pi) for pj in range(n_pj)]
        prep = phases[0][:, None] if len(phases) == 1 else jnp.stack(phases, 1)
    taps, max_r = [], 0
    for ki in range(kh):
        for kj in range(kw):
            r = (ki // s) * wb + (kj // s)
            taps.append(((ki % s) * n_pj + (kj % s), r))
            max_r = max(max_r, r)
    m_full = Ho * wb
    extra = max(0, max_r + m_full - Hb * wb)
    if extra:
        prep = jnp.pad(prep, ((0, 0), (0, 0), (0, extra), (0, 0)))
    return prep, taps, dict(Ho=Ho, Wo=Wo, m_full=m_full)


def _bn_scale_shift(stats, count, gamma, beta, cop, eps=EPS):
    """Fold the fused per-image (sum, sum_sq) into BN scale/shift, f32, padded
    to `cop` channels (padded gamma/beta are zero so padded channels stay 0)."""
    s = jnp.sum(stats[:, 0, :], axis=0).reshape(1, cop)
    q = jnp.sum(stats[:, 1, :], axis=0).reshape(1, cop)
    g = jnp.pad(gamma, (0, cop - gamma.shape[0])).reshape(1, cop)
    b = jnp.pad(beta, (0, cop - beta.shape[0])).reshape(1, cop)
    mean = s / count
    var = jnp.maximum(q / count - mean * mean, 0.0)   # guard f32 cancellation
    scale = g / jnp.sqrt(var + eps)
    shift = b - mean * scale
    return scale.astype(jnp.float32), shift.astype(jnp.float32)


def residual_block_forward(x_nchw, params, stride):
    """Pallas implementation of ResidualBlock.forward (training-mode BN)."""
    cout = params["w1"].shape[0]
    cin = x_nchw.shape[1]
    need_skip = (stride != 1) or (cin != cout)
    cop = _round_up(cout, LANES)

    x = jnp.transpose(x_nchw, (0, 2, 3, 1))                  # NHWC
    N, H, W, _ = x.shape
    xc = x.astype(COMPUTE_DTYPE)

    Ho = (H + 2 - 3) // stride + 1
    Wo = (W + 2 - 3) // stride + 1
    wp = _round_up(Wo + 2, 8)        # shared flattened width = conv2's padded width
    count = N * Ho * Wo

    # --- conv1: 3x3/stride, pad 1, fused BN1 stats, emitted directly at width wp ---
    xp1, taps1, m1 = _prep_phased(xc, 3, 3, stride, 1, wp)
    assert m1["Ho"] == Ho and m1["Wo"] == Wo
    w1m = _w_to_mat(params["w1"], cin, cop)
    y1, st1 = conv2d_phased(xp1, w1m, taps1, cin, cop, m1["m_full"], wp, Wo)
    sc1, sh1 = _bn_scale_shift(st1, count, params["g1"], params["b1"], cop)

    # --- conv2: 3x3/1, pad 1, fused BN1-affine+ReLU input and fused BN2 stats ---
    w2m = _w_to_mat(params["w2"], cop, cop)
    y2, st2 = conv2d_fused_bn_in(y1, w2m, sc1, sh1, cop, Ho, Wo, wp)
    sc2, sh2 = _bn_scale_shift(st2, count, params["g2"], params["b2"], cop)

    # --- identity path, in y2's flattened (Ho, wp, cop) geometry ---
    if need_skip:
        xps, tapss, ms = _prep_phased(xc, 1, 1, stride, 0, wp)
        assert ms["Ho"] == Ho and ms["Wo"] == Wo
        wsm = _w_to_mat(params["ws"], cin, cop)
        ident, sts = conv2d_phased(xps, wsm, tapss, cin, cop, ms["m_full"], wp, Wo)
        scs, shs = _bn_scale_shift(sts, count, params["gs"], params["bs"], cop)
    else:
        ident = jnp.pad(xc, ((0, 0), (0, 0), (0, wp - W), (0, cop - cin)))
        ident = ident.reshape(N, H * wp, cop)
        scs = jnp.ones((1, cop), jnp.float32)
        shs = jnp.zeros((1, cop), jnp.float32)

    # --- fused BN2-affine + skip-affine + residual add + ReLU ---
    out_flat = bn_add_relu(y2, sc2, sh2, ident, scs, shs)    # (N*Ho*wp, cop) f32
    out = out_flat.reshape(N, Ho, wp, cop)[:, :, :Wo, :cout]
    return jnp.transpose(out, (0, 3, 1, 2))                  # back to NCHW


# --------------------------- pure-JAX reference -----------------------------

def _conv_ref(x, w, stride, pad):
    # Same bf16-input / f32-accumulate contract as the Pallas kernels.
    return jax.lax.conv_general_dilated(
        x.astype(COMPUTE_DTYPE), w.astype(COMPUTE_DTYPE),
        (stride, stride), [(pad, pad), (pad, pad)],
        dimension_numbers=("NCHW", "OIHW", "NCHW"),
        preferred_element_type=jnp.float32)


def _bn_ref(x, gamma, beta, eps=EPS):
    mean = x.mean(axis=(0, 2, 3), keepdims=True)
    var = x.var(axis=(0, 2, 3), keepdims=True)
    return ((x - mean) / jnp.sqrt(var + eps)) * gamma.reshape(1, -1, 1, 1) \
        + beta.reshape(1, -1, 1, 1)


def residual_block_ref(x, p, stride):
    out = _conv_ref(x, p["w1"], stride, 1)
    out = jax.nn.relu(_bn_ref(out, p["g1"], p["b1"]))
    out = _conv_ref(out, p["w2"], 1, 1)
    out = _bn_ref(out, p["g2"], p["b2"])
    if (stride != 1) or (x.shape[1] != p["w1"].shape[0]):
        idn = _bn_ref(_conv_ref(x, p["ws"], stride, 0), p["gs"], p["bs"])
    else:
        idn = x
    return jax.nn.relu(out + idn)


# --------------------------------- main -------------------------------------

def _make_params(key, cin, cout, need_skip):
    ks = jax.random.split(key, 9)
    p = {
        "w1": 0.1 * jax.random.normal(ks[0], (cout, cin, 3, 3), jnp.float32),
        "w2": 0.1 * jax.random.normal(ks[1], (cout, cout, 3, 3), jnp.float32),
        "g1": 1.0 + 0.1 * jax.random.normal(ks[2], (cout,), jnp.float32),
        "b1": 0.1 * jax.random.normal(ks[3], (cout,), jnp.float32),
        "g2": 1.0 + 0.1 * jax.random.normal(ks[4], (cout,), jnp.float32),
        "b2": 0.1 * jax.random.normal(ks[5], (cout,), jnp.float32),
    }
    if need_skip:
        p["ws"] = 0.1 * jax.random.normal(ks[6], (cout, cin, 1, 1), jnp.float32)
        p["gs"] = 1.0 + 0.1 * jax.random.normal(ks[7], (cout,), jnp.float32)
        p["bs"] = 0.1 * jax.random.normal(ks[8], (cout,), jnp.float32)
    return p


if __name__ == "__main__":
    key = jax.random.PRNGKey(0)
    k1, k2, k3, k4 = jax.random.split(key, 4)
    fwd = jax.jit(residual_block_forward, static_argnums=2)

    # Tolerance note: kernel and reference quantize the same tensors to bf16 at
    # matching points; the residual deviation comes only from the bf16 rounding
    # of the stored intermediates (y1/y2/ident), while logic errors would be O(1).
    ATOL = RTOL = 3e-2

    # Case 1: downsampling block (stride 2, channel expansion -> conv1x1+BN skip).
    N, Cin, H, W, Cout, stride = 2, 4, 16, 16, 8, 2
    params = _make_params(k1, Cin, Cout, need_skip=True)
    x = jax.random.normal(k2, (N, Cin, H, W), jnp.float32)
    out = jax.block_until_ready(fwd(x, params, stride))
    ref = jax.block_until_ready(residual_block_ref(x, params, stride))
    assert out.shape == ref.shape == (N, Cout, H // stride, W // stride)
    err = float(jnp.max(jnp.abs(out - ref)))
    assert jnp.allclose(out, ref, atol=ATOL, rtol=RTOL), err

    # Case 2: identity block (stride 1, same channels -> plain residual add).
    N2, C2, H2, W2 = 2, 8, 8, 8
    params2 = _make_params(k3, C2, C2, need_skip=False)
    x2 = jax.random.normal(k4, (N2, C2, H2, W2), jnp.float32)
    out2 = jax.block_until_ready(fwd(x2, params2, 1))
    ref2 = jax.block_until_ready(residual_block_ref(x2, params2, 1))
    assert out2.shape == ref2.shape == (N2, C2, H2, W2)
    err2 = float(jnp.max(jnp.abs(out2 - ref2)))
    assert jnp.allclose(out2, ref2, atol=ATOL, rtol=RTOL), err2

    print("KERNEL_OK")
</pallas_src>

<mosaic_0001>
module attributes {stable_mosaic.version = 11 : i64} {
  func.func @_conv_kernel(%arg0: i32, %arg1: memref<1x4x145x4xbf16, #tpu.memory_space<vmem>>, %arg2: memref<36x128xbf16, #tpu.memory_space<vmem>>, %arg3: memref<1x128x128xbf16, #tpu.memory_space<vmem>>, %arg4: memref<1x2x128xf32, #tpu.memory_space<vmem>>) attributes {dimension_semantics = [#tpu.dimension_semantics<parallel>], iteration_bounds = array<i64: 2>, scalar_prefetch = 0 : i64, scratch_operands = 0 : i64, tpu.core_type = #tpu.core_type<tc>, window_params = [{transform_indices = @transform_0, window_bounds = array<i64: 1, 4, 145, 4>}, {pipeline_mode = #tpu.pipeline_mode<synchronous>, transform_indices = @transform_1, window_bounds = array<i64: 36, 128>}, {transform_indices = @transform_2, window_bounds = array<i64: 1, 128, 128>}, {transform_indices = @transform_3, window_bounds = array<i64: 1, 2, 128>}]} {
    %cst = arith.constant 0.000000e+00 : f32
    %0 = vector.broadcast %cst : f32 to vector<1x128xf32>
    %cst_0 = arith.constant 0.000000e+00 : f32
    %1 = vector.broadcast %cst_0 : f32 to vector<1x128xf32>
    %cst_1 = arith.constant 0.000000e+00 : f32
    %2 = vector.broadcast %cst_1 : f32 to vector<128x128xf32>
    %c0 = arith.constant 0 : index
    %c0_2 = arith.constant 0 : index
    %c0_3 = arith.constant 0 : index
    %c0_4 = arith.constant 0 : index
    %3 = vector.load %arg1[%c0, %c0_2, %c0_3, %c0_4] : memref<1x4x145x4xbf16, #tpu.memory_space<vmem>>, vector<1x1x128x4xbf16>
    %4 = vector.shape_cast %3 : vector<1x1x128x4xbf16> to vector<128x4xbf16>
    %c0_5 = arith.constant 0 : index
    %c0_6 = arith.constant 0 : index
    %5 = vector.load %arg2[%c0_5, %c0_6] : memref<36x128xbf16, #tpu.memory_space<vmem>>, vector<4x128xbf16>
    %cst_7 = arith.constant dense<0.000000e+00> : vector<128x128xf32>
    %6 = tpu.matmul %4, %5, %cst_7 {dimension_numbers = #tpu.dot_dimension_numbers<[1], [0], [0], [1], [0, 0, 1, 1], [], []>} : vector<128x4xbf16>, vector<4x128xbf16>, vector<128x128xf32> -> vector<128x128xf32>
    %7 = arith.addf %2, %6 : vector<128x128xf32>
    %c0_8 = arith.constant 0 : index
    %c1 = arith.constant 1 : index
    %c0_9 = arith.constant 0 : index
    %c0_10 = arith.constant 0 : index
    %8 = vector.load %arg1[%c0_8, %c1, %c0_9, %c0_10] : memref<1x4x145x4xbf16, #tpu.memory_space<vmem>>, vector<1x1x128x4xbf16>
    %9 = vector.shape_cast %8 : vector<1x1x128x4xbf16> to vector<128x4xbf16>
    %c4 = arith.constant 4 : index
    %c0_11 = arith.constant 0 : index
    %10 = vector.load %arg2[%c4, %c0_11] : memref<36x128xbf16, #tpu.memory_space<vmem>>, vector<4x128xbf16>
    %cst_12 = arith.constant dense<0.000000e+00> : vector<128x128xf32>
    %11 = tpu.matmul %9, %10, %cst_12 {dimension_numbers = #tpu.dot_dimension_numbers<[1], [0], [0], [1], [0, 0, 1, 1], [], []>} : vector<128x4xbf16>, vector<4x128xbf16>, vector<128x128xf32> -> vector<128x128xf32>
    %12 = arith.addf %7, %11 : vector<128x128xf32>
    %c0_13 = arith.constant 0 : index
    %c0_14 = arith.constant 0 : index
    %c1_15 = arith.constant 1 : index
    %c0_16 = arith.constant 0 : index
    %13 = vector.load %arg1[%c0_13, %c0_14, %c1_15, %c0_16] : memref<1x4x145x4xbf16, #tpu.memory_space<vmem>>, vector<1x1x128x4xbf16>
    %14 = vector.shape_cast %13 : vector<1x1x128x4xbf16> to vector<128x4xbf16>
    %c8 = arith.constant 8 : index
    %c0_17 = arith.constant 0 : index
    %15 = vector.load %arg2[%c8, %c0_17] : memref<36x128xbf16, #tpu.memory_space<vmem>>, vector<4x128xbf16>
    %cst_18 = arith.constant dense<0.000000e+00> : vector<128x128xf32>
    %16 = tpu.matmul %14, %15, %cst_18 {dimension_numbers = #tpu.dot_dimension_numbers<[1], [0], [0], [1], [0, 0, 1, 1], [], []>} : vector<128x4xbf16>, vector<4x128xbf16>, vector<128x128xf32> -> vector<128x128xf32>
    %17 = arith.addf %12, %16 : vector<128x128xf32>
    %c0_19 = arith.constant 0 : index
    %c2 = arith.constant 2 : index
    %c0_20 = arith.constant 0 : index
    %c0_21 = arith.constant 0 : index
    %18 = vector.load %arg1[%c0_19, %c2, %c0_20, %c0_21] : memref<1x4x145x4xbf16, #tpu.memory_space<vmem>>, vector<1x1x128x4xbf16>
    %19 = vector.shape_cast %18 : vector<1x1x128x4xbf16> to vector<128x4xbf16>
    %c12 = arith.constant 12 : index
    %c0_22 = arith.constant 0 : index
    %20 = vector.load %arg2[%c12, %c0_22] : memref<36x128xbf16, #tpu.memory_space<vmem>>, vector<4x128xbf16>
    %cst_23 = arith.constant dense<0.000000e+00> : vector<128x128xf32>
    %21 = tpu.matmul %19, %20, %cst_23 {dimension_numbers = #tpu.dot_dimension_numbers<[1], [0], [0], [1], [0, 0, 1, 1], [], []>} : vector<128x4xbf16>, vector<4x128xbf16>, vector<128x128xf32> -> vector<128x128xf32>
    %22 = arith.addf %17, %21 : vector<128x128xf32>
    %c0_24 = arith.constant 0 : index
    %c3 = arith.constant 3 : index
    %c0_25 = arith.constant 0 : index
    %c0_26 = arith.constant 0 : index
    %23 = vector.load %arg1[%c0_24, %c3, %c0_25, %c0_26] : memref<1x4x145x4xbf16, #tpu.memory_space<vmem>>, vector<1x1x128x4xbf16>
    %24 = vector.shape_cast %23 : vector<1x1x128x4xbf16> to vector<128x4xbf16>
    %c16 = arith.constant 16 : index
    %c0_27 = arith.constant 0 : index
    %25 = vector.load %arg2[%c16, %c0_27] : memref<36x128xbf16, #tpu.memory_space<vmem>>, vector<4x128xbf16>
    %cst_28 = arith.constant dense<0.000000e+00> : vector<128x128xf32>
    %26 = tpu.matmul %24, %25, %cst_28 {dimension_numbers = #tpu.dot_dimension_numbers<[1], [0], [0], [1], [0, 0, 1, 1], [], []>} : vector<128x4xbf16>, vector<4x128xbf16>, vector<128x128xf32> -> vector<128x128xf32>
    %27 = arith.addf %22, %26 : vector<128x128xf32>
    %c0_29 = arith.constant 0 : index
    %c2_30 = arith.constant 2 : index
    %c1_31 = arith.constant 1 : index
    %c0_32 = arith.constant 0 : index
    %28 = vector.load %arg1[%c0_29, %c2_30, %c1_31, %c0_32] : memref<1x4x145x4xbf16, #tpu.memory_space<vmem>>, vector<1x1x128x4xbf16>
    %29 = vector.shape_cast %28 : vector<1x1x128x4xbf16> to vector<128x4xbf16>
    %c20 = arith.constant 20 : index
    %c0_33 = arith.constant 0 : index
    %30 = vector.load %arg2[%c20, %c0_33] : memref<36x128xbf16, #tpu.memory_space<vmem>>, vector<4x128xbf16>
    %cst_34 = arith.constant dense<0.000000e+00> : vector<128x128xf32>
    %31 = tpu.matmul %29, %30, %cst_34 {dimension_numbers = #tpu.dot_dimension_numbers<[1], [0], [0], [1], [0, 0, 1, 1], [], []>} : vector<128x4xbf16>, vector<4x128xbf16>, vector<128x128xf32> -> vector<128x128xf32>
    %32 = arith.addf %27, %31 : vector<128x128xf32>
    %c0_35 = arith.constant 0 : index
    %c0_36 = arith.constant 0 : index
    %c16_37 = arith.constant 16 : index
    %c0_38 = arith.constant 0 : index
    %33 = vector.load %arg1[%c0_35, %c0_36, %c16_37, %c0_38] : memref<1x4x145x4xbf16, #tpu.memory_space<vmem>>, vector<1x1x128x4xbf16>
    %34 = vector.shape_cast %33 : vector<1x1x128x4xbf16> to vector<128x4xbf16>
    %c24 = arith.constant 24 : index
    %c0_39 = arith.constant 0 : index
    %35 = vector.load %arg2[%c24, %c0_39] : memref<36x128xbf16, #tpu.memory_space<vmem>>, vector<4x128xbf16>
    %cst_40 = arith.constant dense<0.000000e+00> : vector<128x128xf32>
    %36 = tpu.matmul %34, %35, %cst_40 {dimension_numbers = #tpu.dot_dimension_numbers<[1], [0], [0], [1], [0, 0, 1, 1], [], []>} : vector<128x4xbf16>, vector<4x128xbf16>, vector<128x128xf32> -> vector<128x128xf32>
    %37 = arith.addf %32, %36 : vector<128x128xf32>
    %c0_41 = arith.constant 0 : index
    %c1_42 = arith.constant 1 : index
    %c16_43 = arith.constant 16 : index
    %c0_44 = arith.constant 0 : index
    %38 = vector.load %arg1[%c0_41, %c1_42, %c16_43, %c0_44] : memref<1x4x145x4xbf16, #tpu.memory_space<vmem>>, vector<1x1x128x4xbf16>
    %39 = vector.shape_cast %38 : vector<1x1x128x4xbf16> to vector<128x4xbf16>
    %c28 = arith.constant 28 : index
    %c0_45 = arith.constant 0 : index
    %40 = vector.load %arg2[%c28, %c0_45] : memref<36x128xbf16, #tpu.memory_space<vmem>>, vector<4x128xbf16>
    %cst_46 = arith.constant dense<0.000000e+00> : vector<128x128xf32>
    %41 = tpu.matmul %39, %40, %cst_46 {dimension_numbers = #tpu.dot_dimension_numbers<[1], [0], [0], [1], [0, 0, 1, 1], [], []>} : vector<128x4xbf16>, vector<4x128xbf16>, vector<128x128xf32> -> vector<128x128xf32>
    %42 = arith.addf %37, %41 : vector<128x128xf32>
    %c0_47 = arith.constant 0 : index
    %c0_48 = arith.constant 0 : index
    %c17 = arith.constant 17 : index
    %c0_49 = arith.constant 0 : index
    %43 = vector.load %arg1[%c0_47, %c0_48, %c17, %c0_49] : memref<1x4x145x4xbf16, #tpu.memory_space<vmem>>, vector<1x1x128x4xbf16>
    %44 = vector.shape_cast %43 : vector<1x1x128x4xbf16> to vector<128x4xbf16>
    %c32 = arith.constant 32 : index
    %c0_50 = arith.constant 0 : index
    %45 = vector.load %arg2[%c32, %c0_50] : memref<36x128xbf16, #tpu.memory_space<vmem>>, vector<4x128xbf16>
    %cst_51 = arith.constant dense<0.000000e+00> : vector<128x128xf32>
    %46 = tpu.matmul %44, %45, %cst_51 {dimension_numbers = #tpu.dot_dimension_numbers<[1], [0], [0], [1], [0, 0, 1, 1], [], []>} : vector<128x4xbf16>, vector<4x128xbf16>, vector<128x128xf32> -> vector<128x128xf32>
    %47 = arith.addf %42, %46 : vector<128x128xf32>
    %48 = arith.truncf %47 : vector<128x128xf32> to vector<128x128xbf16>
    %c0_52 = arith.constant 0 : index
    %c0_53 = arith.constant 0 : index
    %c0_54 = arith.constant 0 : index
    %49 = vector.load %arg3[%c0_52, %c0_53, %c0_54] : memref<1x128x128xbf16, #tpu.memory_space<vmem>>, vector<1x128x128xbf16>
    %50 = vector.shape_cast %49 : vector<1x128x128xbf16> to vector<128x128xbf16>
    %51 = vector.shape_cast %48 : vector<128x128xbf16> to vector<1x128x128xbf16>
    tpu.vector_store %arg3[%c0_52, %c0_53, %c0_54], %51 {strides = array<i32>} : memref<1x128x128xbf16, #tpu.memory_space<vmem>>, vector<1x128x128xbf16>,
    %52 = tpu.iota {dimensions = array<i32: 0>} : vector<128x1xi32>
    %c0_i32 = arith.constant 0 : i32
    %53 = vector.broadcast %c0_i32 : i32 to vector<128x1xi32>
    %54 = arith.addi %52, %53 : vector<128x1xi32>
    %c16_i32 = arith.constant 16 : i32
    %c0_i32_55 = arith.constant 0 : i32
    %55 = arith.cmpi eq, %c16_i32, %c0_i32_55 : i32
    %c1_i32 = arith.constant 1 : i32
    %56 = arith.select %55, %c1_i32, %c16_i32 : i32
    %57 = vector.broadcast %56 : i32 to vector<128x1xi32>
    %58 = arith.remsi %54, %57 : vector<128x1xi32>
    %c0_i32_56 = arith.constant 0 : i32
    %59 = vector.broadcast %c0_i32_56 : i32 to vector<128x1xi32>
    %60 = arith.cmpi ne, %58, %59 : vector<128x1xi32>
    %c0_i32_57 = arith.constant 0 : i32
    %61 = vector.broadcast %c0_i32_57 : i32 to vector<128x1xi32>
    %62 = arith.cmpi slt, %58, %61 : vector<128x1xi32>
    %c0_i32_58 = arith.constant 0 : i32
    %63 = arith.cmpi slt, %56, %c0_i32_58 : i32
    %64 = vector.broadcast %63 : i1 to vector<128x1xi1>
    %65 = vector.broadcast %64 : vector<128x1xi1> to vector<128x1xi1>
    %66 = arith.xori %62, %65 : vector<128x1xi1>
    %67 = arith.andi %66, %60 : vector<128x1xi1>
    %68 = vector.broadcast %56 : i32 to vector<128x1xi32>
    %69 = arith.addi %58, %68 : vector<128x1xi32>
    %70 = arith.select %67, %69, %58 : vector<128x1xi1>, vector<128x1xi32>
    %c8_i32 = arith.constant 8 : i32
    %71 = vector.broadcast %c8_i32 : i32 to vector<128x1xi32>
    %72 = arith.cmpi slt, %70, %71 : vector<128x1xi32>
    %cst_59 = arith.constant 0.000000e+00 : f32
    %73 = vector.shape_cast %72 : vector<128x1xi1> to vector<128x1xi1>
    %74 = vector.broadcast %73 : vector<128x1xi1> to vector<128x128xi1>
    %75 = vector.broadcast %cst_59 : f32 to vector<128x128xf32>
    %76 = arith.select %74, %47, %75 : vector<128x128xi1>, vector<128x128xf32>
    %cst_60 = arith.constant dense<0.000000e+00> : vector<128xf32>
    %77 = vector.multi_reduction <add>, %76, %cst_60 [0] : vector<128x128xf32> to vector<128xf32>
    %78 = vector.shape_cast %77 : vector<128xf32> to vector<1x128xf32>
    %79 = arith.addf %0, %78 : vector<1x128xf32>
    %80 = arith.mulf %76, %76 : vector<128x128xf32>
    %cst_61 = arith.constant dense<0.000000e+00> : vector<128xf32>
    %81 = vector.multi_reduction <add>, %80, %cst_61 [0] : vector<128x128xf32> to vector<128xf32>
    %82 = vector.shape_cast %81 : vector<128xf32> to vector<1x128xf32>
    %83 = arith.addf %1, %82 : vector<1x128xf32>
    %c0_62 = arith.constant 0 : index
    %c0_63 = arith.constant 0 : index
    %c0_64 = arith.constant 0 : index
    %84 = vector.load %arg4[%c0_62, %c0_63, %c0_64] : memref<1x2x128xf32, #tpu.memory_space<vmem>>, vector<1x1x128xf32>
    %85 = vector.shape_cast %84 : vector<1x1x128xf32> to vector<1x128xf32>
    %86 = vector.shape_cast %79 : vector<1x128xf32> to vector<1x1x128xf32>
    tpu.vector_store %arg4[%c0_62, %c0_63, %c0_64], %86 {strides = array<i32>} : memref<1x2x128xf32, #tpu.memory_space<vmem>>, vector<1x1x128xf32>,
    %c0_65 = arith.constant 0 : index
    %c1_66 = arith.constant 1 : index
    %c0_67 = arith.constant 0 : index
    %87 = vector.load %arg4[%c0_65, %c1_66, %c0_67] : memref<1x2x128xf32, #tpu.memory_space<vmem>>, vector<1x1x128xf32>
    %88 = vector.shape_cast %87 : vector<1x1x128xf32> to vector<1x128xf32>
    %89 = vector.shape_cast %83 : vector<1x128xf32> to vector<1x1x128xf32>
    tpu.vector_store %arg4[%c0_65, %c1_66, %c0_67], %89 {strides = array<i32>} : memref<1x2x128xf32, #tpu.memory_space<vmem>>, vector<1x1x128xf32>,
    return
  }
  func.func @transform_0(%arg0: i32) -> (i32, i32, i32, i32) {
    %c0_i32 = arith.constant 0 : i32
    %c0_i32_0 = arith.constant 0 : i32
    %c0_i32_1 = arith.constant 0 : i32
    %c0_i32_2 = arith.constant 0 : i32
    return %arg0, %c0_i32, %c0_i32_0, %c0_i32_1 : i32, i32, i32, i32
  }
  func.func @transform_1(%arg0: i32) -> (i32, i32) {
    %c0_i32 = arith.constant 0 : i32
    %c0_i32_0 = arith.constant 0 : i32
    %c0_i32_1 = arith.constant 0 : i32
    return %c0_i32, %c0_i32_0 : i32, i32
  }
  func.func @transform_2(%arg0: i32) -> (i32, i32, i32) {
    %c0_i32 = arith.constant 0 : i32
    %c0_i32_0 = arith.constant 0 : i32
    %c0_i32_1 = arith.constant 0 : i32
    return %arg0, %c0_i32, %c0_i32_0 : i32, i32, i32
  }
  func.func @transform_3(%arg0: i32) -> (i32, i32, i32) {
    %c0_i32 = arith.constant 0 : i32
    %c0_i32_0 = arith.constant 0 : i32
    %c0_i32_1 = arith.constant 0 : i32
    return %arg0, %c0_i32, %c0_i32_0 : i32, i32, i32
  }
}

module attributes {stable_mosaic.version = 11 : i64} {
  func.func @_conv2_kernel(%arg0: i32, %arg1: memref<1x128x128xbf16, #tpu.memory_space<vmem>>, %arg2: memref<1152x128xbf16, #tpu.memory_space<vmem>>, %arg3: memref<1x128xf32, #tpu.memory_space<vmem>>, %arg4: memref<1x128xf32, #tpu.memory_space<vmem>>, %arg5: memref<1x128x128xbf16, #tpu.memory_space<vmem>>, %arg6: memref<1x2x128xf32, #tpu.memory_space<vmem>>, %arg7: memref<168x128xbf16, #tpu.memory_space<vmem>>) attributes {dimension_semantics = [#tpu.dimension_semantics<parallel>], iteration_bounds = array<i64: 2>, scalar_prefetch = 0 : i64, scratch_operands = 1 : i64, tpu.core_type = #tpu.core_type<tc>, window_params = [{transform_indices = @transform_0, window_bounds = array<i64: 1, 128, 128>}, {pipeline_mode = #tpu.pipeline_mode<synchronous>, transform_indices = @transform_1, window_bounds = array<i64: 1152, 128>}, {pipeline_mode = #tpu.pipeline_mode<synchronous>, transform_indices = @transform_2, window_bounds = array<i64: 1, 128>}, {pipeline_mode = #tpu.pipeline_mode<synchronous>, transform_indices = @transform_3, window_bounds = array<i64: 1, 128>}, {transform_indices = @transform_4, window_bounds = array<i64: 1, 128, 128>}, {transform_indices = @transform_5, window_bounds = array<i64: 1, 2, 128>}]} {
    %0 = tpu.iota {dimensions = array<i32: 0>} : vector<128x1xi32>
    %c16_i32 = arith.constant 16 : i32
    %c0_i32 = arith.constant 0 : i32
    %1 = arith.cmpi eq, %c16_i32, %c0_i32 : i32
    %c1_i32 = arith.constant 1 : i32
    %2 = arith.select %1, %c1_i32, %c16_i32 : i32
    %3 = vector.broadcast %2 : i32 to vector<128x1xi32>
    %4 = arith.remsi %0, %3 : vector<128x1xi32>
    %c0_i32_0 = arith.constant 0 : i32
    %5 = vector.broadcast %c0_i32_0 : i32 to vector<128x1xi32>
    %6 = arith.cmpi ne, %4, %5 : vector<128x1xi32>
    %c0_i32_1 = arith.constant 0 : i32
    %7 = vector.broadcast %c0_i32_1 : i32 to vector<128x1xi32>
    %8 = arith.cmpi slt, %4, %7 : vector<128x1xi32>
    %c0_i32_2 = arith.constant 0 : i32
    %9 = arith.cmpi slt, %2, %c0_i32_2 : i32
    %10 = vector.broadcast %9 : i1 to vector<128x1xi1>
    %11 = vector.broadcast %10 : vector<128x1xi1> to vector<128x1xi1>
    %12 = arith.xori %8, %11 : vector<128x1xi1>
    %13 = arith.andi %12, %6 : vector<128x1xi1>
    %14 = vector.broadcast %2 : i32 to vector<128x1xi32>
    %15 = arith.addi %4, %14 : vector<128x1xi32>
    %16 = arith.select %13, %15, %4 : vector<128x1xi1>, vector<128x1xi32>
    %c0 = arith.constant 0 : index
    %c0_3 = arith.constant 0 : index
    %c0_4 = arith.constant 0 : index
    %17 = vector.load %arg1[%c0, %c0_3, %c0_4] : memref<1x128x128xbf16, #tpu.memory_space<vmem>>, vector<1x128x128xbf16>
    %18 = vector.shape_cast %17 : vector<1x128x128xbf16> to vector<128x128xbf16>
    %19 = arith.extf %18 : vector<128x128xbf16> to vector<128x128xf32>
    %c0_5 = arith.constant 0 : index
    %c0_6 = arith.constant 0 : index
    %20 = vector.load %arg3[%c0_5, %c0_6] : memref<1x128xf32, #tpu.memory_space<vmem>>, vector<1x128xf32>
    %21 = vector.broadcast %20 : vector<1x128xf32> to vector<128x128xf32>
    %22 = arith.mulf %19, %21 : vector<128x128xf32>
    %c0_7 = arith.constant 0 : index
    %c0_8 = arith.constant 0 : index
    %23 = vector.load %arg4[%c0_7, %c0_8] : memref<1x128xf32, #tpu.memory_space<vmem>>, vector<1x128xf32>
    %24 = vector.broadcast %23 : vector<1x128xf32> to vector<128x128xf32>
    %25 = arith.addf %22, %24 : vector<128x128xf32>
    %c8_i32 = arith.constant 8 : i32
    %26 = vector.broadcast %c8_i32 : i32 to vector<128x1xi32>
    %27 = arith.cmpi slt, %16, %26 : vector<128x1xi32>
    %cst = arith.constant 0.000000e+00 : f32
    %28 = vector.broadcast %cst : f32 to vector<128x128xf32>
    %29 = arith.maximumf %25, %28 : vector<128x128xf32>
    %cst_9 = arith.constant 0.000000e+00 : f32
    %30 = vector.shape_cast %27 : vector<128x1xi1> to vector<128x1xi1>
    %31 = vector.broadcast %30 : vector<128x1xi1> to vector<128x128xi1>
    %32 = vector.broadcast %cst_9 : f32 to vector<128x128xf32>
    %33 = arith.select %31, %29, %32 : vector<128x128xi1>, vector<128x128xf32>
    %34 = arith.truncf %33 : vector<128x128xf32> to vector<128x128xbf16>
    %cst_10 = arith.constant 0.000000e+00 : bf16
    %35 = vector.broadcast %cst_10 : bf16 to vector<17x128xbf16>
    %c0_11 = arith.constant 0 : index
    %c0_12 = arith.constant 0 : index
    %36 = vector.load %arg7[%c0_11, %c0_12] : memref<168x128xbf16, #tpu.memory_space<vmem>>, vector<17x128xbf16>
    tpu.vector_store %arg7[%c0_11, %c0_12], %35 {strides = array<i32>} : memref<168x128xbf16, #tpu.memory_space<vmem>>, vector<17x128xbf16>,
    %c17 = arith.constant 17 : index
    %c0_13 = arith.constant 0 : index
    %37 = vector.load %arg7[%c17, %c0_13] : memref<168x128xbf16, #tpu.memory_space<vmem>>, vector<128x128xbf16>
    tpu.vector_store %arg7[%c17, %c0_13], %34 {strides = array<i32>} : memref<168x128xbf16, #tpu.memory_space<vmem>>, vector<128x128xbf16>,
    %cst_14 = arith.constant 0.000000e+00 : bf16
    %38 = vector.broadcast %cst_14 : bf16 to vector<23x128xbf16>
    %c145 = arith.constant 145 : index
    %c0_15 = arith.constant 0 : index
    %39 = vector.load %arg7[%c145, %c0_15] : memref<168x128xbf16, #tpu.memory_space<vmem>>, vector<23x128xbf16>
    tpu.vector_store %arg7[%c145, %c0_15], %38 {strides = array<i32>} : memref<168x128xbf16, #tpu.memory_space<vmem>>, vector<23x128xbf16>,
    %cst_16 = arith.constant 0.000000e+00 : f32
    %40 = vector.broadcast %cst_16 : f32 to vector<1x128xf32>
    %cst_17 = arith.constant 0.000000e+00 : f32
    %41 = vector.broadcast %cst_17 : f32 to vector<1x128xf32>
    %c0_18 = arith.constant 0 : index
    %c0_19 = arith.constant 0 : index
    %42 = vector.load %arg7[%c0_18, %c0_19] : memref<168x128xbf16, #tpu.memory_space<vmem>>, vector<128x128xbf16>
    %c1 = arith.constant 1 : index
    %c0_20 = arith.constant 0 : index
    %43 = vector.load %arg7[%c1, %c0_20] : memref<168x128xbf16, #tpu.memory_space<vmem>>, vector<128x128xbf16>
    %c2 = arith.constant 2 : index
    %c0_21 = arith.constant 0 : index
    %44 = vector.load %arg7[%c2, %c0_21] : memref<168x128xbf16, #tpu.memory_space<vmem>>, vector<128x128xbf16>
    %c16 = arith.constant 16 : index
    %c0_22 = arith.constant 0 : index
    %45 = vector.load %arg7[%c16, %c0_22] : memref<168x128xbf16, #tpu.memory_space<vmem>>, vector<128x128xbf16>
    %c17_23 = arith.constant 17 : index
    %c0_24 = arith.constant 0 : index
    %46 = vector.load %arg7[%c17_23, %c0_24] : memref<168x128xbf16, #tpu.memory_space<vmem>>, vector<128x128xbf16>
    %c18 = arith.constant 18 : index
    %c0_25 = arith.constant 0 : index
    %47 = vector.load %arg7[%c18, %c0_25] : memref<168x128xbf16, #tpu.memory_space<vmem>>, vector<128x128xbf16>
    %c32 = arith.constant 32 : index
    %c0_26 = arith.constant 0 : index
    %48 = vector.load %arg7[%c32, %c0_26] : memref<168x128xbf16, #tpu.memory_space<vmem>>, vector<128x128xbf16>
    %c33 = arith.constant 33 : index
    %c0_27 = arith.constant 0 : index
    %49 = vector.load %arg7[%c33, %c0_27] : memref<168x128xbf16, #tpu.memory_space<vmem>>, vector<128x128xbf16>
    %c34 = arith.constant 34 : index
    %c0_28 = arith.constant 0 : index
    %50 = vector.load %arg7[%c34, %c0_28] : memref<168x128xbf16, #tpu.memory_space<vmem>>, vector<128x128xbf16>
    %51 = tpu.concatenate %42, %43, %44, %45, %46, %47, %48, %49, %50 in 1 : vector<128x128xbf16>, vector<128x128xbf16>, vector<128x128xbf16>, vector<128x128xbf16>, vector<128x128xbf16>, vector<128x128xbf16>, vector<128x128xbf16>, vector<128x128xbf16>, vector<128x128xbf16> -> vector<128x1152xbf16>
    %c0_29 = arith.constant 0 : index
    %c0_30 = arith.constant 0 : index
    %52 = vector.load %arg2[%c0_29, %c0_30] : memref<1152x128xbf16, #tpu.memory_space<vmem>>, vector<1152x128xbf16>
    %cst_31 = arith.constant dense<0.000000e+00> : vector<128x128xf32>
    %53 = tpu.matmul %51, %52, %cst_31 {dimension_numbers = #tpu.dot_dimension_numbers<[1], [0], [0], [1], [0, 0, 1, 1], [], []>} : vector<128x1152xbf16>, vector<1152x128xbf16>, vector<128x128xf32> -> vector<128x128xf32>
    %54 = arith.truncf %53 : vector<128x128xf32> to vector<128x128xbf16>
    %c0_32 = arith.constant 0 : index
    %c0_33 = arith.constant 0 : index
    %c0_34 = arith.constant 0 : index
    %55 = vector.load %arg5[%c0_32, %c0_33, %c0_34] : memref<1x128x128xbf16, #tpu.memory_space<vmem>>, vector<1x128x128xbf16>
    %56 = vector.shape_cast %55 : vector<1x128x128xbf16> to vector<128x128xbf16>
    %57 = vector.shape_cast %54 : vector<128x128xbf16> to vector<1x128x128xbf16>
    tpu.vector_store %arg5[%c0_32, %c0_33, %c0_34], %57 {strides = array<i32>} : memref<1x128x128xbf16, #tpu.memory_space<vmem>>, vector<1x128x128xbf16>,
    %58 = tpu.iota {dimensions = array<i32: 0>} : vector<128x1xi32>
    %c0_i32_35 = arith.constant 0 : i32
    %59 = vector.broadcast %c0_i32_35 : i32 to vector<128x1xi32>
    %60 = arith.addi %58, %59 : vector<128x1xi32>
    %c16_i32_36 = arith.constant 16 : i32
    %c0_i32_37 = arith.constant 0 : i32
    %61 = arith.cmpi eq, %c16_i32_36, %c0_i32_37 : i32
    %c1_i32_38 = arith.constant 1 : i32
    %62 = arith.select %61, %c1_i32_38, %c16_i32_36 : i32
    %63 = vector.broadcast %62 : i32 to vector<128x1xi32>
    %64 = arith.remsi %60, %63 : vector<128x1xi32>
    %c0_i32_39 = arith.constant 0 : i32
    %65 = vector.broadcast %c0_i32_39 : i32 to vector<128x1xi32>
    %66 = arith.cmpi ne, %64, %65 : vector<128x1xi32>
    %c0_i32_40 = arith.constant 0 : i32
    %67 = vector.broadcast %c0_i32_40 : i32 to vector<128x1xi32>
    %68 = arith.cmpi slt, %64, %67 : vector<128x1xi32>
    %c0_i32_41 = arith.constant 0 : i32
    %69 = arith.cmpi slt, %62, %c0_i32_41 : i32
    %70 = vector.broadcast %69 : i1 to vector<128x1xi1>
    %71 = vector.broadcast %70 : vector<128x1xi1> to vector<128x1xi1>
    %72 = arith.xori %68, %71 : vector<128x1xi1>
    %73 = arith.andi %72, %66 : vector<128x1xi1>
    %74 = vector.broadcast %62 : i32 to vector<128x1xi32>
    %75 = arith.addi %64, %74 : vector<128x1xi32>
    %76 = arith.select %73, %75, %64 : vector<128x1xi1>, vector<128x1xi32>
    %c8_i32_42 = arith.constant 8 : i32
    %77 = vector.broadcast %c8_i32_42 : i32 to vector<128x1xi32>
    %78 = arith.cmpi slt, %76, %77 : vector<128x1xi32>
    %cst_43 = arith.constant 0.000000e+00 : f32
    %79 = vector.shape_cast %78 : vector<128x1xi1> to vector<128x1xi1>
    %80 = vector.broadcast %79 : vector<128x1xi1> to vector<128x128xi1>
    %81 = vector.broadcast %cst_43 : f32 to vector<128x128xf32>
    %82 = arith.select %80, %53, %81 : vector<128x128xi1>, vector<128x128xf32>
    %cst_44 = arith.constant dense<0.000000e+00> : vector<128xf32>
    %83 = vector.multi_reduction <add>, %82, %cst_44 [0] : vector<128x128xf32> to vector<128xf32>
    %84 = vector.shape_cast %83 : vector<128xf32> to vector<1x128xf32>
    %85 = arith.addf %40, %84 : vector<1x128xf32>
    %86 = arith.mulf %82, %82 : vector<128x128xf32>
    %cst_45 = arith.constant dense<0.000000e+00> : vector<128xf32>
    %87 = vector.multi_reduction <add>, %86, %cst_45 [0] : vector<128x128xf32> to vector<128xf32>
    %88 = vector.shape_cast %87 : vector<128xf32> to vector<1x128xf32>
    %89 = arith.addf %41, %88 : vector<1x128xf32>
    %c0_46 = arith.constant 0 : index
    %c0_47 = arith.constant 0 : index
    %c0_48 = arith.constant 0 : index
    %90 = vector.load %arg6[%c0_46, %c0_47, %c0_48] : memref<1x2x128xf32, #tpu.memory_space<vmem>>, vector<1x1x128xf32>
    %91 = vector.shape_cast %90 : vector<1x1x128xf32> to vector<1x128xf32>
    %92 = vector.shape_cast %85 : vector<1x128xf32> to vector<1x1x128xf32>
    tpu.vector_store %arg6[%c0_46, %c0_47, %c0_48], %92 {strides = array<i32>} : memref<1x2x128xf32, #tpu.memory_space<vmem>>, vector<1x1x128xf32>,
    %c0_49 = arith.constant 0 : index
    %c1_50 = arith.constant 1 : index
    %c0_51 = arith.constant 0 : index
    %93 = vector.load %arg6[%c0_49, %c1_50, %c0_51] : memref<1x2x128xf32, #tpu.memory_space<vmem>>, vector<1x1x128xf32>
    %94 = vector.shape_cast %93 : vector<1x1x128xf32> to vector<1x128xf32>
    %95 = vector.shape_cast %89 : vector<1x128xf32> to vector<1x1x128xf32>
    tpu.vector_store %arg6[%c0_49, %c1_50, %c0_51], %95 {strides = array<i32>} : memref<1x2x128xf32, #tpu.memory_space<vmem>>, vector<1x1x128xf32>,
    return
  }
  func.func @transform_0(%arg0: i32) -> (i32, i32, i32) {
    %c0_i32 = arith.constant 0 : i32
    %c0_i32_0 = arith.constant 0 : i32
    %c0_i32_1 = arith.constant 0 : i32
    return %arg0, %c0_i32, %c0_i32_0 : i32, i32, i32
  }
  func.func @transform_1(%arg0: i32) -> (i32, i32) {
    %c0_i32 = arith.constant 0 : i32
    %c0_i32_0 = arith.constant 0 : i32
    %c0_i32_1 = arith.constant 0 : i32
    return %c0_i32, %c0_i32_0 : i32, i32
  }
  func.func @transform_2(%arg0: i32) -> (i32, i32) {
    %c0_i32 = arith.constant 0 : i32
    %c0_i32_0 = arith.constant 0 : i32
    %c0_i32_1 = arith.constant 0 : i32
    return %c0_i32, %c0_i32_0 : i32, i32
  }
  func.func @transform_3(%arg0: i32) -> (i32, i32) {
    %c0_i32 = arith.constant 0 : i32
    %c0_i32_0 = arith.constant 0 : i32
    %c0_i32_1 = arith.constant 0 : i32
    return %c0_i32, %c0_i32_0 : i32, i32
  }
  func.func @transform_4(%arg0: i32) -> (i32, i32, i32) {
    %c0_i32 = arith.constant 0 : i32
    %c0_i32_0 = arith.constant 0 : i32
    %c0_i32_1 = arith.constant 0 : i32
    return %arg0, %c0_i32, %c0_i32_0 : i32, i32, i32
  }
  func.func @transform_5(%arg0: i32) -> (i32, i32, i32) {
    %c0_i32 = arith.constant 0 : i32
    %c0_i32_0 = arith.constant 0 : i32
    %c0_i32_1 = arith.constant 0 : i32
    return %arg0, %c0_i32, %c0_i32_0 : i32, i32, i32
  }
}

module attributes {stable_mosaic.version = 11 : i64} {
  func.func @_conv_kernel(%arg0: i32, %arg1: memref<1x1x128x4xbf16, #tpu.memory_space<vmem>>, %arg2: memref<4x128xbf16, #tpu.memory_space<vmem>>, %arg3: memref<1x128x128xbf16, #tpu.memory_space<vmem>>, %arg4: memref<1x2x128xf32, #tpu.memory_space<vmem>>) attributes {dimension_semantics = [#tpu.dimension_semantics<parallel>], iteration_bounds = array<i64: 2>, scalar_prefetch = 0 : i64, scratch_operands = 0 : i64, tpu.core_type = #tpu.core_type<tc>, window_params = [{transform_indices = @transform_0, window_bounds = array<i64: 1, 1, 128, 4>}, {pipeline_mode = #tpu.pipeline_mode<synchronous>, transform_indices = @transform_1, window_bounds = array<i64: 4, 128>}, {transform_indices = @transform_2, window_bounds = array<i64: 1, 128, 128>}, {transform_indices = @transform_3, window_bounds = array<i64: 1, 2, 128>}]} {
    %cst = arith.constant 0.000000e+00 : f32
    %0 = vector.broadcast %cst : f32 to vector<1x128xf32>
    %cst_0 = arith.constant 0.000000e+00 : f32
    %1 = vector.broadcast %cst_0 : f32 to vector<1x128xf32>
    %c0 = arith.constant 0 : index
    %c0_1 = arith.constant 0 : index
    %c0_2 = arith.constant 0 : index
    %c0_3 = arith.constant 0 : index
    %2 = vector.load %arg1[%c0, %c0_1, %c0_2, %c0_3] : memref<1x1x128x4xbf16, #tpu.memory_space<vmem>>, vector<1x1x128x4xbf16>
    %3 = vector.shape_cast %2 : vector<1x1x128x4xbf16> to vector<128x4xbf16>
    %c0_4 = arith.constant 0 : index
    %c0_5 = arith.constant 0 : index
    %4 = vector.load %arg2[%c0_4, %c0_5] : memref<4x128xbf16, #tpu.memory_space<vmem>>, vector<4x128xbf16>
    %cst_6 = arith.constant dense<0.000000e+00> : vector<128x128xf32>
    %5 = tpu.matmul %3, %4, %cst_6 {dimension_numbers = #tpu.dot_dimension_numbers<[1], [0], [0], [1], [0, 0, 1, 1], [], []>} : vector<128x4xbf16>, vector<4x128xbf16>, vector<128x128xf32> -> vector<128x128xf32>
    %6 = arith.truncf %5 : vector<128x128xf32> to vector<128x128xbf16>
    %c0_7 = arith.constant 0 : index
    %c0_8 = arith.constant 0 : index
    %c0_9 = arith.constant 0 : index
    %7 = vector.load %arg3[%c0_7, %c0_8, %c0_9] : memref<1x128x128xbf16, #tpu.memory_space<vmem>>, vector<1x128x128xbf16>
    %8 = vector.shape_cast %7 : vector<1x128x128xbf16> to vector<128x128xbf16>
    %9 = vector.shape_cast %6 : vector<128x128xbf16> to vector<1x128x128xbf16>
    tpu.vector_store %arg3[%c0_7, %c0_8, %c0_9], %9 {strides = array<i32>} : memref<1x128x128xbf16, #tpu.memory_space<vmem>>, vector<1x128x128xbf16>,
    %10 = tpu.iota {dimensions = array<i32: 0>} : vector<128x1xi32>
    %c0_i32 = arith.constant 0 : i32
    %11 = vector.broadcast %c0_i32 : i32 to vector<128x1xi32>
    %12 = arith.addi %10, %11 : vector<128x1xi32>
    %c16_i32 = arith.constant 16 : i32
    %c0_i32_10 = arith.constant 0 : i32
    %13 = arith.cmpi eq, %c16_i32, %c0_i32_10 : i32
    %c1_i32 = arith.constant 1 : i32
    %14 = arith.select %13, %c1_i32, %c16_i32 : i32
    %15 = vector.broadcast %14 : i32 to vector<128x1xi32>
    %16 = arith.remsi %12, %15 : vector<128x1xi32>
    %c0_i32_11 = arith.constant 0 : i32
    %17 = vector.broadcast %c0_i32_11 : i32 to vector<128x1xi32>
    %18 = arith.cmpi ne, %16, %17 : vector<128x1xi32>
    %c0_i32_12 = arith.constant 0 : i32
    %19 = vector.broadcast %c0_i32_12 : i32 to vector<128x1xi32>
    %20 = arith.cmpi slt, %16, %19 : vector<128x1xi32>
    %c0_i32_13 = arith.constant 0 : i32
    %21 = arith.cmpi slt, %14, %c0_i32_13 : i32
    %22 = vector.broadcast %21 : i1 to vector<128x1xi1>
    %23 = vector.broadcast %22 : vector<128x1xi1> to vector<128x1xi1>
    %24 = arith.xori %20, %23 : vector<128x1xi1>
    %25 = arith.andi %24, %18 : vector<128x1xi1>
    %26 = vector.broadcast %14 : i32 to vector<128x1xi32>
    %27 = arith.addi %16, %26 : vector<128x1xi32>
    %28 = arith.select %25, %27, %16 : vector<128x1xi1>, vector<128x1xi32>
    %c8_i32 = arith.constant 8 : i32
    %29 = vector.broadcast %c8_i32 : i32 to vector<128x1xi32>
    %30 = arith.cmpi slt, %28, %29 : vector<128x1xi32>
    %cst_14 = arith.constant 0.000000e+00 : f32
    %31 = vector.shape_cast %30 : vector<128x1xi1> to vector<128x1xi1>
    %32 = vector.broadcast %31 : vector<128x1xi1> to vector<128x128xi1>
    %33 = vector.broadcast %cst_14 : f32 to vector<128x128xf32>
    %34 = arith.select %32, %5, %33 : vector<128x128xi1>, vector<128x128xf32>
    %cst_15 = arith.constant dense<0.000000e+00> : vector<128xf32>
    %35 = vector.multi_reduction <add>, %34, %cst_15 [0] : vector<128x128xf32> to vector<128xf32>
    %36 = vector.shape_cast %35 : vector<128xf32> to vector<1x128xf32>
    %37 = arith.addf %0, %36 : vector<1x128xf32>
    %38 = arith.mulf %34, %34 : vector<128x128xf32>
    %cst_16 = arith.constant dense<0.000000e+00> : vector<128xf32>
    %39 = vector.multi_reduction <add>, %38, %cst_16 [0] : vector<128x128xf32> to vector<128xf32>
    %40 = vector.shape_cast %39 : vector<128xf32> to vector<1x128xf32>
    %41 = arith.addf %1, %40 : vector<1x128xf32>
    %c0_17 = arith.constant 0 : index
    %c0_18 = arith.constant 0 : index
    %c0_19 = arith.constant 0 : index
    %42 = vector.load %arg4[%c0_17, %c0_18, %c0_19] : memref<1x2x128xf32, #tpu.memory_space<vmem>>, vector<1x1x128xf32>
    %43 = vector.shape_cast %42 : vector<1x1x128xf32> to vector<1x128xf32>
    %44 = vector.shape_cast %37 : vector<1x128xf32> to vector<1x1x128xf32>
    tpu.vector_store %arg4[%c0_17, %c0_18, %c0_19], %44 {strides = array<i32>} : memref<1x2x128xf32, #tpu.memory_space<vmem>>, vector<1x1x128xf32>,
    %c0_20 = arith.constant 0 : index
    %c1 = arith.constant 1 : index
    %c0_21 = arith.constant 0 : index
    %45 = vector.load %arg4[%c0_20, %c1, %c0_21] : memref<1x2x128xf32, #tpu.memory_space<vmem>>, vector<1x1x128xf32>
    %46 = vector.shape_cast %45 : vector<1x1x128xf32> to vector<1x128xf32>
    %47 = vector.shape_cast %41 : vector<1x128xf32> to vector<1x1x128xf32>
    tpu.vector_store %arg4[%c0_20, %c1, %c0_21], %47 {strides = array<i32>} : memref<1x2x128xf32, #tpu.memory_space<vmem>>, vector<1x1x128xf32>,
    return
  }
  func.func @transform_0(%arg0: i32) -> (i32, i32, i32, i32) {
    %c0_i32 = arith.constant 0 : i32
    %c0_i32_0 = arith.constant 0 : i32
    %c0_i32_1 = arith.constant 0 : i32
    %c0_i32_2 = arith.constant 0 : i32
    return %arg0, %c0_i32, %c0_i32_0, %c0_i32_1 : i32, i32, i32, i32
  }
  func.func @transform_1(%arg0: i32) -> (i32, i32) {
    %c0_i32 = arith.constant 0 : i32
    %c0_i32_0 = arith.constant 0 : i32
    %c0_i32_1 = arith.constant 0 : i32
    return %c0_i32, %c0_i32_0 : i32, i32
  }
  func.func @transform_2(%arg0: i32) -> (i32, i32, i32) {
    %c0_i32 = arith.constant 0 : i32
    %c0_i32_0 = arith.constant 0 : i32
    %c0_i32_1 = arith.constant 0 : i32
    return %arg0, %c0_i32, %c0_i32_0 : i32, i32, i32
  }
  func.func @transform_3(%arg0: i32) -> (i32, i32, i32) {
    %c0_i32 = arith.constant 0 : i32
    %c0_i32_0 = arith.constant 0 : i32
    %c0_i32_1 = arith.constant 0 : i32
    return %arg0, %c0_i32, %c0_i32_0 : i32, i32, i32
  }
}

module attributes {stable_mosaic.version = 11 : i64} {
  func.func @_final_kernel(%arg0: i32, %arg1: memref<256x128xbf16, #tpu.memory_space<vmem>>, %arg2: memref<1x128xf32, #tpu.memory_space<vmem>>, %arg3: memref<1x128xf32, #tpu.memory_space<vmem>>, %arg4: memref<256x128xbf16, #tpu.memory_space<vmem>>, %arg5: memref<1x128xf32, #tpu.memory_space<vmem>>, %arg6: memref<1x128xf32, #tpu.memory_space<vmem>>, %arg7: memref<256x128xf32, #tpu.memory_space<vmem>>) attributes {dimension_semantics = [#tpu.dimension_semantics<parallel>], iteration_bounds = array<i64: 1>, scalar_prefetch = 0 : i64, scratch_operands = 0 : i64, tpu.core_type = #tpu.core_type<tc>, window_params = [{transform_indices = @transform_0, window_bounds = array<i64: 256, 128>}, {pipeline_mode = #tpu.pipeline_mode<synchronous>, transform_indices = @transform_1, window_bounds = array<i64: 1, 128>}, {pipeline_mode = #tpu.pipeline_mode<synchronous>, transform_indices = @transform_2, window_bounds = array<i64: 1, 128>}, {transform_indices = @transform_3, window_bounds = array<i64: 256, 128>}, {pipeline_mode = #tpu.pipeline_mode<synchronous>, transform_indices = @transform_4, window_bounds = array<i64: 1, 128>}, {pipeline_mode = #tpu.pipeline_mode<synchronous>, transform_indices = @transform_5, window_bounds = array<i64: 1, 128>}, {transform_indices = @transform_6, window_bounds = array<i64: 256, 128>}]} {
    %c0 = arith.constant 0 : index
    %c0_0 = arith.constant 0 : index
    %0 = vector.load %arg1[%c0, %c0_0] : memref<256x128xbf16, #tpu.memory_space<vmem>>, vector<256x128xbf16>
    %1 = arith.extf %0 : vector<256x128xbf16> to vector<256x128xf32>
    %c0_1 = arith.constant 0 : index
    %c0_2 = arith.constant 0 : index
    %2 = vector.load %arg2[%c0_1, %c0_2] : memref<1x128xf32, #tpu.memory_space<vmem>>, vector<1x128xf32>
    %3 = vector.broadcast %2 : vector<1x128xf32> to vector<256x128xf32>
    %4 = arith.mulf %1, %3 : vector<256x128xf32>
    %c0_3 = arith.constant 0 : index
    %c0_4 = arith.constant 0 : index
    %5 = vector.load %arg3[%c0_3, %c0_4] : memref<1x128xf32, #tpu.memory_space<vmem>>, vector<1x128xf32>
    %6 = vector.broadcast %5 : vector<1x128xf32> to vector<256x128xf32>
    %7 = arith.addf %4, %6 : vector<256x128xf32>
    %c0_5 = arith.constant 0 : index
    %c0_6 = arith.constant 0 : index
    %8 = vector.load %arg4[%c0_5, %c0_6] : memref<256x128xbf16, #tpu.memory_space<vmem>>, vector<256x128xbf16>
    %9 = arith.extf %8 : vector<256x128xbf16> to vector<256x128xf32>
    %c0_7 = arith.constant 0 : index
    %c0_8 = arith.constant 0 : index
    %10 = vector.load %arg5[%c0_7, %c0_8] : memref<1x128xf32, #tpu.memory_space<vmem>>, vector<1x128xf32>
    %11 = vector.broadcast %10 : vector<1x128xf32> to vector<256x128xf32>
    %12 = arith.mulf %9, %11 : vector<256x128xf32>
    %13 = arith.addf %7, %12 : vector<256x128xf32>
    %c0_9 = arith.constant 0 : index
    %c0_10 = arith.constant 0 : index
    %14 = vector.load %arg6[%c0_9, %c0_10] : memref<1x128xf32, #tpu.memory_space<vmem>>, vector<1x128xf32>
    %15 = vector.broadcast %14 : vector<1x128xf32> to vector<256x128xf32>
    %16 = arith.addf %13, %15 : vector<256x128xf32>
    %cst = arith.constant 0.000000e+00 : f32
    %17 = vector.broadcast %cst : f32 to vector<256x128xf32>
    %18 = arith.maximumf %16, %17 : vector<256x128xf32>
    %c0_11 = arith.constant 0 : index
    %c0_12 = arith.constant 0 : index
    %19 = vector.load %arg7[%c0_11, %c0_12] : memref<256x128xf32, #tpu.memory_space<vmem>>, vector<256x128xf32>
    tpu.vector_store %arg7[%c0_11, %c0_12], %18 {strides = array<i32>} : memref<256x128xf32, #tpu.memory_space<vmem>>, vector<256x128xf32>,
    return
  }
  func.func @transform_0(%arg0: i32) -> (i32, i32) {
    %c0_i32 = arith.constant 0 : i32
    %c0_i32_0 = arith.constant 0 : i32
    return %arg0, %c0_i32 : i32, i32
  }
  func.func @transform_1(%arg0: i32) -> (i32, i32) {
    %c0_i32 = arith.constant 0 : i32
    %c0_i32_0 = arith.constant 0 : i32
    %c0_i32_1 = arith.constant 0 : i32
    return %c0_i32, %c0_i32_0 : i32, i32
  }
  func.func @transform_2(%arg0: i32) -> (i32, i32) {
    %c0_i32 = arith.constant 0 : i32
    %c0_i32_0 = arith.constant 0 : i32
    %c0_i32_1 = arith.constant 0 : i32
    return %c0_i32, %c0_i32_0 : i32, i32
  }
  func.func @transform_3(%arg0: i32) -> (i32, i32) {
    %c0_i32 = arith.constant 0 : i32
    %c0_i32_0 = arith.constant 0 : i32
    return %arg0, %c0_i32 : i32, i32
  }
  func.func @transform_4(%arg0: i32) -> (i32, i32) {
    %c0_i32 = arith.constant 0 : i32
    %c0_i32_0 = arith.constant 0 : i32
    %c0_i32_1 = arith.constant 0 : i32
    return %c0_i32, %c0_i32_0 : i32, i32
  }
  func.func @transform_5(%arg0: i32) -> (i32, i32) {
    %c0_i32 = arith.constant 0 : i32
    %c0_i32_0 = arith.constant 0 : i32
    %c0_i32_1 = arith.constant 0 : i32
    return %c0_i32, %c0_i32_0 : i32, i32
  }
  func.func @transform_6(%arg0: i32) -> (i32, i32) {
    %c0_i32 = arith.constant 0 : i32
    %c0_i32_0 = arith.constant 0 : i32
    return %arg0, %c0_i32 : i32, i32
  }
}

</mosaic_0001>

<bundles_post_ra>
// kernel: residual_block_forward.6
= control target key start
LH: loop header
LB: loop body
LE: loop exit
PB: predicated region body
PF: predicated region fallthrough
CT: control target
= control target key end

     0   :  { %s1051_s12 = smov 0   ;;  %s1096_s0 = inlined_call_operand.vmem [shape: bf16[2,1,128,4], index: 0, kind: input, shape index: {}]   ;;  %s1097_s1 = inlined_call_operand.vmem [shape: bf16[4,128], index: 1, kind: input, shape index: {}]   ;;  %s1098_s2 = inlined_call_operand.vmem [shape: bf16[2,128,128], index: 2, kind: output, shape index: {0}]   ;;  %s1099_s3 = inlined_call_operand.vmem [shape: f32[2,2,128], index: 3, kind: output, shape index: {1}]  }
   0x1 LB: > { %s867_s13 = sadd.s32 4294967295, %s1029_s12   ;;  %p871_p0 = scmp.ge.s32.totalorder %s1029_s12, 1  ;;  %s1029_s12 = sphi %s1051_s12, %s14_s12  }
   0x2   : > { %p140_p1 = scmp.lt.s32.totalorder %s1029_s12, 3 }
   0x4   : > { %p141_p2 = pnand %p871_p0, %p140_p1 }
   0x5   : > { %v199_v0 = vld [vmem:[%s1097_s1] sm:$0x3] (!%p141_p2)  ;;  %vm265_vm0 = vcmask (!%p141_p2), 1041408   ;;  %p168_p3 = scmp.lt.s32.totalorder (!%p141_p2), %s867_s13, 1  ;;  %vm240_vm1 = vcmask (!%p141_p2), 31744  }
   0x6   : > { %144 = sbr.rel (%p141_p2) target bundleno = 266 (0x10a), region = 28  ;;  %1005 = vmatprep.subr.msk.bf16.mxu0 (!%p141_p2), %vm265_vm0, %v199_v0  ;;  %v267_v1 = vsel (!%p141_p2), %vm265_vm0, %v199_v0, 0  ;;  %1006 = vmatprep.subr.msk.bf16.mxu1 (!%p141_p2), %vm265_vm0, %v199_v0 }
   0x7   : > { %986 = vmatpush3.bf16.msra.mxu0 (!%p141_p2), %v267_v1  ;;  %1004 = vmatpush3.bf16.msra.mxu1 (!%p141_p2), %v267_v1 }
   0xd   : > { %s1101_s13 = smov (!%p168_p3, %s867_s13), 1 }
   0xe   : > { %s911_s16 = sshll.u32 %s1101_s13, 6  ;;  %s876_s23 = sshll.u32 %s1101_s13, 1 }
   0xf   : > { %s172_s19 = scalar_lea.vmem %s1096_s0, %s911_s16  ;;  %s1079_s22 = scalar_lea.vmem %s1098_s2, %s911_s16 }
  0x10   : > { %v1015_v2 = vld [vmem:[%s172_s19] sm:$0xff]   ;;  %v1016_v3 = vld [vmem:[%s172_s19 + $0x8] sm:$0xff]   ;;  %v1019_v6 = vld [vmem:[%s172_s19 + $0x10] sm:$0xff]   ;;  %s181_s26 = scalar_lea.vmem %s1099_s3, %s876_s23 }
  0x11   : > { %987 = vmatprep.mubr.msk.bf16.mxu0 %vm240_vm1, %v1015_v2  ;;  %v1017_v4 = vld [vmem:[%s172_s19 + $0x20] sm:$0xff]   ;;  %v1018_v5 = vld [vmem:[%s172_s19 + $0x28] sm:$0xff]   ;;  %v1021_v7 = vld [vmem:[%s172_s19 + $0x30] sm:$0xff]  }
  0x12   : > { %988 = vmatmul.mubr.msk.bf16.vlgmr.msra.gmra.mrb[0].mxu0 %vm240_vm1, %v1016_v3  ;;  %995 = vmatprep.mubr.msk.bf16.mxu1 %vm240_vm1, %v1017_v4  ;;  %v1020_v8 = vld [vmem:[%s172_s19 + $0x18] sm:$0xff]  }
  0x13   : > { %996 = vmatmul.mubr.msk.bf16.vlgmr.msra.gmra.mrb[0].mxu1 %vm240_vm1, %v1018_v5  ;;  %991 = vmatprep.mubr.msk.bf16.mxu0 %vm240_vm1, %v1019_v6  ;;  %v1022_v9 = vld [vmem:[%s172_s19 + $0x38] sm:$0xff]  }
  0x14   : > { %999 = vmatprep.mubr.msk.bf16.mxu1 %vm240_vm1, %v1021_v7 }
  0x1a   : > { %992 = vmatmul.mubr.msk.bf16.gmra.mrb[4].mxu0 %vm240_vm1, %v1020_v8 }
  0x1b   : > { %1000 = vmatmul.mubr.msk.bf16.gmra.mrb[4].mxu1 %vm240_vm1, %v1022_v9 }
  0xe5   : > { %v989_v10 = vpop.f32.mrb[0].mxu0 }
  0xe6   : > { %v743_v11 = vmul.f32 %v989_v10, %v989_v10  ;;  %v303_v12 = vpop.f32.mrb[1].mxu0  ;;  %v997_v16 = vpop.f32.mrb[0].mxu1 }
  0xe7   : > { %v720_v13 = vadd.f32 %v989_v10, %v303_v12  ;;  %v741_v14 = vmul.f32 %v303_v12, %v303_v12  ;;  %v990_v15 = vpop.f32.mrb[2].mxu0  ;;  %v335_v19 = vpop.f32.mrb[1].mxu1  ;;  %v751_v46 = vmul.f32 %v997_v16, %v997_v16 }
  0xe8   : > { %v937_v17 = vpack.c.bf16 %v990_v15, %v989_v10  ;;  %v306_v18 = vpop.f32.mrb[3].mxu0  ;;  %v998_v22 = vpop.f32.mrb[2].mxu1  ;;  %v749_v42 = vmul.f32 %v335_v19, %v335_v19 }
  0xe9   : > { %v758_v20 = vadd.f32 %v743_v11, %v741_v14  ;;  %v932_v21 = vpack.c.bf16 %v306_v18, %v303_v12  ;;  %v957_v23 = vpack.c.bf16 %v998_v22, %v997_v16  ;;  %v338_v24 = vpop.f32.mrb[3].mxu1 }
  0xea   : > { %969 = vst [vmem:[%s1079_s22 + $0x8] sm:$0xff] %v937_v17   ;;  %v952_v25 = vpack.c.bf16 %v338_v24, %v335_v19 }
  0xeb   : > { %933 = vst [vmem:[%s1079_s22] sm:$0xff] %v932_v21   ;;  %973 = vst [vmem:[%s1079_s22 + $0x28] sm:$0xff] %v957_v23  }
  0xec   : > { %972 = vst [vmem:[%s1079_s22 + $0x20] sm:$0xff] %v952_v25  }
  0xed   : > { %v993_v26 = vpop.f32.mrb[4].mxu0 }
  0xee   : > { %v319_v27 = vpop.f32.mrb[5].mxu0  ;;  %v1001_v31 = vpop.f32.mrb[4].mxu1  ;;  %v747_v35 = vmul.f32 %v993_v26, %v993_v26 }
  0xef   : > { %v722_v28 = vadd.f32 %v720_v13, %v319_v27  ;;  %v745_v29 = vmul.f32 %v319_v27, %v319_v27  ;;  %v994_v30 = vpop.f32.mrb[6].mxu0  ;;  %v351_v34 = vpop.f32.mrb[5].mxu1  ;;  %v755_v52 = vmul.f32 %v1001_v31, %v1001_v31 }
  0xf0   : > { %v947_v32 = vpack.c.bf16 %v994_v30, %v993_v26  ;;  %v322_v33 = vpop.f32.mrb[7].mxu0  ;;  %v1002_v39 = vpop.f32.mrb[6].mxu1  ;;  %v753_v48 = vmul.f32 %v351_v34, %v351_v34 }
  0xf1   : > { %v724_v36 = vadd.f32 %v993_v26, %v722_v28  ;;  %v760_v37 = vadd.f32 %v758_v20, %v745_v29  ;;  %v942_v38 = vpack.c.bf16 %v322_v33, %v319_v27  ;;  %v967_v40 = vpack.c.bf16 %v1002_v39, %v1001_v31  ;;  %v354_v41 = vpop.f32.mrb[7].mxu1 }
  0xf2   : > { %971 = vst [vmem:[%s1079_s22 + $0x18] sm:$0xff] %v947_v32   ;;  %v962_v45 = vpack.c.bf16 %v354_v41, %v351_v34 }
  0xf3   : > { %v762_v43 = vadd.f32 %v760_v37, %v747_v35  ;;  %970 = vst [vmem:[%s1079_s22 + $0x10] sm:$0xff] %v942_v38   ;;  %v726_v44 = vadd.f32 %v724_v36, %v335_v19  ;;  %975 = vst [vmem:[%s1079_s22 + $0x38] sm:$0xff] %v967_v40  }
  0xf4   : > { %974 = vst [vmem:[%s1079_s22 + $0x30] sm:$0xff] %v962_v45  }
  0xf5   : > { %v728_v47 = vadd.f32 %v997_v16, %v726_v44  ;;  %v764_v49 = vadd.f32 %v762_v43, %v749_v42 }
  0xf7   : > { %v730_v50 = vadd.f32 %v728_v47, %v351_v34  ;;  %v766_v51 = vadd.f32 %v764_v49, %v751_v46 }
  0xf9   : > { %v732_v53 = vadd.f32 %v1001_v31, %v730_v50  ;;  %v768_v54 = vadd.f32 %v766_v51, %v753_v48 }
  0xfb   : > { %v734_v55 = vrot.slane %v732_v53, 4  ;;  %v770_v56 = vadd.f32 %v768_v54, %v755_v52 }
  0xfd   : > { %v735_v57 = vadd.f32 %v734_v55, %v732_v53  ;;  %v772_v58 = vrot.slane %v770_v56, 4 }
  0xff   : > { %v736_v59 = vrot.slane %v735_v57, 2  ;;  %v773_v60 = vadd.f32 %v772_v58, %v770_v56 }
 0x101   : > { %v737_v61 = vadd.f32 %v736_v59, %v735_v57  ;;  %v774_v62 = vrot.slane %v773_v60, 2 }
 0x103   : > { %v738_v63 = vrot.slane %v737_v61, 1  ;;  %v775_v0 = vadd.f32 %v774_v62, %v773_v60 }
 0x105   : > { %v739_v1 = vadd.f32 %v738_v63, %v737_v61  ;;  %v776_v2 = vrot.slane %v775_v0, 1 }
 0x107   : > { %v777_v3 = vadd.f32 %v776_v2, %v775_v0  ;;  %779 = vst [vmem:[%s181_s26] sm:$0x1] %v739_v1 }
 0x109   : > { %780 = vst [vmem:[%s181_s26 + $0x1] sm:$0x1] %v777_v3 }
 0x10a PF: > { %s14_s12 = sadd.s32 1, %s1029_s12  }
 0x10b   : > { %p11_p4 = scmp.ge.s32.totalorder %s14_s12, 4  }
 0x10d   :  { %13 = sbr.rel (!%p11_p4) target bundleno = 1 (0x1), region = 70 }

// kernel: residual_block_forward.7
= control target key start
LH: loop header
LB: loop body
LE: loop exit
PB: predicated region body
PF: predicated region fallthrough
CT: control target
= control target key end

     0   :  { %s944_s0 = inlined_call_operand.vmem [shape: bf16[256,128], index: 0, kind: input, shape index: {}]   ;;  %s945_s1 = inlined_call_operand.vmem [shape: f32[1,128], index: 1, kind: input, shape index: {}]   ;;  %s946_s2 = inlined_call_operand.vmem [shape: f32[1,128], index: 2, kind: input, shape index: {}]   ;;  %s947_s3 = inlined_call_operand.vmem [shape: bf16[256,128], index: 3, kind: input, shape index: {}]   ;;  %s948_s4 = inlined_call_operand.vmem [shape: f32[1,128], index: 4, kind: input, shape index: {}]   ;;  %s949_s5 = inlined_call_operand.vmem [shape: f32[1,128], index: 5, kind: input, shape index: {}]   ;;  %s950_s6 = inlined_call_operand.vmem [shape: f32[256,128], index: 6, kind: output, shape index: {}]  }
   0x1   :  { %v412_v0 = vld [vmem:[%s944_s0] sm:$0xff]   ;;  %v539_v9 = vld [vmem:[%s944_s0 + $0x8] sm:$0xff]   ;;  %v540_v15 = vld [vmem:[%s944_s0 + $0x10] sm:$0xff]  }
   0x2   :  { %v610_v1 = vld [vmem:[%s945_s1] ss:$0 sm:$0xff]  ;;  %v413_v2 = vunpack.c.l.bf16 %v412_v0  ;;  %v414_v5 = vunpack.c.h.bf16 %v412_v0  ;;  %v554_v10 = vld [vmem:[%s947_s3 + $0x8] sm:$0xff]   ;;  %v417_v13 = vunpack.c.l.bf16 %v539_v9  ;;  %v555_v16 = vld [vmem:[%s947_s3 + $0x10] sm:$0xff]   ;;  %v418_v19 = vunpack.c.h.bf16 %v539_v9 }
   0x3   :  { %v476_v3 = vld [vmem:[%s947_s3] sm:$0xff]   ;;  %v481_v14 = vunpack.c.l.bf16 %v554_v10  ;;  %v482_v20 = vunpack.c.h.bf16 %v554_v10  ;;  %v421_v28 = vunpack.c.l.bf16 %v540_v15  ;;  %v485_v29 = vunpack.c.l.bf16 %v555_v16  ;;  %v541_v34 = vld [vmem:[%s944_s0 + $0x18] sm:$0xff]   ;;  %v543_v9 = vld [vmem:[%s944_s0 + $0x28] sm:$0xff]  }
   0x4   :  { %v618_v4 = vld [vmem:[%s948_s4] ss:$0 sm:$0xff]  ;;  %v477_v7 = vunpack.c.l.bf16 %v476_v3  ;;  %v478_v8 = vunpack.c.h.bf16 %v476_v3  ;;  %v94_v11 = vmul.f32 %v413_v2, %v610_v1  ;;  %v95_v12 = vmul.f32 %v414_v5, %v610_v1  ;;  %v556_v43 = vld [vmem:[%s947_s3 + $0x18] sm:$0xff]  }
   0x5   :  { %v623_v6 = vld [vmem:[%s946_s2] ss:$0 sm:$0xff]  ;;  %v96_v23 = vmul.f32 %v417_v13, %v610_v1  ;;  %v238_v24 = vmul.f32 %v481_v14, %v618_v4  ;;  %v97_v26 = vmul.f32 %v418_v19, %v610_v1  ;;  %v239_v27 = vmul.f32 %v482_v20, %v618_v4  ;;  %v558_v14 = vld [vmem:[%s947_s3 + $0x28] sm:$0xff]  }
   0x6   :  { %v236_v17 = vmul.f32 %v477_v7, %v618_v4  ;;  %v237_v18 = vmul.f32 %v478_v8, %v618_v4  ;;  %v133_v21 = vadd.f32 %v623_v6, %v94_v11  ;;  %v134_v22 = vadd.f32 %v623_v6, %v95_v12  ;;  %v648_v25 = vld [vmem:[%s949_s5] ss:$0 sm:$0xff] }
   0x7   :  { %v135_v32 = vadd.f32 %v623_v6, %v96_v23  ;;  %v422_v33 = vunpack.c.h.bf16 %v540_v15  ;;  %v136_v35 = vadd.f32 %v623_v6, %v97_v26  ;;  %v98_v36 = vmul.f32 %v421_v28, %v610_v1  ;;  %v542_v56 = vld [vmem:[%s944_s0 + $0x20] sm:$0xff]   ;;  %v544_v28 = vld [vmem:[%s944_s0 + $0x30] sm:$0xff]  }
   0x8   :  { %v268_v30 = vadd.f32 %v236_v17, %v133_v21  ;;  %v269_v31 = vadd.f32 %v237_v18, %v134_v22  ;;  %v240_v37 = vmul.f32 %v485_v29, %v618_v4  ;;  %v486_v38 = vunpack.c.h.bf16 %v555_v16  ;;  %v557_v61 = vld [vmem:[%s947_s3 + $0x20] sm:$0xff]  }
   0x9   :  { %v270_v41 = vadd.f32 %v238_v24, %v135_v32  ;;  %v99_v42 = vmul.f32 %v422_v33, %v610_v1  ;;  %v271_v44 = vadd.f32 %v239_v27, %v136_v35  ;;  %v137_v45 = vadd.f32 %v623_v6, %v98_v36  ;;  %v559_v33 = vld [vmem:[%s947_s3 + $0x30] sm:$0xff]  }
   0xa   :  { %v307_v39 = vadd.f32 %v648_v25, %v268_v30  ;;  %v308_v40 = vadd.f32 %v648_v25, %v269_v31  ;;  %v241_v46 = vmul.f32 %v486_v38, %v618_v4  ;;  %v425_v47 = vunpack.c.l.bf16 %v541_v34 }
   0xb   :  { %v309_v50 = vadd.f32 %v648_v25, %v270_v41  ;;  %v138_v51 = vadd.f32 %v623_v6, %v99_v42  ;;  %v310_v52 = vadd.f32 %v648_v25, %v271_v44  ;;  %v272_v53 = vadd.f32 %v240_v37, %v137_v45 }
   0xc   :  { %v339_v48 = vmax.f32 %v307_v39, 0.0  ;;  %v340_v49 = vmax.f32 %v308_v40, 0.0  ;;  %v100_v54 = vmul.f32 %v425_v47, %v610_v1  ;;  %v489_v55 = vunpack.c.l.bf16 %v556_v43 }
   0xd   :  { %v341_v57 = vmax.f32 %v309_v50, 0.0  ;;  %v273_v58 = vadd.f32 %v241_v46, %v138_v51  ;;  %v426_v59 = vunpack.c.h.bf16 %v541_v34  ;;  %v490_v60 = vunpack.c.h.bf16 %v556_v43  ;;  %v545_v50 = vld [vmem:[%s944_s0 + $0x38] sm:$0xff]  }
   0xe   :  { %371 = vst [vmem:[%s950_s6] sm:$0xff] %v339_v48  ;;  %372 = vst [vmem:[%s950_s6 + $0x8] sm:$0xff] %v340_v49  ;;  %v342_v62 = vmax.f32 %v310_v52, 0.0  ;;  %v311_v63 = vadd.f32 %v648_v25, %v272_v53  ;;  %v139_v0 = vadd.f32 %v623_v6, %v100_v54  ;;  %v242_v2 = vmul.f32 %v489_v55, %v618_v4  ;;  %v560_v51 = vld [vmem:[%s947_s3 + $0x38] sm:$0xff]  }
   0xf   :  { %373 = vst [vmem:[%s950_s6 + $0x10] sm:$0xff] %v341_v57  ;;  %v312_v3 = vadd.f32 %v648_v25, %v273_v58  ;;  %v101_v5 = vmul.f32 %v426_v59, %v610_v1  ;;  %v243_v7 = vmul.f32 %v490_v60, %v618_v4  ;;  %v429_v8 = vunpack.c.l.bf16 %v542_v56 }
  0x10   :  { %374 = vst [vmem:[%s950_s6 + $0x18] sm:$0xff] %v342_v62  ;;  %v343_v10 = vmax.f32 %v311_v63, 0.0  ;;  %v274_v11 = vadd.f32 %v242_v2, %v139_v0  ;;  %v493_v12 = vunpack.c.l.bf16 %v557_v61  ;;  %v430_v13 = vunpack.c.h.bf16 %v542_v56  ;;  %v546_v0 = vld [vmem:[%s944_s0 + $0x40] sm:$0xff]  }
  0x11   :  { %v344_v15 = vmax.f32 %v312_v3, 0.0  ;;  %v140_v16 = vadd.f32 %v623_v6, %v101_v5  ;;  %v102_v17 = vmul.f32 %v429_v8, %v610_v1  ;;  %v494_v18 = vunpack.c.h.bf16 %v557_v61  ;;  %v561_v8 = vld [vmem:[%s947_s3 + $0x40] sm:$0xff]  }
  0x12   :  { %375 = vst [vmem:[%s950_s6 + $0x20] sm:$0xff] %v343_v10  ;;  %v313_v19 = vadd.f32 %v648_v25, %v274_v11  ;;  %v244_v20 = vmul.f32 %v493_v12, %v618_v4  ;;  %v103_v21 = vmul.f32 %v430_v13, %v610_v1  ;;  %v433_v22 = vunpack.c.l.bf16 %v543_v9 }
  0x13   :  { %376 = vst [vmem:[%s950_s6 + $0x28] sm:$0xff] %v344_v15  ;;  %v275_v23 = vadd.f32 %v243_v7, %v140_v16  ;;  %v141_v24 = vadd.f32 %v623_v6, %v102_v17  ;;  %v245_v26 = vmul.f32 %v494_v18, %v618_v4  ;;  %v497_v27 = vunpack.c.l.bf16 %v558_v14 }
  0x14   :  { %v345_v29 = vmax.f32 %v313_v19, 0.0  ;;  %v142_v30 = vadd.f32 %v623_v6, %v103_v21  ;;  %v104_v31 = vmul.f32 %v433_v22, %v610_v1  ;;  %v434_v32 = vunpack.c.h.bf16 %v543_v9  ;;  %v547_v21 = vld [vmem:[%s944_s0 + $0x48] sm:$0xff]  }
  0x15   :  { %v314_v34 = vadd.f32 %v648_v25, %v275_v23  ;;  %v276_v35 = vadd.f32 %v244_v20, %v141_v24  ;;  %v246_v36 = vmul.f32 %v497_v27, %v618_v4  ;;  %v498_v37 = vunpack.c.h.bf16 %v558_v14  ;;  %v562_v27 = vld [vmem:[%s947_s3 + $0x48] sm:$0xff]  }
  0x16   :  { %377 = vst [vmem:[%s950_s6 + $0x30] sm:$0xff] %v345_v29  ;;  %v277_v38 = vadd.f32 %v245_v26, %v142_v30  ;;  %v143_v39 = vadd.f32 %v623_v6, %v104_v31  ;;  %v105_v40 = vmul.f32 %v434_v32, %v610_v1  ;;  %v437_v41 = vunpack.c.l.bf16 %v544_v28 }
  0x17   :  { %v346_v42 = vmax.f32 %v314_v34, 0.0  ;;  %v315_v43 = vadd.f32 %v648_v25, %v276_v35  ;;  %v247_v44 = vmul.f32 %v498_v37, %v618_v4  ;;  %v501_v45 = vunpack.c.l.bf16 %v559_v33 }
  0x18   :  { %v316_v46 = vadd.f32 %v648_v25, %v277_v38  ;;  %v278_v47 = vadd.f32 %v246_v36, %v143_v39  ;;  %v144_v48 = vadd.f32 %v623_v6, %v105_v40  ;;  %v106_v49 = vmul.f32 %v437_v41, %v610_v1 }
  0x19   :  { %378 = vst [vmem:[%s950_s6 + $0x38] sm:$0xff] %v346_v42  ;;  %v347_v52 = vmax.f32 %v315_v43, 0.0  ;;  %v248_v53 = vmul.f32 %v501_v45, %v618_v4  ;;  %v438_v54 = vunpack.c.h.bf16 %v544_v28  ;;  %v502_v55 = vunpack.c.h.bf16 %v559_v33  ;;  %v563_v45 = vld [vmem:[%s947_s3 + $0x50] sm:$0xff]  }
  0x1a   :  { %v348_v56 = vmax.f32 %v316_v46, 0.0  ;;  %v317_v57 = vadd.f32 %v648_v25, %v278_v47  ;;  %v279_v58 = vadd.f32 %v247_v44, %v144_v48  ;;  %v145_v59 = vadd.f32 %v623_v6, %v106_v49  ;;  %v548_v44 = vld [vmem:[%s944_s0 + $0x50] sm:$0xff]  }
  0x1b   :  { %379 = vst [vmem:[%s950_s6 + $0x40] sm:$0xff] %v347_v52  ;;  %v107_v60 = vmul.f32 %v438_v54, %v610_v1  ;;  %v249_v61 = vmul.f32 %v502_v55, %v618_v4  ;;  %v441_v62 = vunpack.c.l.bf16 %v545_v50  ;;  %v505_v63 = vunpack.c.l.bf16 %v560_v51 }
  0x1c   :  { %380 = vst [vmem:[%s950_s6 + $0x48] sm:$0xff] %v348_v56  ;;  %v349_v2 = vmax.f32 %v317_v57, 0.0  ;;  %v318_v3 = vadd.f32 %v648_v25, %v279_v58  ;;  %v280_v5 = vadd.f32 %v248_v53, %v145_v59  ;;  %v442_v7 = vunpack.c.h.bf16 %v545_v50  ;;  %v549_v58 = vld [vmem:[%s944_s0 + $0x58] sm:$0xff]  }
  0x1d   :  { %v146_v9 = vadd.f32 %v623_v6, %v107_v60  ;;  %v108_v10 = vmul.f32 %v441_v62, %v610_v1  ;;  %v250_v11 = vmul.f32 %v505_v63, %v618_v4  ;;  %v506_v12 = vunpack.c.h.bf16 %v560_v51  ;;  %v564_v63 = vld [vmem:[%s947_s3 + $0x58] sm:$0xff]  }
  0x1e   :  { %381 = vst [vmem:[%s950_s6 + $0x50] sm:$0xff] %v349_v2  ;;  %v350_v13 = vmax.f32 %v318_v3, 0.0  ;;  %v319_v14 = vadd.f32 %v648_v25, %v280_v5  ;;  %v109_v15 = vmul.f32 %v442_v7, %v610_v1  ;;  %v445_v16 = vunpack.c.l.bf16 %v546_v0 }
  0x1f   :  { %v281_v17 = vadd.f32 %v249_v61, %v146_v9  ;;  %v147_v18 = vadd.f32 %v623_v6, %v108_v10  ;;  %v251_v19 = vmul.f32 %v506_v12, %v618_v4  ;;  %v509_v20 = vunpack.c.l.bf16 %v561_v8 }
  0x20   :  { %382 = vst [vmem:[%s950_s6 + $0x58] sm:$0xff] %v350_v13  ;;  %v351_v22 = vmax.f32 %v319_v14, 0.0  ;;  %v148_v23 = vadd.f32 %v623_v6, %v109_v15  ;;  %v110_v24 = vmul.f32 %v445_v16, %v610_v1  ;;  %v446_v26 = vunpack.c.h.bf16 %v546_v0  ;;  %v550_v15 = vld [vmem:[%s944_s0 + $0x60] sm:$0xff]  }
  0x21   :  { %v320_v28 = vadd.f32 %v648_v25, %v281_v17  ;;  %v282_v29 = vadd.f32 %v250_v11, %v147_v18  ;;  %v252_v30 = vmul.f32 %v509_v20, %v618_v4  ;;  %v510_v31 = vunpack.c.h.bf16 %v561_v8  ;;  %v565_v20 = vld [vmem:[%s947_s3 + $0x60] sm:$0xff]  }
  0x22   :  { %383 = vst [vmem:[%s950_s6 + $0x60] sm:$0xff] %v351_v22  ;;  %v283_v32 = vadd.f32 %v251_v19, %v148_v23  ;;  %v149_v33 = vadd.f32 %v623_v6, %v110_v24  ;;  %v111_v34 = vmul.f32 %v446_v26, %v610_v1  ;;  %v449_v35 = vunpack.c.l.bf16 %v547_v21 }
  0x23   :  { %v352_v36 = vmax.f32 %v320_v28, 0.0  ;;  %v321_v37 = vadd.f32 %v648_v25, %v282_v29  ;;  %v253_v38 = vmul.f32 %v510_v31, %v618_v4  ;;  %v513_v39 = vunpack.c.l.bf16 %v562_v27 }
  0x24   :  { %v322_v40 = vadd.f32 %v648_v25, %v283_v32  ;;  %v284_v41 = vadd.f32 %v252_v30, %v149_v33  ;;  %v150_v42 = vadd.f32 %v623_v6, %v111_v34  ;;  %v112_v43 = vmul.f32 %v449_v35, %v610_v1 }
  0x25   :  { %384 = vst [vmem:[%s950_s6 + $0x68] sm:$0xff] %v352_v36  ;;  %v353_v46 = vmax.f32 %v321_v37, 0.0  ;;  %v254_v47 = vmul.f32 %v513_v39, %v618_v4  ;;  %v450_v48 = vunpack.c.h.bf16 %v547_v21  ;;  %v514_v49 = vunpack.c.h.bf16 %v562_v27  ;;  %v566_v39 = vld [vmem:[%s947_s3 + $0x68] sm:$0xff]  }
  0x26   :  { %v354_v50 = vmax.f32 %v322_v40, 0.0  ;;  %v323_v51 = vadd.f32 %v648_v25, %v284_v41  ;;  %v285_v52 = vadd.f32 %v253_v38, %v150_v42  ;;  %v151_v53 = vadd.f32 %v623_v6, %v112_v43  ;;  %v551_v38 = vld [vmem:[%s944_s0 + $0x68] sm:$0xff]  }
  0x27   :  { %385 = vst [vmem:[%s950_s6 + $0x70] sm:$0xff] %v353_v46  ;;  %v113_v54 = vmul.f32 %v450_v48, %v610_v1  ;;  %v255_v55 = vmul.f32 %v514_v49, %v618_v4  ;;  %v453_v56 = vunpack.c.l.bf16 %v548_v44  ;;  %v517_v57 = vunpack.c.l.bf16 %v563_v45 }
  0x28   :  { %386 = vst [vmem:[%s950_s6 + $0x78] sm:$0xff] %v354_v50  ;;  %v355_v59 = vmax.f32 %v323_v51, 0.0  ;;  %v324_v60 = vadd.f32 %v648_v25, %v285_v52  ;;  %v286_v61 = vadd.f32 %v254_v47, %v151_v53  ;;  %v454_v62 = vunpack.c.h.bf16 %v548_v44  ;;  %v552_v52 = vld [vmem:[%s944_s0 + $0x70] sm:$0xff]  }
  0x29   :  { %v152_v0 = vadd.f32 %v623_v6, %v113_v54  ;;  %v114_v2 = vmul.f32 %v453_v56, %v610_v1  ;;  %v256_v3 = vmul.f32 %v517_v57, %v618_v4  ;;  %v518_v5 = vunpack.c.h.bf16 %v563_v45  ;;  %v567_v57 = vld [vmem:[%s947_s3 + $0x70] sm:$0xff]  }
  0x2a   :  { %387 = vst [vmem:[%s950_s6 + $0x80] sm:$0xff] %v355_v59  ;;  %v356_v7 = vmax.f32 %v324_v60, 0.0  ;;  %v325_v8 = vadd.f32 %v648_v25, %v286_v61  ;;  %v115_v9 = vmul.f32 %v454_v62, %v610_v1  ;;  %v457_v10 = vunpack.c.l.bf16 %v549_v58 }
  0x2b   :  { %v287_v11 = vadd.f32 %v255_v55, %v152_v0  ;;  %v153_v12 = vadd.f32 %v623_v6, %v114_v2  ;;  %v257_v13 = vmul.f32 %v518_v5, %v618_v4  ;;  %v521_v14 = vunpack.c.l.bf16 %v564_v63 }
  0x2c   :  { %388 = vst [vmem:[%s950_s6 + $0x88] sm:$0xff] %v356_v7  ;;  %v357_v16 = vmax.f32 %v325_v8, 0.0  ;;  %v154_v17 = vadd.f32 %v623_v6, %v115_v9  ;;  %v116_v18 = vmul.f32 %v457_v10, %v610_v1  ;;  %v458_v19 = vunpack.c.h.bf16 %v549_v58  ;;  %v553_v9 = vld [vmem:[%s944_s0 + $0x78] sm:$0xff]  }
  0x2d   :  { %v326_v21 = vadd.f32 %v648_v25, %v287_v11  ;;  %v288_v22 = vadd.f32 %v256_v3, %v153_v12  ;;  %v258_v23 = vmul.f32 %v521_v14, %v618_v4  ;;  %v522_v24 = vunpack.c.h.bf16 %v564_v63  ;;  %v568_v14 = vld [vmem:[%s947_s3 + $0x78] sm:$0xff]  }
  0x2e   :  { %389 = vst [vmem:[%s950_s6 + $0x90] sm:$0xff] %v357_v16  ;;  %v289_v26 = vadd.f32 %v257_v13, %v154_v17  ;;  %v155_v27 = vadd.f32 %v623_v6, %v116_v18  ;;  %v117_v28 = vmul.f32 %v458_v19, %v610_v1  ;;  %v461_v29 = vunpack.c.l.bf16 %v550_v15 }
  0x2f   :  { %v358_v30 = vmax.f32 %v326_v21, 0.0  ;;  %v327_v31 = vadd.f32 %v648_v25, %v288_v22  ;;  %v259_v32 = vmul.f32 %v522_v24, %v618_v4  ;;  %v525_v33 = vunpack.c.l.bf16 %v565_v20 }
  0x30   :  { %v328_v34 = vadd.f32 %v648_v25, %v289_v26  ;;  %v290_v35 = vadd.f32 %v258_v23, %v155_v27  ;;  %v156_v36 = vadd.f32 %v623_v6, %v117_v28  ;;  %v118_v37 = vmul.f32 %v461_v29, %v610_v1 }
  0x31   :  { %390 = vst [vmem:[%s950_s6 + $0x98] sm:$0xff] %v358_v30  ;;  %v359_v40 = vmax.f32 %v327_v31, 0.0  ;;  %v260_v41 = vmul.f32 %v525_v33, %v618_v4  ;;  %v462_v42 = vunpack.c.h.bf16 %v550_v15  ;;  %v526_v43 = vunpack.c.h.bf16 %v565_v20 }
  0x32   :  { %v360_v44 = vmax.f32 %v328_v34, 0.0  ;;  %v329_v45 = vadd.f32 %v648_v25, %v290_v35  ;;  %v291_v46 = vadd.f32 %v259_v32, %v156_v36  ;;  %v157_v47 = vadd.f32 %v623_v6, %v118_v37 }
  0x33   :  { %391 = vst [vmem:[%s950_s6 + $0xa0] sm:$0xff] %v359_v40  ;;  %v119_v48 = vmul.f32 %v462_v42, %v610_v1  ;;  %v261_v49 = vmul.f32 %v526_v43, %v618_v4  ;;  %v465_v50 = vunpack.c.l.bf16 %v551_v38  ;;  %v529_v51 = vunpack.c.l.bf16 %v566_v39 }
  0x34   :  { %392 = vst [vmem:[%s950_s6 + $0xa8] sm:$0xff] %v360_v44  ;;  %v361_v53 = vmax.f32 %v329_v45, 0.0  ;;  %v330_v54 = vadd.f32 %v648_v25, %v291_v46  ;;  %v292_v55 = vadd.f32 %v260_v41, %v157_v47  ;;  %v466_v56 = vunpack.c.h.bf16 %v551_v38 }
  0x35   :  { %v158_v58 = vadd.f32 %v623_v6, %v119_v48  ;;  %v120_v59 = vmul.f32 %v465_v50, %v610_v1  ;;  %v262_v60 = vmul.f32 %v529_v51, %v618_v4  ;;  %v530_v61 = vunpack.c.h.bf16 %v566_v39 }
  0x36   :  { %393 = vst [vmem:[%s950_s6 + $0xb0] sm:$0xff] %v361_v53  ;;  %v362_v62 = vmax.f32 %v330_v54, 0.0  ;;  %v331_v63 = vadd.f32 %v648_v25, %v292_v55  ;;  %v121_v0 = vmul.f32 %v466_v56, %v610_v1  ;;  %v469_v2 = vunpack.c.l.bf16 %v552_v52 }
  0x37   :  { %v293_v3 = vadd.f32 %v261_v49, %v158_v58  ;;  %v159_v5 = vadd.f32 %v623_v6, %v120_v59  ;;  %v263_v7 = vmul.f32 %v530_v61, %v618_v4  ;;  %v533_v8 = vunpack.c.l.bf16 %v567_v57 }
  0x38   :  { %394 = vst [vmem:[%s950_s6 + $0xb8] sm:$0xff] %v362_v62  ;;  %v363_v10 = vmax.f32 %v331_v63, 0.0  ;;  %v160_v11 = vadd.f32 %v623_v6, %v121_v0  ;;  %v122_v12 = vmul.f32 %v469_v2, %v610_v1  ;;  %v470_v13 = vunpack.c.h.bf16 %v552_v52 }
  0x39   :  { %v332_v15 = vadd.f32 %v648_v25, %v293_v3  ;;  %v294_v16 = vadd.f32 %v262_v60, %v159_v5  ;;  %v264_v17 = vmul.f32 %v533_v8, %v618_v4  ;;  %v534_v18 = vunpack.c.h.bf16 %v567_v57 }
  0x3a   :  { %395 = vst [vmem:[%s950_s6 + $0xc0] sm:$0xff] %v363_v10  ;;  %v295_v19 = vadd.f32 %v263_v7, %v160_v11  ;;  %v161_v20 = vadd.f32 %v623_v6, %v122_v12  ;;  %v123_v21 = vmul.f32 %v470_v13, %v610_v1  ;;  %v473_v22 = vunpack.c.l.bf16 %v553_v9 }
  0x3b   :  { %v364_v23 = vmax.f32 %v332_v15, 0.0  ;;  %v333_v24 = vadd.f32 %v648_v25, %v294_v16  ;;  %v265_v26 = vmul.f32 %v534_v18, %v618_v4  ;;  %v537_v27 = vunpack.c.l.bf16 %v568_v14 }
  0x3c   :  { %v334_v28 = vadd.f32 %v648_v25, %v295_v19  ;;  %v296_v29 = vadd.f32 %v264_v17, %v161_v20  ;;  %v162_v30 = vadd.f32 %v623_v6, %v123_v21  ;;  %v124_v31 = vmul.f32 %v473_v22, %v610_v1 }
  0x3d   :  { %396 = vst [vmem:[%s950_s6 + $0xc8] sm:$0xff] %v364_v23  ;;  %v365_v32 = vmax.f32 %v333_v24, 0.0  ;;  %v266_v33 = vmul.f32 %v537_v27, %v618_v4  ;;  %v474_v34 = vunpack.c.h.bf16 %v553_v9  ;;  %v538_v35 = vunpack.c.h.bf16 %v568_v14 }
  0x3e   :  { %v366_v36 = vmax.f32 %v334_v28, 0.0  ;;  %v335_v37 = vadd.f32 %v648_v25, %v296_v29  ;;  %v297_v38 = vadd.f32 %v265_v26, %v162_v30  ;;  %v163_v39 = vadd.f32 %v623_v6, %v124_v31 }
  0x3f   :  { %397 = vst [vmem:[%s950_s6 + $0xd0] sm:$0xff] %v365_v32  ;;  %v125_v40 = vmul.f32 %v474_v34, %v610_v1  ;;  %v267_v41 = vmul.f32 %v538_v35, %v618_v4 }
  0x40   :  { %398 = vst [vmem:[%s950_s6 + $0xd8] sm:$0xff] %v366_v36  ;;  %v367_v42 = vmax.f32 %v335_v37, 0.0  ;;  %v336_v43 = vadd.f32 %v648_v25, %v297_v38  ;;  %v298_v44 = vadd.f32 %v266_v33, %v163_v39 }
  0x41   :  { %v164_v45 = vadd.f32 %v623_v6, %v125_v40 }
  0x42   :  { %399 = vst [vmem:[%s950_s6 + $0xe0] sm:$0xff] %v367_v42  ;;  %v368_v46 = vmax.f32 %v336_v43, 0.0  ;;  %v337_v47 = vadd.f32 %v648_v25, %v298_v44 }
  0x43   :  { %v299_v1 = vadd.f32 %v267_v41, %v164_v45 }
  0x44   :  { %400 = vst [vmem:[%s950_s6 + $0xe8] sm:$0xff] %v368_v46  ;;  %v369_v4 = vmax.f32 %v337_v47, 0.0 }
  0x45   :  { %v338_v48 = vadd.f32 %v648_v25, %v299_v1 }
  0x46   :  { %401 = vst [vmem:[%s950_s6 + $0xf0] sm:$0xff] %v369_v4 }
  0x47   :  { %v370_v6 = vmax.f32 %v338_v48, 0.0 }
  0x49   :  { %402 = vst [vmem:[%s950_s6 + $0xf8] sm:$0xff] %v370_v6 }

// kernel: residual_block_forward.4
= control target key start
LH: loop header
LB: loop body
LE: loop exit
PB: predicated region body
PF: predicated region fallthrough
CT: control target
= control target key end

     0   :  { %s3485_s12 = smov 0   ;;  %s3770_s0 = inlined_call_operand.vmem [shape: bf16[2,4,145,4], index: 0, kind: input, shape index: {}]   ;;  %s3771_s1 = inlined_call_operand.vmem [shape: bf16[36,128], index: 1, kind: input, shape index: {}]   ;;  %s3772_s2 = inlined_call_operand.vmem [shape: bf16[2,128,128], index: 2, kind: output, shape index: {0}]   ;;  %s3773_s3 = inlined_call_operand.vmem [shape: f32[2,2,128], index: 3, kind: output, shape index: {1}]  }
   0x1 LB: > { %s2663_s13 = sadd.s32 4294967295, %s3463_s12   ;;  %p2667_p0 = scmp.ge.s32.totalorder %s3463_s12, 1  ;;  %s3463_s12 = sphi %s3485_s12, %s14_s12  }
   0x2   : > { %p140_p1 = scmp.lt.s32.totalorder %s3463_s12, 3 }
   0x4   : > { %p141_p2 = pnand %p2667_p0, %p140_p1 }
   0x5   : > { %v3378_v0 = vld [vmem:[%s3771_s1] ss:$0 sps:$4 sm:$0xcc] (!%p141_p2)   ;;  %vm287_vm0 = vcmask (!%p141_p2), 1041408   ;;  %v3499_v1 = vld [vmem:[%s3771_s1 + $0x8] sm:$0x3] (!%p141_p2) }
   0x6   : > { %144 = sbr.rel (%p141_p2) target bundleno = 389 (0x185), region = 28  ;;  %p168_p3 = scmp.lt.s32.totalorder (!%p141_p2), %s2663_s13, 1  ;;  %v261_v2 = vrot.slane (!%p141_p2), %v3378_v0, 2  ;;  %3363 = vmatprep.subr.msk.bf16.mxu0 (!%p141_p2), %vm287_vm0, %v3499_v1  ;;  %v3505_v3 = vsel (!%p141_p2), %vm287_vm0, %v3499_v1, 0  ;;  %v199_v4 = vld [vmem:[%s3771_s1] sm:$0x3] (!%p141_p2) }
   0x7   : > { %3140 = vmatpush3.bf16.msra.mxu0 (!%p141_p2), %v3505_v3  ;;  %v3381_v5 = vld [vmem:[%s3771_s1 + $0x8] ss:$0 sps:$4 sm:$0xcc] (!%p141_p2)   ;;  %vm262_vm1 = vcmask (!%p141_p2), 31744   ;;  %v453_v11 = vsel (!%p141_p2), %vm287_vm0, %v199_v4, 0 }
   0x8   : > { %3359 = vmatprep.subr.msk.bf16.mxu1 (!%p141_p2), %vm287_vm0, %v261_v2  ;;  %v289_v6 = vsel (!%p141_p2), %vm287_vm0, %v261_v2, 0  ;;  %v1354_v7 = vrot.slane (!%p141_p2), %v3381_v5, 2  ;;  %v1511_v12 = vld [vmem:[%s3771_s1 + $0xc] sm:$0x3] (!%p141_p2)  ;;  %v3540_v15 = vld [vmem:[%s3771_s1 + $0x4] sm:$0x3] (!%p141_p2) }
   0x9   : > { %3068 = vmatpush3.bf16.msra.mxu1 (!%p141_p2), %v289_v6  ;;  %vm613_vm2 = vsmask.f32 (!%p141_p2), 7424  ;;  %v1577_v28 = vsel (!%p141_p2), %vm287_vm0, %v1511_v12, 0  ;;  %v3564_v29 = vld [vmem:[%s3771_s1 + $0xc] ss:$0 sps:$4 sm:$0xcc] (!%p141_p2)  }
   0xa   : > { %3360 = vmatprep.subr.msk.bf16.mxu1 (!%p141_p2), %vm287_vm0, %v199_v4  ;;  %3365 = vmatprep.subr.msk.bf16.mxu0 (!%p141_p2), %vm287_vm0, %v1354_v7  ;;  %v1380_v14 = vsel (!%p141_p2), %vm287_vm0, %v1354_v7, 0  ;;  %v1752_v48 = vrot.slane (!%p141_p2), %v3564_v29, 2  ;;  %v3592_v5 = vld [vmem:[%s3771_s1 + $0x4] ss:$0 sps:$4 sm:$0xcc] (!%p141_p2)  }
   0xd   : > { %s3775_s13 = smov (!%p168_p3, %s2663_s13), 1 }
   0xe   : > { %s3369_s22 = smul.u32 304, %s3775_s13  ;;  %s2922_s9 = sshll.u32 %s3775_s13, 6 }
   0xf   : > { %s3753_s14 = scalar_lea.vmem %s3772_s2, %s2922_s9  ;;  %s2671_s15 = sshll.u32 %s3775_s13, 1 }
  0x10   : > { %s3523_s25 = scalar_lea.vmem %s3770_s0, %s3369_s22  ;;  %s181_s18 = scalar_lea.vmem %s3773_s3, %s2671_s15 }
  0x11   : > { %v3379_v8 = vld [vmem:[%s3523_s25 + $0x4c] sm:$0xff]   ;;  %v3380_v9 = vld [vmem:[%s3523_s25 + $0xe4] sm:$0xff]   ;;  %v3382_v10 = vld [vmem:[%s3523_s25 + $0x54] sm:$0xff]  }
  0x12   : > { %3069 = vmatprep.mubr.msk.bf16.mxu1 %vm262_vm1, %v3379_v8  ;;  %3141 = vmatprep.mubr.msk.bf16.mxu0 %vm262_vm1, %v3380_v9  ;;  %v3383_v13 = vld [vmem:[%s3523_s25 + $0xec] sm:$0xff]   ;;  %v3384_v16 = vld [vmem:[%s3523_s25 + $0x5c] sm:$0xff]   ;;  %v3385_v17 = vld [vmem:[%s3523_s25 + $0xf4] sm:$0xff]  }
  0x13   : > { %3070 = vmatmul.mubr.msk.bf16.vlgmr.msra.gmra.mrb[0].mxu1 %vm262_vm1, %v3382_v10  ;;  %3142 = vmatmul.mubr.msk.bf16.vlgmr.msra.gmra.mrb[0].mxu0 %vm262_vm1, %v3383_v13  ;;  %v3386_v18 = vld [vmem:[%s3523_s25 + $0x64] sm:$0xff]   ;;  %v3387_v19 = vld [vmem:[%s3523_s25 + $0xfc] sm:$0xff]   ;;  %v3388_v20 = vld [vmem:[%s3523_s25 + $0x6c] sm:$0xff]  }
  0x14   : > { %3086 = vmatpush3.bf16.msra.mxu1 %v453_v11  ;;  %3158 = vmatpush3.bf16.msra.mxu0 %v1380_v14  ;;  %v3389_v21 = vld [vmem:[%s3523_s25 + $0x98] sm:$0xff]   ;;  %v3390_v22 = vld [vmem:[%s3523_s25 + $0xa0] sm:$0xff]   ;;  %v3392_v27 = vld [vmem:[%s3523_s25 + $0xa8] sm:$0xff]   ;;  %v883_v14 = vrot.slane %v3592_v5, 2 }
  0x15   : > { %3073 = vmatprep.mubr.msk.bf16.mxu1 %vm262_vm1, %v3384_v16  ;;  %3145 = vmatprep.mubr.msk.bf16.mxu0 %vm262_vm1, %v3385_v17  ;;  %v1284_v23 = vshrl.u32 %v3389_v21, 16  ;;  %v1286_v24 = vshll.u32 %v3389_v21, 16  ;;  %v1291_v25 = vshll.u32 %v3390_v22, 16  ;;  %v1295_v26 = vshrl.u32 %v3390_v22, 16  ;;  %v3391_v32 = vld [vmem:[%s3523_s25 + $0x74] sm:$0xff]   ;;  %v3393_v38 = vld [vmem:[%s3523_s25 + $0x7c] sm:$0xff]  }
  0x16   : > { %3366 = vmatprep.subr.msk.bf16.mxu0 %vm287_vm0, %v1511_v12  ;;  %3361 = vmatprep.subr.msk.bf16.mxu1 %vm287_vm0, %v3540_v15  ;;  %v3394_v33 = vld [vmem:[%s3523_s25 + $0xb0] sm:$0xff]   ;;  %v1299_v34 = vshll.u32 %v3392_v27, 16  ;;  %v1303_v35 = vshrl.u32 %v3392_v27, 16  ;;  %v3396_v41 = vld [vmem:[%s3523_s25 + $0xb8] sm:$0xff]   ;;  %v3398_v49 = vld [vmem:[%s3523_s25 + $0xc0] sm:$0xff]   ;;  %v707_v12 = vsel %vm287_vm0, %v3540_v15, 0 }
  0x17   : > { %v1288_v30 = vrot.slane %v1286_v24, 1  ;;  %v1293_v31 = vrot.slane %v1291_v25, 1  ;;  %v1307_v39 = vshll.u32 %v3394_v33, 16  ;;  %v1311_v44 = vshrl.u32 %v3394_v33, 16  ;;  %v3400_v55 = vld [vmem:[%s3523_s25 + $0xc8] sm:$0xff]   ;;  %v3402_v59 = vld [vmem:[%s3523_s25 + $0xd0] sm:$0xff]  }
  0x18   : > { %v1301_v40 = vrot.slane %v1299_v34, 1  ;;  %v1315_v47 = vshll.u32 %v3396_v41, 16  ;;  %v1319_v50 = vshrl.u32 %v3396_v41, 16  ;;  %v1323_v54 = vshll.u32 %v3398_v49, 16  ;;  %v3395_v57 = vld [vmem:[%s3523_s25 + $0x84] sm:$0xff]   ;;  %v3401_v13 = vld [vmem:[%s3523_s25 + $0x10] sm:$0xff]  }
  0x19   : > { %v1289_v36 = vor.u32 %v1288_v30, %v1284_v23  ;;  %v1297_v37 = vor.u32 %v1295_v26, %v1293_v31  ;;  %v1309_v43 = vrot.slane %v1307_v39, 1  ;;  %v3397_v60 = vld [vmem:[%s3523_s25] sm:$0xff]   ;;  %v1331_v61 = vshll.u32 %v3400_v55, 16  ;;  %v3404_v6 = vld [vmem:[%s3523_s25 + $0xd8] ss:$0 sps:$4 sm:$0x11]  }
  0x1a   : > { %v1305_v46 = vor.u32 %v1303_v35, %v1301_v40  ;;  %v1317_v52 = vrot.slane %v1315_v47, 1  ;;  %v1325_v58 = vrot.slane %v1323_v54, 1  ;;  %v1327_v63 = vshrl.u32 %v3398_v49, 16  ;;  %v3399_v11 = vld [vmem:[%s3523_s25 + $0x8] sm:$0xff]   ;;  %v3403_v21 = vld [vmem:[%s3523_s25 + $0x18] sm:$0xff]   ;;  %v3405_v22 = vld [vmem:[%s3523_s25 + $0x20] sm:$0xff]  }
  0x1b   : > { %3074 = vmatmul.mubr.msk.bf16.gmra.mrb[4].mxu1 %vm262_vm1, %v3386_v18  ;;  %3146 = vmatmul.mubr.msk.bf16.gmra.mrb[4].mxu0 %vm262_vm1, %v3387_v19  ;;  %v1294_v42 = vsel %vm613_vm2, %v1289_v36, %v1293_v31  ;;  %v1302_v45 = vsel %vm613_vm2, %v1297_v37, %v1301_v40  ;;  %v1313_v53 = vor.u32 %v1311_v44, %v1309_v43  ;;  %v1335_v2 = vshrl.u32 %v3400_v55, 16  ;;  %v3406_v23 = vld [vmem:[%s3523_s25 + $0x8] sm:$0xff]   ;;  %v3414_v25 = vld [vmem:[%s3523_s25] sm:$0xff]   ;;  %v3409_v30 = vld [vmem:[%s3523_s25 + $0x10] sm:$0xff]  }
  0x1c   : > { %3077 = vmatprep.mubr.msk.bf16.mxu1 %vm262_vm1, %v3388_v20  ;;  %3159 = vmatprep.mubr.msk.bf16.mxu0 %vm262_vm1, %v1294_v42  ;;  %v1310_v51 = vsel %vm613_vm2, %v1305_v46, %v1309_v43  ;;  %v1321_v56 = vor.u32 %v1319_v50, %v1317_v52  ;;  %v1339_v4 = vshll.u32 %v3402_v59, 16  ;;  %v1333_v7 = vrot.slane %v1331_v61, 1  ;;  %v3415_v26 = vld [vmem:[%s3523_s25 + $0x8] sm:$0xff]   ;;  %v3410_v31 = vld [vmem:[%s3523_s25 + $0x30] sm:$0xff]   ;;  %v3420_v40 = vld [vmem:[%s3523_s25 + $0x18] sm:$0xff]  }
  0x1d   : > { %v1318_v62 = vsel %vm613_vm2, %v1313_v53, %v1317_v52  ;;  %v1329_v8 = vor.u32 %v1327_v63, %v1325_v58  ;;  %v1343_v17 = vshrl.u32 %v3402_v59, 16  ;;  %v1347_v18 = vshll.u32 %v3404_v6, 16  ;;  %v3634_v37 = vld [vmem:[%s3771_s1 + $0x10] sm:$0x3]  ;;  %v3412_v41 = vld [vmem:[%s3523_s25 + $0x38] sm:$0xff]   ;;  %v3413_v42 = vld [vmem:[%s3523_s25 + $0x20] sm:$0xff]  }
  0x1e   : > { %v1326_v0 = vsel %vm613_vm2, %v1321_v56, %v1325_v58  ;;  %v1337_v9 = vor.u32 %v1335_v2, %v1333_v7  ;;  %v1341_v10 = vrot.slane %v1339_v4, 1  ;;  %v617_v27 = vshll.u32 %v3414_v25, 16  ;;  %v3417_v46 = vld [vmem:[%s3523_s25 + $0x28] sm:$0xff]   ;;  %v3422_v49 = vld [vmem:[%s3523_s25 + $0x20] sm:$0xff]   ;;  %v3426_v2 = vld [vmem:[%s3523_s25 + $0x30] sm:$0xff]  }
  0x1f   : > { %v1334_v16 = vsel %vm613_vm2, %v1329_v8, %v1333_v7  ;;  %v1349_v20 = vrot.slane %v1347_v18, 1  ;;  %v615_v33 = vshrl.u32 %v3414_v25, 16  ;;  %v622_v35 = vshll.u32 %v3415_v26, 16  ;;  %v3424_v53 = vld [vmem:[%s3523_s25 + $0x28] sm:$0xff]   ;;  %v3428_v7 = vld [vmem:[%s3523_s25 + $0x38] sm:$0xff]   ;;  %v3423_v8 = vld [vmem:[%s3523_s25 + $0x40] sm:$0xff]  }
  0x20   : > { %v1342_v19 = vsel %vm613_vm2, %v1337_v9, %v1341_v10  ;;  %v1345_v15 = vor.u32 %v1343_v17, %v1341_v10  ;;  %v619_v34 = vrot.slane %v617_v27, 1  ;;  %v1778_v36 = vsel %vm287_vm0, %v1752_v48, 0  ;;  %v3430_v18 = vld [vmem:[%s3523_s25 + $0x40] ss:$0 sps:$4 sm:$0x11]   ;;  %v3429_v25 = vld [vmem:[%s3523_s25 + $0x64] sm:$0xff]  }
  0x21   : > { %v624_v39 = vrot.slane %v622_v35, 1  ;;  %v626_v43 = vshrl.u32 %v3415_v26, 16  ;;  %v638_v47 = vshll.u32 %v3420_v40, 16  ;;  %v646_v55 = vshll.u32 %v3422_v49, 16  ;;  %v3442_v35 = vld [vmem:[%s3523_s25 + $0x10] sm:$0xff]  }
  0x22   : > { %v1350_v24 = vsel %vm613_vm2, %v1345_v15, %v1349_v20  ;;  %v620_v29 = vor.u32 %v619_v34, %v615_v33  ;;  %v642_v58 = vshrl.u32 %v3420_v40, 16  ;;  %v909_v59 = vsel %vm287_vm0, %v883_v14, 0  ;;  %v3433_v33 = vld [vmem:[%s3523_s25 + $0x74] sm:$0xff]   ;;  %v3441_v34 = vld [vmem:[%s3523_s25 + $0x8] sm:$0xff]  }
  0x23   : > { %3078 = vmatmul.mubr.msk.bf16.gmra.mrb[8].mxu1 %vm262_vm1, %v3391_v32  ;;  %3160 = vmatmul.mubr.msk.bf16.vlgmr.msra.gmra.mrb[0].mxu0 %vm262_vm1, %v1302_v45  ;;  %v3411_v32 = vld [vmem:[%s3523_s25 + $0x18] sm:$0xff]   ;;  %v628_v50 = vor.u32 %v626_v43, %v624_v39  ;;  %v640_v52 = vrot.slane %v638_v47, 1  ;;  %v650_v61 = vshrl.u32 %v3422_v49, 16  ;;  %v662_v9 = vshll.u32 %v3426_v2, 16  ;;  %v3438_v47 = vld [vmem:[%s3523_s25 + $0xb0] sm:$0xff]  }
  0x24   : > { %3081 = vmatprep.mubr.msk.bf16.mxu1 %vm262_vm1, %v3393_v38  ;;  %3176 = vmatpush3.bf16.msra.mxu0 %v1577_v28  ;;  %v3408_v28 = vld [vmem:[%s3523_s25 + $0x28] sm:$0xff]   ;;  %v3418_v38 = vld [vmem:[%s3523_s25 + $0x10] sm:$0xff]   ;;  %v625_v45 = vsel %vm613_vm2, %v620_v29, %v624_v39  ;;  %v2047_v26 = vsel %vm287_vm0, %v3634_v37, 0  ;;  %v1955_v40 = vshrl.u32 %v3441_v34, 16  ;;  %v3444_v43 = vld [vmem:[%s3523_s25 + $0x18] sm:$0xff]  }
  0x25   : > { %3163 = vmatprep.mubr.msk.bf16.mxu0 %vm262_vm1, %v1310_v51  ;;  %3367 = vmatprep.subr.msk.bf16.mxu0 %vm287_vm0, %v1752_v48  ;;  %v630_v44 = vshll.u32 %v3418_v38, 16  ;;  %v634_v48 = vshrl.u32 %v3418_v38, 16  ;;  %v644_v4 = vor.u32 %v642_v58, %v640_v52  ;;  %v664_v17 = vrot.slane %v662_v9, 1  ;;  %v3435_v38 = vld [vmem:[%s3523_s25 + $0x7c] sm:$0xff]   ;;  %v3436_v29 = vld [vmem:[%s3523_s25 + $0xa8] sm:$0xff]  }
  0x26   : > { %v3437_v39 = vld [vmem:[%s3523_s25 + $0x84] sm:$0xff]   ;;  %v3440_v49 = vld [vmem:[%s3523_s25 + $0xb8] sm:$0xff]  }
  0x27   : > { %v632_v51 = vrot.slane %v630_v44, 1 }
  0x29   : > { %v636_v54 = vor.u32 %v634_v48, %v632_v51  ;;  %v633_v56 = vsel %vm613_vm2, %v628_v50, %v632_v51  ;;  %v3439_v48 = vld [vmem:[%s3523_s25 + $0x8c] sm:$0xff]   ;;  %v1970_v50 = vshll.u32 %v3444_v43, 16  ;;  %v1966_v51 = vshrl.u32 %v3442_v35, 16 }
  0x2b   : > { %3082 = vmatmul.mubr.msk.bf16.gmra.mrb[12].mxu1 %vm262_vm1, %v3395_v57  ;;  %3164 = vmatmul.mubr.msk.bf16.gmra.mrb[4].mxu0 %vm262_vm1, %v1318_v62  ;;  %v3419_v57 = vld [vmem:[%s3523_s25 + $0x30] sm:$0xff]   ;;  %v654_v62 = vshll.u32 %v3424_v53, 16  ;;  %v641_v63 = vsel %vm613_vm2, %v636_v54, %v640_v52  ;;  %v1974_v52 = vshrl.u32 %v3444_v43, 16  ;;  %v1972_v54 = vrot.slane %v1970_v50, 1 }
  0x2c   : > { %3087 = vmatprep.mubr.msk.bf16.mxu1 %vm262_vm1, %v3397_v60  ;;  %3167 = vmatprep.mubr.msk.bf16.mxu0 %vm262_vm1, %v1326_v0  ;;  %v3421_v60 = vld [vmem:[%s3523_s25 + $0x38] sm:$0xff]   ;;  %v648_v0 = vrot.slane %v646_v55, 1  ;;  %v3448_v55 = vld [vmem:[%s3523_s25 + $0x28] sm:$0xff]  }
  0x2d   : > { %v656_v6 = vrot.slane %v654_v62, 1  ;;  %v1986_v62 = vshll.u32 %v3448_v55, 16 }
  0x2e   : > { %v652_v5 = vor.u32 %v650_v61, %v648_v0  ;;  %v649_v10 = vsel %vm613_vm2, %v644_v4, %v648_v0  ;;  %v3445_v61 = vld [vmem:[%s3523_s25 + $0xc8] sm:$0xff]   ;;  %v1990_v4 = vshrl.u32 %v3448_v55, 16 }
  0x33   : > { %3088 = vmatmul.mubr.msk.bf16.vlgmr.msra.gmra.mrb[0].mxu1 %vm262_vm1, %v3399_v11  ;;  %3168 = vmatmul.mubr.msk.bf16.gmra.mrb[8].mxu0 %vm262_vm1, %v1334_v16  ;;  %v3425_v11 = vld [vmem:[%s3523_s25 + $0x54] sm:$0xff]   ;;  %v670_v16 = vshll.u32 %v3428_v7, 16 }
  0x34   : > { %3104 = vmatpush3.bf16.msra.mxu1 %v707_v12  ;;  %3091 = vmatprep.mubr.msk.bf16.mxu1 %vm262_vm1, %v3401_v13  ;;  %v658_v12 = vshrl.u32 %v3424_v53, 16  ;;  %v657_v13 = vsel %vm613_vm2, %v652_v5, %v656_v6 }
  0x35   : > { %3171 = vmatprep.mubr.msk.bf16.mxu0 %vm262_vm1, %v1342_v19  ;;  %3362 = vmatprep.subr.msk.bf16.mxu1 %vm287_vm0, %v883_v14  ;;  %v666_v14 = vshrl.u32 %v3426_v2, 16  ;;  %v672_v15 = vrot.slane %v670_v16, 1 }
  0x37   : > { %v668_v19 = vor.u32 %v666_v14, %v664_v17 }
  0x3b   : > { %3092 = vmatmul.mubr.msk.bf16.gmra.mrb[4].mxu1 %vm262_vm1, %v3403_v21  ;;  %3172 = vmatmul.mubr.msk.bf16.gmra.mrb[12].mxu0 %vm262_vm1, %v1350_v24  ;;  %v3427_v21 = vld [vmem:[%s3523_s25 + $0x5c] sm:$0xff]   ;;  %v673_v24 = vsel %vm613_vm2, %v668_v19, %v672_v15 }
  0x3c   : > { %3095 = vmatprep.mubr.msk.bf16.mxu1 %vm262_vm1, %v3405_v22  ;;  %3177 = vmatprep.mubr.msk.bf16.mxu0 %vm262_vm1, %v3406_v23  ;;  %v674_v22 = vshrl.u32 %v3428_v7, 16  ;;  %v678_v23 = vshll.u32 %v3430_v18, 16  ;;  %v3452_v7 = vld [vmem:[%s3523_s25 + $0x38] sm:$0xff]  }
  0x3d   : > { %v2002_v14 = vshll.u32 %v3452_v7, 16 }
  0x3e   : > { %v676_v27 = vor.u32 %v674_v22, %v672_v15 }
  0x3f   : > { %v2004_v15 = vrot.slane %v2002_v14, 1 }
  0x43   : > { %3096 = vmatmul.mubr.msk.bf16.gmra.mrb[8].mxu1 %vm262_vm1, %v3408_v28  ;;  %3178 = vmatmul.mubr.msk.bf16.vlgmr.msra.gmra.mrb[0].mxu0 %vm262_vm1, %v3409_v30  ;;  %v680_v28 = vrot.slane %v678_v23, 1 }
  0x44   : > { %3099 = vmatprep.mubr.msk.bf16.mxu1 %vm262_vm1, %v3410_v31  ;;  %3194 = vmatpush3.bf16.msra.mxu0 %v1778_v36  ;;  %v3431_v31 = vld [vmem:[%s3523_s25 + $0x6c] sm:$0xff]   ;;  %v1957_v36 = vshll.u32 %v3441_v34, 16 }
  0x45   : > { %3181 = vmatprep.mubr.msk.bf16.mxu0 %vm262_vm1, %v3411_v32  ;;  %3368 = vmatprep.subr.msk.bf16.mxu0 %vm287_vm0, %v3634_v37  ;;  %v681_v30 = vsel %vm613_vm2, %v676_v27, %v680_v28  ;;  %v3432_v32 = vld [vmem:[%s3523_s25 + $0x98] sm:$0xff]   ;;  %v3434_v37 = vld [vmem:[%s3523_s25 + $0xa0] sm:$0xff]  }
  0x4b   : > { %3100 = vmatmul.mubr.msk.bf16.gmra.mrb[12].mxu1 %vm262_vm1, %v3412_v41  ;;  %3182 = vmatmul.mubr.msk.bf16.gmra.mrb[4].mxu0 %vm262_vm1, %v3413_v42  ;;  %v1959_v41 = vrot.slane %v1957_v36, 1  ;;  %v1962_v42 = vshll.u32 %v3442_v35, 16 }
  0x4c   : > { %3105 = vmatprep.mubr.msk.bf16.mxu1 %vm262_vm1, %v625_v45  ;;  %3185 = vmatprep.mubr.msk.bf16.mxu0 %vm262_vm1, %v3417_v46  ;;  %v3446_v46 = vld [vmem:[%s3523_s25 + $0x20] sm:$0xff]  }
  0x4d   : > { %v1960_v44 = vor.u32 %v1959_v41, %v1955_v40  ;;  %v1964_v45 = vrot.slane %v1962_v42, 1  ;;  %v1978_v53 = vshll.u32 %v3446_v46, 16  ;;  %v1982_v0 = vshrl.u32 %v3446_v46, 16 }
  0x4f   : > { %v1980_v58 = vrot.slane %v1978_v53, 1 }
  0x53   : > { %3106 = vmatmul.mubr.msk.bf16.vlgmr.msra.gmra.mrb[0].mxu1 %vm262_vm1, %v633_v56  ;;  %3186 = vmatmul.mubr.msk.bf16.gmra.mrb[8].mxu0 %vm262_vm1, %v3419_v57  ;;  %v1968_v56 = vor.u32 %v1966_v51, %v1964_v45  ;;  %v1976_v57 = vor.u32 %v1974_v52, %v1972_v54 }
  0x54   : > { %3122 = vmatpush3.bf16.msra.mxu1 %v909_v59  ;;  %3109 = vmatprep.mubr.msk.bf16.mxu1 %vm262_vm1, %v641_v63  ;;  %v3450_v59 = vld [vmem:[%s3523_s25 + $0x30] sm:$0xff]  }
  0x55   : > { %3189 = vmatprep.mubr.msk.bf16.mxu0 %vm262_vm1, %v3421_v60  ;;  %3364 = vmatprep.subr.msk.bf16.mxu1 %vm287_vm0, %v3499_v1  ;;  %v660_v1 = vor.u32 %v658_v12, %v656_v6  ;;  %v3443_v60 = vld [vmem:[%s3523_s25 + $0xc0] sm:$0xff]   ;;  %v1973_v63 = vsel %vm613_vm2, %v1968_v56, %v1972_v54  ;;  %v1981_v2 = vsel %vm613_vm2, %v1976_v57, %v1980_v58  ;;  %v1994_v5 = vshll.u32 %v3450_v59, 16  ;;  %v3447_v12 = vld [vmem:[%s3523_s25 + $0xd0] sm:$0xff]  }
  0x56   : > { %v1988_v6 = vrot.slane %v1986_v62, 1 }
  0x57   : > { %v665_v20 = vsel %vm613_vm2, %v660_v1, %v664_v17  ;;  %v1998_v17 = vshrl.u32 %v3450_v59, 16  ;;  %v2006_v1 = vshrl.u32 %v3452_v7, 16 }
  0x58   : > { %v1992_v9 = vor.u32 %v1990_v4, %v1988_v6 }
  0x59   : > { %v2008_v22 = vor.u32 %v2006_v1, %v2004_v15 }
  0x5b   : > { %3110 = vmatmul.mubr.msk.bf16.gmra.mrb[4].mxu1 %vm262_vm1, %v649_v10  ;;  %3190 = vmatmul.mubr.msk.bf16.gmra.mrb[12].mxu0 %vm262_vm1, %v3423_v8  ;;  %v1984_v8 = vor.u32 %v1982_v0, %v1980_v58  ;;  %v1996_v10 = vrot.slane %v1994_v5, 1 }
  0x5c   : > { %3113 = vmatprep.mubr.msk.bf16.mxu1 %vm262_vm1, %v657_v13  ;;  %3195 = vmatprep.mubr.msk.bf16.mxu0 %vm262_vm1, %v3425_v11  ;;  %v3454_v11 = vld [vmem:[%s3523_s25 + $0x40] sm:$0xff]  }
  0x5d   : > { %v3449_v13 = vld [vmem:[%s3523_s25 + $0x104] sm:$0xff]   ;;  %v1989_v16 = vsel %vm613_vm2, %v1984_v8, %v1988_v6  ;;  %v1997_v18 = vsel %vm613_vm2, %v1992_v9, %v1996_v10  ;;  %v2010_v19 = vshll.u32 %v3454_v11, 16  ;;  %v2014_v27 = vshrl.u32 %v3454_v11, 16 }
  0x5f   : > { %v2012_v23 = vrot.slane %v2010_v19, 1 }
  0x63   : > { %3114 = vmatmul.mubr.msk.bf16.gmra.mrb[8].mxu1 %vm262_vm1, %v665_v20  ;;  %3196 = vmatmul.mubr.msk.bf16.vlgmr.msra.gmra.mrb[0].mxu0 %vm262_vm1, %v3427_v21  ;;  %v2000_v20 = vor.u32 %v1998_v17, %v1996_v10  ;;  %v3456_v21 = vld [vmem:[%s3523_s25 + $0x48] ss:$0 sps:$4 sm:$0x11]  }
  0x64   : > { %3117 = vmatprep.mubr.msk.bf16.mxu1 %vm262_vm1, %v673_v24  ;;  %3212 = vmatpush3.bf16.msra.mxu0 %v2047_v26  ;;  %v3451_v24 = vld [vmem:[%s3523_s25 + $0x10c] sm:$0xff]   ;;  %v2018_v28 = vshll.u32 %v3456_v21, 16 }
  0x65   : > { %3199 = vmatprep.mubr.msk.bf16.mxu0 %vm262_vm1, %v3429_v25  ;;  %v3453_v25 = vld [vmem:[%s3523_s25 + $0x114] sm:$0xff]   ;;  %v2005_v26 = vsel %vm613_vm2, %v2000_v20, %v2004_v15 }
  0x6b   : > { %3118 = vmatmul.mubr.msk.bf16.gmra.mrb[12].mxu1 %vm262_vm1, %v681_v30  ;;  %3200 = vmatmul.mubr.msk.bf16.gmra.mrb[4].mxu0 %vm262_vm1, %v3431_v31  ;;  %v2013_v30 = vsel %vm613_vm2, %v2008_v22, %v2012_v23  ;;  %v2016_v31 = vor.u32 %v2014_v27, %v2012_v23 }
  0x6c   : > { %3123 = vmatprep.mubr.msk.bf16.mxu1 %vm262_vm1, %v3432_v32  ;;  %3203 = vmatprep.mubr.msk.bf16.mxu0 %vm262_vm1, %v3433_v33  ;;  %v2020_v32 = vrot.slane %v2018_v28, 1  ;;  %v3455_v33 = vld [vmem:[%s3523_s25 + $0x11c] sm:$0xff]  }
  0x6e   : > { %v2021_v34 = vsel %vm613_vm2, %v2016_v31, %v2020_v32 }
  0x73   : > { %3124 = vmatmul.mubr.msk.bf16.vlgmr.msra.gmra.mrb[0].mxu1 %vm262_vm1, %v3434_v37  ;;  %3204 = vmatmul.mubr.msk.bf16.gmra.mrb[8].mxu0 %vm262_vm1, %v3435_v38 }
  0x74   : > { %3230 = vmatpush3.bf16.msra.mxu1 %v3505_v3  ;;  %3127 = vmatprep.mubr.msk.bf16.mxu1 %vm262_vm1, %v3436_v29  ;;  %v1965_v3 = vsel %vm613_vm2, %v1960_v44, %v1964_v45 }
  0x75   : > { %3207 = vmatprep.mubr.msk.bf16.mxu0 %vm262_vm1, %v3437_v39 }
  0x7b   : > { %3128 = vmatmul.mubr.msk.bf16.gmra.mrb[4].mxu1 %vm262_vm1, %v3438_v47  ;;  %3208 = vmatmul.mubr.msk.bf16.gmra.mrb[12].mxu0 %vm262_vm1, %v3439_v48 }
  0x7c   : > { %3131 = vmatprep.mubr.msk.bf16.mxu1 %vm262_vm1, %v3440_v49  ;;  %3213 = vmatprep.mubr.msk.bf16.mxu0 %vm262_vm1, %v1965_v3 }
  0x83   : > { %3132 = vmatmul.mubr.msk.bf16.gmra.mrb[8].mxu1 %vm262_vm1, %v3443_v60  ;;  %3214 = vmatmul.mubr.msk.bf16.vlgmr.msra.gmra.mrb[0].mxu0 %vm262_vm1, %v1973_v63 }
  0x84   : > { %3135 = vmatprep.mubr.msk.bf16.mxu1 %vm262_vm1, %v3445_v61  ;;  %3217 = vmatprep.mubr.msk.bf16.mxu0 %vm262_vm1, %v1981_v2 }
  0x8b   : > { %3136 = vmatmul.mubr.msk.bf16.gmra.mrb[12].mxu1 %vm262_vm1, %v3447_v12  ;;  %3218 = vmatmul.mubr.msk.bf16.gmra.mrb[4].mxu0 %vm262_vm1, %v1989_v16 }
  0x8c   : > { %3149 = vmatprep.mubr.msk.bf16.mxu1 %vm262_vm1, %v3449_v13  ;;  %3221 = vmatprep.mubr.msk.bf16.mxu0 %vm262_vm1, %v1997_v18 }
  0x93   : > { %3150 = vmatmul.mubr.msk.bf16.vlgmr.msra.gmra.mrb[8].mxu1 %vm262_vm1, %v3451_v24  ;;  %3222 = vmatmul.mubr.msk.bf16.gmra.mrb[8].mxu0 %vm262_vm1, %v2005_v26 }
  0x94   : > { %3153 = vmatprep.mubr.msk.bf16.mxu1 %vm262_vm1, %v3453_v25  ;;  %3225 = vmatprep.mubr.msk.bf16.mxu0 %vm262_vm1, %v2013_v30 }
  0x9b   : > { %3154 = vmatmul.mubr.msk.bf16.gmra.mrb[12].mxu1 %vm262_vm1, %v3455_v33  ;;  %3226 = vmatmul.mubr.msk.bf16.gmra.mrb[12].mxu0 %vm262_vm1, %v2021_v34 }
 0x146   : > { %v3125_v35 = vpop.f32.mrb[0].mxu1 }
 0x147   : > { %v945_v36 = vpop.f32.mrb[1].mxu1 }
 0x148   : > { %v3126_v37 = vpop.f32.mrb[2].mxu1 }
 0x149   : > { %v948_v38 = vpop.f32.mrb[3].mxu1 }
 0x14e   : > { %v3129_v29 = vpop.f32.mrb[4].mxu1 }
 0x14f   : > { %v961_v39 = vpop.f32.mrb[5].mxu1 }
 0x150   : > { %v3130_v40 = vpop.f32.mrb[6].mxu1 }
 0x151   : > { %v964_v41 = vpop.f32.mrb[7].mxu1 }
 0x156   : > { %v3215_v42 = vpop.f32.mrb[0].mxu0 }
 0x157   : > { %v3231_v43 = vadd.f32 %v3215_v42, %v3125_v35  ;;  %v2083_v44 = vpop.f32.mrb[1].mxu0 }
 0x158   : > { %v3232_v45 = vadd.f32 %v2083_v44, %v945_v36  ;;  %v3216_v46 = vpop.f32.mrb[2].mxu0 }
 0x159   : > { %v2539_v47 = vmul.f32 %v3231_v43, %v3231_v43  ;;  %v3233_v48 = vadd.f32 %v3216_v46, %v3126_v37  ;;  %v2086_v49 = vpop.f32.mrb[3].mxu0 }
 0x15a   : > { %v2516_v50 = vadd.f32 %v3232_v45, %v3231_v43  ;;  %v2537_v51 = vmul.f32 %v3232_v45, %v3232_v45  ;;  %v3234_v3 = vadd.f32 %v2086_v49, %v948_v38 }
 0x15b   : > { %v2947_v52 = vpack.c.bf16 %v3233_v48, %v3231_v43 }
 0x15c   : > { %v2554_v53 = vadd.f32 %v2539_v47, %v2537_v51  ;;  %v2942_v54 = vpack.c.bf16 %v3234_v3, %v3232_v45 }
 0x15d   : > { %2979 = vst [vmem:[%s3753_s14 + $0x8] sm:$0xff] %v2947_v52  }
 0x15e   : > { %2943 = vst [vmem:[%s3753_s14] sm:$0xff] %v2942_v54   ;;  %v3219_v55 = vpop.f32.mrb[4].mxu0 }
 0x15f   : > { %v3235_v56 = vadd.f32 %v3219_v55, %v3129_v29  ;;  %v2099_v57 = vpop.f32.mrb[5].mxu0 }
 0x160   : > { %v3236_v58 = vadd.f32 %v2099_v57, %v961_v39  ;;  %v3220_v59 = vpop.f32.mrb[6].mxu0 }
 0x161   : > { %v3237_v60 = vadd.f32 %v3220_v59, %v3130_v40  ;;  %v2102_v61 = vpop.f32.mrb[7].mxu0  ;;  %v2543_v4 = vmul.f32 %v3235_v56, %v3235_v56 }
 0x162   : > { %v2518_v62 = vadd.f32 %v3236_v58, %v2516_v50  ;;  %v2541_v63 = vmul.f32 %v3236_v58, %v3236_v58  ;;  %v3238_v0 = vadd.f32 %v2102_v61, %v964_v41 }
 0x163   : > { %v2957_v2 = vpack.c.bf16 %v3237_v60, %v3235_v56 }
 0x164   : > { %v2556_v5 = vadd.f32 %v2554_v53, %v2541_v63  ;;  %v2952_v6 = vpack.c.bf16 %v3238_v0, %v3236_v58  ;;  %v2520_v7 = vadd.f32 %v3235_v56, %v2518_v62 }
 0x165   : > { %2981 = vst [vmem:[%s3753_s14 + $0x18] sm:$0xff] %v2957_v2  }
 0x166   : > { %v3151_v8 = vpop.f32.mrb[8].mxu1  ;;  %2980 = vst [vmem:[%s3753_s14 + $0x10] sm:$0xff] %v2952_v6   ;;  %v3223_v9 = vpop.f32.mrb[8].mxu0  ;;  %v2558_v11 = vadd.f32 %v2556_v5, %v2543_v4 }
 0x167   : > { %v1175_v10 = vpop.f32.mrb[9].mxu1  ;;  %v3239_v12 = vadd.f32 %v3223_v9, %v3151_v8  ;;  %v2115_v13 = vpop.f32.mrb[9].mxu0 }
 0x168   : > { %v3152_v14 = vpop.f32.mrb[10].mxu1  ;;  %v3240_v16 = vadd.f32 %v2115_v13, %v1175_v10  ;;  %v3224_v17 = vpop.f32.mrb[10].mxu0 }
 0x169   : > { %v1178_v18 = vpop.f32.mrb[11].mxu1  ;;  %v3241_v1 = vadd.f32 %v3224_v17, %v3152_v14  ;;  %v2118_v19 = vpop.f32.mrb[11].mxu0  ;;  %v2547_v23 = vmul.f32 %v3239_v12, %v3239_v12 }
 0x16a   : > { %v2522_v15 = vadd.f32 %v3240_v16, %v2520_v7  ;;  %v2545_v20 = vmul.f32 %v3240_v16, %v3240_v16  ;;  %v3242_v21 = vadd.f32 %v2118_v19, %v1178_v18 }
 0x16b   : > { %v2967_v22 = vpack.c.bf16 %v3241_v1, %v3239_v12 }
 0x16c   : > { %v2560_v24 = vadd.f32 %v2558_v11, %v2545_v20  ;;  %v2962_v25 = vpack.c.bf16 %v3242_v21, %v3240_v16  ;;  %v2524_v26 = vadd.f32 %v3239_v12, %v2522_v15 }
 0x16d   : > { %2983 = vst [vmem:[%s3753_s14 + $0x28] sm:$0xff] %v2967_v22  }
 0x16e   : > { %v3155_v27 = vpop.f32.mrb[12].mxu1  ;;  %2982 = vst [vmem:[%s3753_s14 + $0x20] sm:$0xff] %v2962_v25   ;;  %v3227_v28 = vpop.f32.mrb[12].mxu0  ;;  %v2562_v31 = vadd.f32 %v2560_v24, %v2547_v23 }
 0x16f   : > { %v1191_v30 = vpop.f32.mrb[13].mxu1  ;;  %v3243_v32 = vadd.f32 %v3227_v28, %v3155_v27  ;;  %v2131_v33 = vpop.f32.mrb[13].mxu0 }
 0x170   : > { %v3156_v34 = vpop.f32.mrb[14].mxu1  ;;  %v3244_v35 = vadd.f32 %v2131_v33, %v1191_v30  ;;  %v3228_v36 = vpop.f32.mrb[14].mxu0 }
 0x171   : > { %v1194_v37 = vpop.f32.mrb[15].mxu1  ;;  %v3245_v38 = vadd.f32 %v3228_v36, %v3156_v34  ;;  %v2134_v29 = vpop.f32.mrb[15].mxu0  ;;  %v2551_v43 = vmul.f32 %v3243_v32, %v3243_v32 }
 0x172   : > { %v2526_v39 = vadd.f32 %v3244_v35, %v2524_v26  ;;  %v2549_v40 = vmul.f32 %v3244_v35, %v3244_v35  ;;  %v3246_v41 = vadd.f32 %v2134_v29, %v1194_v37 }
 0x173   : > { %v2977_v42 = vpack.c.bf16 %v3245_v38, %v3243_v32 }
 0x174   : > { %v2528_v44 = vadd.f32 %v3243_v32, %v2526_v39  ;;  %v2564_v45 = vadd.f32 %v2562_v31, %v2549_v40  ;;  %v2972_v46 = vpack.c.bf16 %v3246_v41, %v3244_v35 }
 0x175   : > { %2985 = vst [vmem:[%s3753_s14 + $0x38] sm:$0xff] %v2977_v42  }
 0x176   : > { %v2530_v47 = vrot.slane %v2528_v44, 4  ;;  %v2566_v48 = vadd.f32 %v2564_v45, %v2551_v43  ;;  %2984 = vst [vmem:[%s3753_s14 + $0x30] sm:$0xff] %v2972_v46  }
 0x178   : > { %v2531_v49 = vadd.f32 %v2530_v47, %v2528_v44  ;;  %v2568_v50 = vrot.slane %v2566_v48, 4 }
 0x17a   : > { %v2532_v51 = vrot.slane %v2531_v49, 2  ;;  %v2569_v3 = vadd.f32 %v2568_v50, %v2566_v48 }
 0x17c   : > { %v2533_v52 = vadd.f32 %v2532_v51, %v2531_v49  ;;  %v2570_v53 = vrot.slane %v2569_v3, 2 }
 0x17e   : > { %v2534_v54 = vrot.slane %v2533_v52, 1  ;;  %v2571_v55 = vadd.f32 %v2570_v53, %v2569_v3 }
 0x180   : > { %v2535_v56 = vadd.f32 %v2534_v54, %v2533_v52  ;;  %v2572_v57 = vrot.slane %v2571_v55, 1 }
 0x182   : > { %v2573_v58 = vadd.f32 %v2572_v57, %v2571_v55  ;;  %2575 = vst [vmem:[%s181_s18] sm:$0x1] %v2535_v56 }
 0x184   : > { %2576 = vst [vmem:[%s181_s18 + $0x1] sm:$0x1] %v2573_v58 }
 0x185 PF: > { %s14_s12 = sadd.s32 1, %s3463_s12  }
 0x186   : > { %p11_p4 = scmp.ge.s32.totalorder %s14_s12, 4  }
 0x188   :  { %13 = sbr.rel (!%p11_p4) target bundleno = 1 (0x1), region = 73 }

// kernel: residual_block_forward.5
= control target key start
LH: loop header
LB: loop body
LE: loop exit
PB: predicated region body
PF: predicated region fallthrough
CT: control target
= control target key end

     0   :  { %s3231_s18 = smov 0   ;;  %s3892_s0 = inlined_call_operand.vmem [shape: bf16[2,128,128], index: 0, kind: input, shape index: {}]   ;;  %s3893_s1 = inlined_call_operand.vmem [shape: bf16[1152,128], index: 1, kind: input, shape index: {}]   ;;  %s3894_s2 = inlined_call_operand.vmem [shape: f32[1,128], index: 2, kind: input, shape index: {}]   ;;  %s3895_s3 = inlined_call_operand.vmem [shape: f32[1,128], index: 3, kind: input, shape index: {}]   ;;  %s3896_s4 = inlined_call_operand.vmem [shape: bf16[2,128,128], index: 4, kind: output, shape index: {0}]   ;;  %s3897_s5 = inlined_call_operand.vmem [shape: f32[2,2,128], index: 5, kind: output, shape index: {1}]  }
   0x1 LB: > { %s2544_s19 = sadd.s32 4294967295, %s3198_s18   ;;  %p2548_p0 = scmp.ge.s32.totalorder %s3198_s18, 1  ;;  %s3198_s18 = sphi %s3231_s18, %s16_s18  }
   0x2   : > { %p190_p1 = scmp.lt.s32.totalorder %s3198_s18, 3 }
   0x4   : > { %p191_p2 = pnand %p2548_p0, %p190_p1 }
   0x5   : > { %v3096_v0 = vld [vmem:[%s3893_s1 + $0xc0] sm:$0xff] (!%p191_p2)   ;;  %v3200_v3 = vmov (!%p191_p2), 0   ;;  %v3100_v5 = vld [vmem:[%s3893_s1 + $0xc8] sm:$0xff] (!%p191_p2)   ;;  %v3104_v9 = vld [vmem:[%s3893_s1 + $0xd0] sm:$0xff] (!%p191_p2)   ;;  %p222_p3 = scmp.lt.s32.totalorder (!%p191_p2), %s2544_s19, 1  ;;  %vm614_vm0 = vcmask (!%p191_p2), 1040384  }
   0x6   : > { %194 = sbr.rel (%p191_p2) target bundleno = 428 (0x1ac), region = 36  ;;  %v3097_v1 = vld [vmem:[%s3893_s1 + $0x80] sm:$0xff] (!%p191_p2)   ;;  %2831 = vmatprep.subr.bf16.mxu1 (!%p191_p2), %v3096_v0  ;;  %612 = vst [vmem:[#allocation2] sm:$0xf] (!%p191_p2), %v3200_v3  ;;  %613 = vst [vmem:[#allocation2 + $0x4] sm:$0xf] (!%p191_p2), %v3200_v3 }
   0x7   : > { %v3098_v2 = vld [vmem:[%s3893_s1 + $0x40] sm:$0xff] (!%p191_p2)   ;;  %849 = vst [vmem:[#allocation2 + $0x4c] sm:$0xf] (!%p191_p2), %v3200_v3  ;;  %850 = vst [vmem:[#allocation2 + $0x50] sm:$0xf] (!%p191_p2), %v3200_v3  ;;  %2832 = vmatpush3.bf16.msra.mxu1 (!%p191_p2), %v3097_v1  ;;  %v3101_v6 = vld [vmem:[%s3893_s1 + $0x88] sm:$0xff] (!%p191_p2)  }
   0x8   : > { %v3099_v4 = vld [vmem:[%s3893_s1] sm:$0xff] (!%p191_p2)   ;;  %2767 = vmatprep.subr.bf16.mxu0 (!%p191_p2), %v3098_v2  ;;  %2833 = vmatprep.subr.bf16.mxu1 (!%p191_p2), %v3100_v5  ;;  %v3102_v7 = vld [vmem:[%s3893_s1 + $0x48] sm:$0xff] (!%p191_p2)   ;;  %v3105_v10 = vld [vmem:[%s3893_s1 + $0x90] sm:$0xff] (!%p191_p2)   ;;  %vm615_vm1 = vsmask.f32 (!%p191_p2), 256  ;;  %v3378_v45 = vrot.slane (!%p191_p2), %v3200_v3, 7 }
   0x9   : > { %2768 = vmatpush3.bf16.msra.mxu0 (!%p191_p2), %v3099_v4  ;;  %v3103_v8 = vld [vmem:[%s3893_s1 + $0x8] sm:$0xff] (!%p191_p2)   ;;  %v3106_v11 = vld [vmem:[%s3893_s1 + $0x50] sm:$0xff] (!%p191_p2)   ;;  %v3108_v13 = vld [vmem:[%s3893_s1 + $0xd8] sm:$0xff] (!%p191_p2)   ;;  %vm660_vm3 = vsmask.f32 (!%p191_p2), 4368  ;;  %vm822_vm5 = vcmask (!%p191_p2), 1043456  }
   0xa   : > { %2769 = vmatprep.subr.bf16.mxu0 (!%p191_p2), %v3102_v7  ;;  %v3107_v12 = vld [vmem:[%s3893_s1 + $0x10] sm:$0xff] (!%p191_p2)   ;;  %v3109_v14 = vld [vmem:[%s3893_s1 + $0x98] sm:$0xff] (!%p191_p2)   ;;  %v3112_v17 = vld [vmem:[%s3893_s1 + $0xe0] sm:$0xff] (!%p191_p2)   ;;  %vm823_vm4 = vsmask.f32 (!%p191_p2), 7938  ;;  %v3402_v5 = vrot.slane (!%p191_p2), %v3378_v45, 4 }
   0xb   : > { %2834 = vmatpush3.bf16.msra.mxu1 (!%p191_p2), %v3101_v6  ;;  %v3110_v15 = vld [vmem:[%s3893_s1 + $0x58] sm:$0xff] (!%p191_p2)   ;;  %v3113_v18 = vld [vmem:[%s3893_s1 + $0xa0] sm:$0xff] (!%p191_p2)   ;;  %v3116_v21 = vld [vmem:[%s3893_s1 + $0xe8] sm:$0xff] (!%p191_p2)   ;;  %vm944_vm8 = vsmask.f32 (!%p191_p2), 7424  ;;  %vm1024_vm9 = vcmask (!%p191_p2), 1046528  }
   0xc   : > { %2835 = vmatprep.subr.bf16.mxu1 (!%p191_p2), %v3104_v9  ;;  %v3111_v16 = vld [vmem:[%s3893_s1 + $0x18] sm:$0xff] (!%p191_p2)   ;;  %v3114_v19 = vld [vmem:[%s3893_s1 + $0x60] sm:$0xff] (!%p191_p2)   ;;  %v3117_v22 = vld [vmem:[%s3893_s1 + $0xa8] sm:$0xff] (!%p191_p2)  }
   0xd   : > { %2770 = vmatpush3.bf16.msra.mxu0 %v3103_v8  ;;  %v3115_v20 = vld [vmem:[%s3893_s1 + $0x20] sm:$0xff]   ;;  %v3118_v23 = vld [vmem:[%s3893_s1 + $0x68] sm:$0xff]   ;;  %s3905_s19 = smov (!%p222_p3, %s2544_s19), 1  ;;  %v3120_v25 = vld [vmem:[%s3893_s1 + $0xf0] sm:$0xff]  }
   0xe   : > { %2771 = vmatprep.subr.bf16.mxu0 %v3106_v11  ;;  %v3119_v24 = vld [vmem:[%s3893_s1 + $0x28] sm:$0xff]   ;;  %v3121_v26 = vld [vmem:[%s3893_s1 + $0xb0] sm:$0xff]   ;;  %s2686_s28 = sshll.u32 %s3905_s19, 6  ;;  %v3124_v29 = vld [vmem:[%s3893_s1 + $0xf8] sm:$0xff]  }
   0xf   : > { %2836 = vmatpush3.bf16.msra.mxu1 %v3105_v10  ;;  %v3122_v27 = vld [vmem:[%s3893_s1 + $0x70] sm:$0xff]   ;;  %v3125_v30 = vld [vmem:[%s3893_s1 + $0xb8] sm:$0xff]   ;;  %s3345_s12 = scalar_lea.vmem %s3892_s0, %s2686_s28  ;;  %v3357_v34 = vld [vmem:[%s3894_s2] ss:$0 sm:$0xff]  ;;  %s3863_s16 = scalar_lea.vmem %s3896_s4, %s2686_s28 }
  0x10   : > { %2837 = vmatprep.subr.bf16.mxu1 %v3108_v13  ;;  %v3123_v28 = vld [vmem:[%s3893_s1 + $0x30] sm:$0xff]   ;;  %v3126_v31 = vld [vmem:[%s3893_s1 + $0x78] sm:$0xff]   ;;  %v446_v33 = vld [vmem:[%s3345_s12] ss:$8 sps:$4 sm:$0xff]   ;;  %s2553_s28 = sshll.u32 %s3905_s19, 1 }
  0x11   : > { %2772 = vmatpush3.bf16.msra.mxu0 %v3107_v12  ;;  %v3127_v32 = vld [vmem:[%s3893_s1 + $0x38] sm:$0xff]   ;;  %v462_v35 = vunpack.c.l.bf16 %v446_v33  ;;  %v617_v36 = vld [vmem:[#allocation2 + $0x8] sm:$0x1]  ;;  %v464_v37 = vunpack.c.h.bf16 %v446_v33  ;;  %v3362_v38 = vld [vmem:[%s3895_s3] ss:$0 sm:$0xff]  ;;  %s235_s20 = scalar_lea.vmem %s3897_s5, %s2553_s28 }
  0x12   : > { %2773 = vmatprep.subr.bf16.mxu0 %v3110_v15  ;;  %vm3365_vm2 = vmand %vm614_vm0, %vm615_vm1  ;;  %v3131_v42 = vld [vmem:[%s3893_s1 + $0x140] sm:$0xff]   ;;  %v450_v53 = vld [vmem:[%s3345_s12 + $0x10] ss:$8 sps:$4 sm:$0xff]  }
  0x13   : > { %2838 = vmatpush3.bf16.msra.mxu1 %v3109_v14  ;;  %v485_v40 = vmul.f32 %v3357_v34, %v462_v35  ;;  %v618_v41 = vsel %vm3365_vm2, 0, %v617_v36  ;;  %v487_v43 = vmul.f32 %v3357_v34, %v464_v37  ;;  %v3135_v48 = vld [vmem:[%s3893_s1 + $0x1c0] sm:$0xff]   ;;  %v466_v57 = vunpack.c.l.bf16 %v450_v53  ;;  %vm3387_vm6 = vmor %vm615_vm1, %vm660_vm3 }
  0x14   : > { %2839 = vmatprep.subr.bf16.mxu1 %v3112_v17  ;;  %619 = vst [vmem:[#allocation2 + $0x8] sm:$0x1] %v618_v41  ;;  %v851_v51 = vld [vmem:[#allocation2] sm:$0xf]  ;;  %v852_v56 = vld [vmem:[#allocation2 + $0x4] sm:$0xf]  ;;  %v468_v58 = vunpack.c.h.bf16 %v450_v53  ;;  %vm3395_vm7 = vmand %vm822_vm5, %vm823_vm4 }
  0x15   : > { %2774 = vmatpush3.bf16.msra.mxu0 %v3111_v16  ;;  %v508_v44 = vadd.f32 %v3362_v38, %v485_v40  ;;  %v510_v46 = vadd.f32 %v3362_v38, %v487_v43  ;;  %v489_v0 = vmul.f32 %v3357_v34, %v466_v57  ;;  %v868_v3 = vld [vmem:[#allocation2] sm:$0xe]  ;;  %v3399_v4 = vcombine.low %v851_v51, %v852_v56 }
  0x16   : > { %2775 = vmatprep.subr.bf16.mxu0 %v3114_v19  ;;  %v491_v1 = vmul.f32 %v3357_v34, %v468_v58  ;;  %v2581_v19 = vcombine.low %v868_v3, %v852_v56  ;;  %v3629_v62 = vld [vmem:[%s3893_s1 + $0x200] sm:$0xff]  }
  0x17   : > { %2840 = vmatpush3.bf16.msra.mxu1 %v3113_v18  ;;  %v540_v47 = vmax.f32 %v508_v44, 0.0  ;;  %v542_v49 = vmax.f32 %v510_v46, 0.0  ;;  %v512_v9 = vadd.f32 %v3362_v38, %v489_v0  ;;  %v3140_v0 = vld [vmem:[%s3893_s1 + $0x1c8] sm:$0xff]  }
  0x18   : > { %2841 = vmatprep.subr.bf16.mxu1 %v3116_v21  ;;  %v514_v10 = vadd.f32 %v3362_v38, %v491_v1  ;;  %v1025_v33 = vrot.slane %v2581_v19, 1 }
  0x19   : > { %2776 = vmatpush3.bf16.msra.mxu0 %v3115_v20  ;;  %v2688_v50 = vpack.c.bf16 %v540_v47, %v540_v47  ;;  %v2690_v52 = vpack.c.bf16 %v542_v49, %v542_v49  ;;  %v544_v15 = vmax.f32 %v512_v9, 0.0  ;;  %v948_v20 = vshll.u32 %v3399_v4, 16  ;;  %v3134_v9 = vld [vmem:[%s3893_s1 + $0x148] sm:$0xff]  }
  0x1a   : > { %2777 = vmatprep.subr.bf16.mxu0 %v3118_v23  ;;  %v546_v16 = vmax.f32 %v514_v10, 0.0  ;;  %v454_v23 = vld [vmem:[%s3345_s12 + $0x20] ss:$8 sps:$4 sm:$0xff]  }
  0x1b   : > { %2842 = vmatpush3.bf16.msra.mxu1 %v3117_v22  ;;  %v663_v54 = vshrl.u32 %v2688_v50, 16  ;;  %v666_v55 = vshll.u32 %v2688_v50, 16  ;;  %v825_v59 = vld [vmem:[#allocation2 + $0x8] sm:$0xf]  ;;  %v680_v60 = vshrl.u32 %v2690_v52, 16  ;;  %v683_v61 = vshll.u32 %v2690_v52, 16 }
  0x1c   : > { %2843 = vmatprep.subr.bf16.mxu1 %v3120_v25  ;;  %v2692_v21 = vpack.c.bf16 %v544_v15, %v544_v15  ;;  %v2694_v22 = vpack.c.bf16 %v546_v16, %v546_v16  ;;  %v472_v25 = vunpack.c.h.bf16 %v454_v23  ;;  %v950_v35 = vrot.slane %v948_v20, 1  ;;  %v3145_v20 = vld [vmem:[%s3893_s1 + $0x1d0] sm:$0xff]  }
  0x1d   : > { %2778 = vmatpush3.bf16.msra.mxu0 %v3119_v24  ;;  %v665_v63 = vrot.slane %v663_v54, 7  ;;  %v682_v6 = vrot.slane %v680_v60, 7  ;;  %v470_v24 = vunpack.c.l.bf16 %v454_v23  ;;  %v3137_v60 = vld [vmem:[%s3893_s1 + $0x180] sm:$0xff]  }
  0x1e   : > { %2779 = vmatprep.subr.bf16.mxu0 %v3122_v27  ;;  %v701_v27 = vshll.u32 %v2692_v21, 16 }
  0x1f   : > { %2844 = vmatpush3.bf16.msra.mxu1 %v3121_v26  ;;  %v668_v7 = vor.u32 %v666_v55, %v665_v63  ;;  %v669_v8 = vrot.slane %v665_v63, 4  ;;  %v685_v11 = vor.u32 %v683_v61, %v682_v6  ;;  %v687_v12 = vrot.slane %v682_v6, 4  ;;  %v3132_v61 = vld [vmem:[%s3893_s1 + $0x100] sm:$0xff]  }
  0x20   : > { %2845 = vmatprep.subr.bf16.mxu1 %v3124_v29  ;;  %v698_v26 = vshrl.u32 %v2692_v21, 16  ;;  %v719_v29 = vshll.u32 %v2694_v22, 16 }
  0x21   : > { %2780 = vmatpush3.bf16.msra.mxu0 %v3123_v28  ;;  %v677_v13 = vsel %vm3387_vm6, %v669_v8, %v3378_v45  ;;  %v826_v14 = vsel %vm3395_vm7, %v668_v7, %v825_v59  ;;  %v686_v17 = vsel %vm3387_vm6, %v3402_v5, %v685_v11  ;;  %v695_v18 = vsel %vm3387_vm6, %v687_v12, %v3378_v45  ;;  %v3142_v11 = vld [vmem:[%s3893_s1 + $0x188] sm:$0xff]  }
  0x22   : > { %2781 = vmatprep.subr.bf16.mxu0 %v3126_v31  ;;  %827 = vst [vmem:[#allocation2 + $0x8] sm:$0xf] %v826_v14  ;;  %828 = vst [vmem:[#allocation2 + $0xc] sm:$0xf] %v677_v13  ;;  %v716_v28 = vshrl.u32 %v2694_v22, 16  ;;  %v493_v31 = vmul.f32 %v3357_v34, %v470_v24  ;;  %v700_v36 = vrot.slane %v698_v26, 7 }
  0x23   : > { %2846 = vmatpush3.bf16.msra.mxu1 %v3125_v30  ;;  %829 = vst [vmem:[#allocation2 + $0x10] sm:$0xf] %v686_v17  ;;  %830 = vst [vmem:[#allocation2 + $0x14] sm:$0xf] %v695_v18  ;;  %v946_v30 = vshrl.u32 %v3399_v4, 16  ;;  %v3136_v18 = vld [vmem:[%s3893_s1 + $0x108] sm:$0xff]  }
  0x24   : > { %2959 = vmatprep.subr.bf16.mxu1 %v3135_v48  ;;  %v718_v37 = vrot.slane %v716_v28, 7  ;;  %v516_v40 = vadd.f32 %v3362_v38, %v493_v31  ;;  %v703_v44 = vor.u32 %v701_v27, %v700_v36  ;;  %v705_v46 = vrot.slane %v700_v36, 4  ;;  %v458_v17 = vld [vmem:[%s3345_s12 + $0x30] ss:$8 sps:$4 sm:$0xff]  }
  0x25   : > { %2782 = vmatpush3.bf16.msra.mxu0 %v3127_v32  ;;  %v495_v32 = vmul.f32 %v3357_v34, %v472_v25  ;;  %v951_v57 = vor.u32 %v950_v35, %v946_v30  ;;  %v3139_v24 = vld [vmem:[%s3893_s1 + $0x150] sm:$0xff]   ;;  %v474_v26 = vunpack.c.l.bf16 %v458_v17  ;;  %v476_v27 = vunpack.c.h.bf16 %v458_v17  ;;  %v3151_v17 = vld [vmem:[%s3893_s1 + $0x120] sm:$0xff]  }
  0x26   : > { %2895 = vmatprep.subr.bf16.mxu0 %v3131_v42  ;;  %v721_v47 = vor.u32 %v719_v29, %v718_v37  ;;  %v723_v48 = vrot.slane %v718_v37, 4  ;;  %v548_v51 = vmax.f32 %v516_v40, 0.0  ;;  %v704_v52 = vsel %vm3387_vm6, %v3402_v5, %v703_v44  ;;  %v3141_v40 = vld [vmem:[%s3893_s1 + $0x110] sm:$0xff]  }
  0x27   : > { %v518_v41 = vadd.f32 %v3362_v38, %v495_v32  ;;  %v713_v53 = vsel %vm3387_vm6, %v705_v46, %v3378_v45  ;;  %831 = vst [vmem:[#allocation2 + $0x18] sm:$0xf] %v704_v52  ;;  %v499_v35 = vmul.f32 %v3357_v34, %v476_v27  ;;  %v3156_v27 = vld [vmem:[%s3893_s1 + $0x128] sm:$0xff]  }
  0x28   : > { %v722_v54 = vsel %vm3387_vm6, %v3402_v5, %v721_v47  ;;  %v731_v55 = vsel %vm3387_vm6, %v723_v48, %v3378_v45  ;;  %832 = vst [vmem:[#allocation2 + $0x1c] sm:$0xf] %v713_v53  ;;  %v2696_v1 = vpack.c.bf16 %v548_v51, %v548_v51  ;;  %v3150_v47 = vld [vmem:[%s3893_s1 + $0x1d8] sm:$0xff]  }
  0x29   : > { %v853_v42 = vld [vmem:[#allocation2 + $0x8] sm:$0xf]  ;;  %v3424_v43 = vld [vmem:[#allocation2 + $0xc] sm:$0xf]  ;;  %833 = vst [vmem:[#allocation2 + $0x20] sm:$0xf] %v722_v54 }
  0x2a   : > { %v3427_v49 = vcombine.low %v853_v42, %v3424_v43  ;;  %v3429_v50 = vld [vmem:[#allocation2 + $0x10] sm:$0xff]   ;;  %834 = vst [vmem:[#allocation2 + $0x24] sm:$0xf] %v731_v55  ;;  %v550_v3 = vmax.f32 %v518_v41, 0.0  ;;  %v734_v12 = vshrl.u32 %v2696_v1, 16  ;;  %v737_v13 = vshll.u32 %v2696_v1, 16 }
  0x2b   : > { %v961_v63 = vshll.u32 %v3429_v50, 16  ;;  %v3459_v8 = vrot.slane %v3429_v50, 1  ;;  %v965_v19 = vshrl.u32 %v3429_v50, 16  ;;  %v3147_v41 = vld [vmem:[%s3893_s1 + $0x190] sm:$0xff]  }
  0x2c   : > { %1944 = vmatprep.mubr.bf16.mxu1 %v3427_v49  ;;  %v1026_v56 = vrot.slane %v3427_v49, 1  ;;  %v953_v58 = vshll.u32 %v3427_v49, 16  ;;  %v957_v59 = vshrl.u32 %v3427_v49, 16  ;;  %v2698_v14 = vpack.c.bf16 %v550_v3, %v550_v3 }
  0x2d   : > { %v963_v10 = vrot.slane %v961_v63, 1  ;;  %v736_v21 = vrot.slane %v734_v12, 7  ;;  %v3155_v63 = vld [vmem:[%s3893_s1 + $0x1e0] sm:$0xff]  }
  0x2e   : > { %v1027_v6 = vsel %vm1024_vm9, %v1025_v33, %v1026_v56  ;;  %v955_v7 = vrot.slane %v953_v58, 1  ;;  %v752_v22 = vshrl.u32 %v2698_v14, 16  ;;  %v755_v25 = vshll.u32 %v2698_v14, 16  ;;  %v3146_v58 = vld [vmem:[%s3893_s1 + $0x118] sm:$0xff]  }
  0x2f   : > { %1945 = vmatmul.mubr.bf16.vlgmr.msra.gmra.mrb[0].mxu1 %v1027_v6  ;;  %v3485_v28 = vld [vmem:[#allocation2 + $0x18] sm:$0xff]   ;;  %v739_v29 = vor.u32 %v737_v13, %v736_v21  ;;  %v741_v30 = vrot.slane %v736_v21, 4  ;;  %v497_v33 = vmul.f32 %v3357_v34, %v474_v26  ;;  %v967_v36 = vor.u32 %v965_v19, %v963_v10 }
  0x30   : > { %v956_v15 = vsel %vm944_vm8, %v951_v57, %v955_v7  ;;  %1952 = vmatprep.mubr.bf16.mxu1 %v3429_v50  ;;  %v959_v16 = vor.u32 %v957_v59, %v955_v7  ;;  %2960 = vmatpush3.bf16.msra.mxu1 %v3137_v60  ;;  %v754_v32 = vrot.slane %v752_v22, 7  ;;  %v969_v37 = vshll.u32 %v3485_v28, 16  ;;  %v3144_v34 = vld [vmem:[%s3893_s1 + $0x158] sm:$0xff]   ;;  %v3157_v7 = vld [vmem:[%s3893_s1 + $0x1a0] sm:$0xff]   ;;  %v3154_v22 = vld [vmem:[%s3893_s1 + $0x168] sm:$0xff]  }
  0x31   : > { %1847 = vmatprep.mubr.bf16.mxu0 %v956_v15  ;;  %2961 = vmatprep.subr.bf16.mxu1 %v3140_v0  ;;  %v3489_v31 = vld [vmem:[#allocation2 + $0x20] sm:$0xff]   ;;  %v740_v42 = vsel %vm3387_vm6, %v3402_v5, %v739_v29  ;;  %v1030_v44 = vrot.slane %v3485_v28, 1  ;;  %v749_v46 = vsel %vm3387_vm6, %v741_v30, %v3378_v45  ;;  %v973_v53 = vshrl.u32 %v3485_v28, 16  ;;  %v3152_v59 = vld [vmem:[%s3893_s1 + $0x198] sm:$0xff]  }
  0x32   : > { %1848 = vmatmul.mubr.bf16.vlgmr.msra.gmra.mrb[0].mxu0 %v3399_v4  ;;  %v3479_v23 = vsel %vm944_vm8, %v959_v16, %v963_v10  ;;  %v1029_v4 = vsel %vm1024_vm9, %v1026_v56, %v3459_v8  ;;  %835 = vst [vmem:[#allocation2 + $0x28] sm:$0xf] %v740_v42  ;;  %v971_v48 = vrot.slane %v969_v37, 1  ;;  %836 = vst [vmem:[#allocation2 + $0x2c] sm:$0xf] %v749_v46  ;;  %v759_v52 = vrot.slane %v754_v32, 4 }
  0x33   : > { %2896 = vmatpush3.bf16.msra.mxu0 %v3132_v61  ;;  %1855 = vmatprep.mubr.bf16.mxu0 %v3479_v23  ;;  %v757_v51 = vor.u32 %v755_v25, %v754_v32  ;;  %v977_v54 = vshll.u32 %v3489_v31, 16  ;;  %v520_v55 = vadd.f32 %v3362_v38, %v497_v33  ;;  %v522_v56 = vadd.f32 %v3362_v38, %v499_v35  ;;  %v3149_v61 = vld [vmem:[%s3893_s1 + $0x160] sm:$0xff]   ;;  %v3162_v25 = vld [vmem:[%s3893_s1 + $0x1a8] sm:$0xff]   ;;  %v3159_v35 = vld [vmem:[%s3893_s1 + $0x170] sm:$0xff]  }
  0x34   : > { %2897 = vmatprep.subr.bf16.mxu0 %v3134_v9  ;;  %2962 = vmatpush3.bf16.msra.mxu1 %v3142_v11  ;;  %v3519_v57 = vsel %vm944_vm8, %v967_v36, %v971_v48  ;;  %v767_v38 = vsel %vm3387_vm6, %v759_v52, %v3378_v45  ;;  %v3544_v3 = vsel %vm1024_vm9, %v3459_v8, %v1030_v44  ;;  %v3160_v11 = vld [vmem:[%s3893_s1 + $0x1e8] sm:$0xff]   ;;  %v1032_v16 = vrot.slane %v3489_v31, 1 }
  0x35   : > { %2963 = vmatprep.subr.bf16.mxu1 %v3145_v20  ;;  %v758_v60 = vsel %vm3387_vm6, %v3402_v5, %v757_v51  ;;  %838 = vst [vmem:[#allocation2 + $0x34] sm:$0xf] %v767_v38  ;;  %v552_v0 = vmax.f32 %v520_v55, 0.0  ;;  %v554_v1 = vmax.f32 %v522_v56, 0.0  ;;  %v979_v6 = vrot.slane %v977_v54, 1  ;;  %v3167_v56 = vld [vmem:[%s3893_s1 + $0x178] sm:$0xff]  }
  0x36   : > { %837 = vst [vmem:[#allocation2 + $0x30] sm:$0xf] %v758_v60  ;;  %v981_v20 = vshrl.u32 %v3489_v31, 16  ;;  %v3588_v37 = vsel %vm1024_vm9, %v1030_v44, %v1032_v16  ;;  %v3166_v44 = vld [vmem:[%s3893_s1 + $0x1b0] sm:$0xff]  }
  0x37   : > { %1953 = vmatmul.mubr.bf16.gmra.mrb[4].mxu1 %v1029_v4  ;;  %2898 = vmatpush3.bf16.msra.mxu0 %v3136_v18  ;;  %v2700_v9 = vpack.c.bf16 %v552_v0, %v552_v0  ;;  %v2702_v10 = vpack.c.bf16 %v554_v1, %v554_v1  ;;  %v3165_v4 = vld [vmem:[%s3893_s1 + $0x1f0] sm:$0xff]  }
  0x38   : > { %1960 = vmatprep.mubr.bf16.mxu1 %v3485_v28  ;;  %2899 = vmatprep.subr.bf16.mxu0 %v3139_v24 }
  0x39   : > { %2964 = vmatpush3.bf16.msra.mxu1 %v3147_v41  ;;  %v3553_v12 = vld [vmem:[#allocation2 + $0x28] sm:$0xff]   ;;  %v770_v13 = vshrl.u32 %v2700_v9, 16  ;;  %v773_v14 = vshll.u32 %v2700_v9, 16  ;;  %v788_v15 = vshrl.u32 %v2702_v10, 16  ;;  %v791_v18 = vshll.u32 %v2702_v10, 16 }
  0x3a   : > { %1856 = vmatmul.mubr.bf16.gmra.mrb[4].mxu0 %v3427_v49  ;;  %2965 = vmatprep.subr.bf16.mxu1 %v3150_v47  ;;  %v975_v49 = vor.u32 %v973_v53, %v971_v48  ;;  %v985_v21 = vshll.u32 %v3553_v12, 16  ;;  %v3169_v47 = vld [vmem:[%s3893_s1 + $0x1f8] sm:$0xff]   ;;  %v3161_v48 = vld [vmem:[%s3893_s1 + $0x130] sm:$0xff]   ;;  %v1034_v52 = vrot.slane %v3553_v12, 1  ;;  %v989_v54 = vshrl.u32 %v3553_v12, 16 }
  0x3b   : > { %1863 = vmatprep.mubr.bf16.mxu0 %v3519_v57  ;;  %2900 = vmatpush3.bf16.msra.mxu0 %v3141_v40  ;;  %v772_v24 = vrot.slane %v770_v13, 7  ;;  %v790_v26 = vrot.slane %v788_v15, 7  ;;  %v983_v40 = vor.u32 %v981_v20, %v979_v6 }
  0x3c   : > { %2901 = vmatprep.subr.bf16.mxu0 %v3144_v34  ;;  %v3562_v19 = vsel %vm944_vm8, %v975_v49, %v979_v6  ;;  %v987_v32 = vrot.slane %v985_v21, 1  ;;  %v875_v6 = vld [vmem:[#allocation2 + $0x10] sm:$0xf]  ;;  %v3172_v21 = vld [vmem:[#allocation2 + $0x18] sm:$0xff]  }
  0x3d   : > { %2966 = vmatpush3.bf16.msra.mxu1 %v3152_v59  ;;  %v775_v29 = vor.u32 %v773_v14, %v772_v24  ;;  %v777_v30 = vrot.slane %v772_v24, 4  ;;  %v3580_v33 = vld [vmem:[#allocation2 + $0x30] sm:$0xff]   ;;  %v793_v36 = vor.u32 %v791_v18, %v790_v26  ;;  %v795_v46 = vrot.slane %v790_v26, 4 }
  0x3e   : > { %2967 = vmatprep.subr.bf16.mxu1 %v3155_v63  ;;  %v3615_v53 = vsel %vm944_vm8, %v983_v40, %v987_v32  ;;  %v993_v55 = vshll.u32 %v3580_v33, 16  ;;  %v3636_v59 = vsel %vm1024_vm9, %v1032_v16, %v1034_v52  ;;  %v991_v60 = vor.u32 %v989_v54, %v987_v32  ;;  %v843_v16 = vld [vmem:[#allocation2 + $0x48] sm:$0x1] }
  0x3f   : > { %1961 = vmatmul.mubr.bf16.gmra.mrb[8].mxu1 %v3544_v3  ;;  %2902 = vmatpush3.bf16.msra.mxu0 %v3146_v58  ;;  %v776_v41 = vsel %vm3387_vm6, %v3402_v5, %v775_v29  ;;  %v785_v42 = vsel %vm3387_vm6, %v777_v30, %v3378_v45  ;;  %v794_v34 = vsel %vm3387_vm6, %v3402_v5, %v793_v36  ;;  %v3168_v58 = vld [vmem:[%s3893_s1 + $0x138] sm:$0xff]   ;;  %v1036_v63 = vrot.slane %v3580_v33, 1  ;;  %v892_v29 = vld [vmem:[#allocation2 + $0x10] sm:$0xe] }
  0x40   : > { %1968 = vmatprep.mubr.bf16.mxu1 %v3489_v31  ;;  %2903 = vmatprep.subr.bf16.mxu0 %v3149_v61  ;;  %839 = vst [vmem:[#allocation2 + $0x38] sm:$0xf] %v776_v41  ;;  %840 = vst [vmem:[#allocation2 + $0x3c] sm:$0xf] %v785_v42  ;;  %v803_v51 = vsel %vm3387_vm6, %v795_v46, %v3378_v45  ;;  %v3170_v45 = vld [vmem:[%s3893_s1 + $0x1b8] sm:$0xff]   ;;  %v995_v38 = vrot.slane %v993_v55, 1  ;;  %v844_v18 = vsel %vm3365_vm2, %v3402_v5, %v843_v16 }
  0x41   : > { %2968 = vmatpush3.bf16.msra.mxu1 %v3157_v7  ;;  %841 = vst [vmem:[#allocation2 + $0x40] sm:$0xf] %v794_v34  ;;  %842 = vst [vmem:[#allocation2 + $0x44] sm:$0xf] %v803_v51  ;;  %v997_v1 = vshrl.u32 %v3580_v33, 16  ;;  %v3175_v5 = vld [vmem:[#allocation2 + $0x20] sm:$0xff]  }
  0x42   : > { %1864 = vmatmul.mubr.bf16.gmra.mrb[8].mxu0 %v3429_v50  ;;  %2969 = vmatprep.subr.bf16.mxu1 %v3160_v11  ;;  %v3645_v0 = vsel %vm944_vm8, %v991_v60, %v995_v38  ;;  %v876_v7 = vld [vmem:[#allocation2 + $0x14] sm:$0xf]  ;;  %v3654_v11 = vsel %vm1024_vm9, %v1034_v52, %v1036_v63  ;;  %845 = vst [vmem:[#allocation2 + $0x48] sm:$0x1] %v844_v18  ;;  %v1215_v30 = vrot.slane %v3172_v21, 1  ;;  %v1217_v36 = vrot.slane %v3175_v5, 1 }
  0x43   : > { %1871 = vmatprep.mubr.bf16.mxu0 %v3562_v19  ;;  %2904 = vmatpush3.bf16.msra.mxu0 %v3151_v17  ;;  %v999_v13 = vor.u32 %v997_v1, %v995_v38  ;;  %v2586_v17 = vcombine.low %v875_v6, %v876_v7  ;;  %v872_v42 = vld [vmem:[#allocation2 + $0x8] sm:$0xe]  ;;  %v1147_v6 = vshrl.u32 %v3172_v21, 16  ;;  %v1155_v16 = vshrl.u32 %v3175_v5, 16 }
  0x44   : > { %2905 = vmatprep.subr.bf16.mxu0 %v3154_v22  ;;  %v3686_v52 = vsel %vm1024_vm9, %v1215_v30, %v1217_v36  ;;  %v2584_v60 = vcombine.low %v872_v42, %v3424_v43 }
  0x45   : > { %2970 = vmatpush3.bf16.msra.mxu1 %v3162_v25  ;;  %v1138_v39 = vshll.u32 %v2586_v17, 16 }
  0x46   : > { %2971 = vmatprep.subr.bf16.mxu1 %v3165_v4  ;;  %v3673_v4 = vld [vmem:[#allocation2 + $0x28] sm:$0xff]   ;;  %v1077_v1 = vrot.slane %v2584_v60, 1 }
  0x47   : > { %1969 = vmatmul.mubr.bf16.gmra.mrb[12].mxu1 %v3588_v37  ;;  %2906 = vmatpush3.bf16.msra.mxu0 %v3156_v27  ;;  %v3638_v61 = vld [vmem:[#allocation2 + $0x38] sm:$0xff]   ;;  %v1219_v46 = vrot.slane %v3673_v4, 1 }
  0x48   : > { %1976 = vmatprep.mubr.bf16.mxu1 %v3553_v12  ;;  %2907 = vmatprep.subr.bf16.mxu0 %v3159_v35  ;;  %v1001_v49 = vshll.u32 %v3638_v61, 16  ;;  %v3164_v9 = vld [vmem:[#allocation2 + $0x40] ss:$0 sps:$4 sm:$0x11]   ;;  %v1005_v10 = vshrl.u32 %v3638_v61, 16  ;;  %v3662_v20 = vrot.slane %v3638_v61, 1  ;;  %v2595_v35 = vcombine.low %v892_v29, %v876_v7 }
  0x49   : > { %2972 = vmatpush3.bf16.msra.mxu1 %v3166_v44  ;;  %v3656_v15 = vld [vmem:[#allocation2 + $0x40] sm:$0xff]   ;;  %v1009_v26 = vshll.u32 %v3164_v9, 16  ;;  %v1136_v44 = vshrl.u32 %v2586_v17, 16  ;;  %v846_v51 = vld [vmem:[#allocation2 + $0x48] sm:$0xf]  ;;  %v1151_v7 = vshll.u32 %v3175_v5, 16 }
  0x4a   : > { %1872 = vmatmul.mubr.bf16.gmra.mrb[12].mxu0 %v3485_v28  ;;  %2973 = vmatprep.subr.bf16.mxu1 %v3169_v47  ;;  %v1003_v14 = vrot.slane %v1001_v49, 1  ;;  %v1060_v22 = vshll.u32 %v3656_v15, 16  ;;  %v3682_v40 = vsel %vm1024_vm9, %v1036_v63, %v3662_v20  ;;  %v1214_v34 = vrot.slane %v2595_v35, 1  ;;  %v3182_v5 = vld [vmem:[%s3893_s1 + $0x220] sm:$0xff]  }
  0x4b   : > { %1879 = vmatprep.mubr.bf16.mxu0 %v3615_v53  ;;  %2908 = vmatpush3.bf16.msra.mxu0 %v3161_v48  ;;  %v1011_v41 = vrot.slane %v1009_v26, 1  ;;  %v1140_v47 = vrot.slane %v1138_v39, 1  ;;  %v1143_v48 = vshll.u32 %v3172_v21, 16  ;;  %v847_v54 = vsel %vm3395_vm7, 0, %v846_v51  ;;  %v3178_v21 = vld [vmem:[%s3893_s1 + $0x210] sm:$0xff]   ;;  %v3180_v39 = vld [vmem:[%s3893_s1 + $0x218] sm:$0xff]  }
  0x4c   : > { %2909 = vmatprep.subr.bf16.mxu0 %v3167_v56  ;;  %v3668_v24 = vsel %vm944_vm8, %v999_v13, %v1003_v14  ;;  %v1007_v25 = vor.u32 %v1005_v10, %v1003_v14  ;;  %v3670_v27 = vrot.slane %v1060_v22, 1  ;;  %v3691_v55 = vsel %vm1024_vm9, %v1214_v34, %v1215_v30  ;;  %848 = vst [vmem:[#allocation2 + $0x48] sm:$0xf] %v847_v54  ;;  %v3176_v14 = vld [vmem:[%s3893_s1 + $0x208] sm:$0xff]   ;;  %v3719_v22 = vld [vmem:[#allocation2 + $0x30] sm:$0xff]  }
  0x4d   : > { %2974 = vmatpush3.bf16.msra.mxu1 %v3170_v45  ;;  %v3696_v56 = vsel %vm1024_vm9, %v1217_v36, %v1219_v46  ;;  %v1040_v45 = vrot.slane %v3164_v9, 1  ;;  %v1141_v2 = vor.u32 %v1140_v47, %v1136_v44  ;;  %v1145_v38 = vrot.slane %v1143_v48, 1  ;;  %v3745_v36 = vld [vmem:[#allocation2 + $0x40] sm:$0xff]  }
  0x4e   : > { %3071 = vmatprep.subr.bf16.mxu1 %v3629_v62  ;;  %v3677_v32 = vsel %vm944_vm8, %v1007_v25, %v3670_v27  ;;  %v1078_v9 = vsel %vm1024_vm9, %v1077_v1, %v3459_v8  ;;  %v1153_v43 = vrot.slane %v1151_v7, 1  ;;  %v1159_v17 = vshll.u32 %v3673_v4, 16 }
  0x4f   : > { %1977 = vmatmul.mubr.bf16.gmra.mrb[16].mxu1 %v3636_v59  ;;  %2910 = vmatpush3.bf16.msra.mxu0 %v3168_v58  ;;  %v1012_v58 = vsel %vm944_vm8, %v1007_v25, %v1011_v41  ;;  %v1041_v63 = vsel %vm1024_vm9, %v3662_v20, %v1040_v45  ;;  %v1146_v49 = vsel %vm944_vm8, %v1141_v2, %v1145_v38  ;;  %v1163_v25 = vshrl.u32 %v3673_v4, 16  ;;  %v3186_v41 = vld [vmem:[%s3893_s1 + $0x230] sm:$0xff]  }
  0x50   : > { %1984 = vmatprep.mubr.bf16.mxu1 %v3580_v33  ;;  %3039 = vmatprep.subr.bf16.mxu0 %v3629_v62  ;;  %v1149_v10 = vor.u32 %v1147_v6, %v1145_v38  ;;  %v1157_v8 = vor.u32 %v1155_v16, %v1153_v43  ;;  %v1161_v18 = vrot.slane %v1159_v17, 1  ;;  %v1167_v26 = vshll.u32 %v3719_v22, 16 }
  0x51   : > { %v1171_v29 = vshrl.u32 %v3719_v22, 16  ;;  %v1183_v34 = vshll.u32 %v3745_v36, 16  ;;  %v1187_v51 = vshrl.u32 %v3745_v36, 16  ;;  %v1221_v7 = vrot.slane %v3719_v22, 1 }
  0x52   : > { %1880 = vmatmul.mubr.bf16.gmra.mrb[16].mxu0 %v3489_v31  ;;  %v1154_v13 = vsel %vm944_vm8, %v1149_v10, %v1153_v43 }
  0x53   : > { %1887 = vmatprep.mubr.bf16.mxu0 %v3645_v0  ;;  %v1185_v44 = vrot.slane %v1183_v34, 1  ;;  %v3185_v47 = vld [vmem:[#allocation2 + $0x48] sm:$0xff]  }
  0x54   : > { %v1191_v54 = vshll.u32 %v3185_v47, 16  ;;  %v1195_v60 = vshrl.u32 %v3185_v47, 16  ;;  %v3189_v38 = vld [vmem:[#allocation2 + $0x48] ss:$0 sps:$4 sm:$0x11]  }
  0x55   : > { %v1068_v6 = vshll.u32 %v3189_v38, 16 }
  0x56   : > { %v1193_v45 = vrot.slane %v1191_v54, 1 }
  0x57   : > { %1985 = vmatmul.mubr.bf16.gmra.mrb[20].mxu1 %v3654_v11  ;;  %v1070_v10 = vrot.slane %v1068_v6, 1 }
  0x58   : > { %1992 = vmatprep.mubr.bf16.mxu1 %v3638_v61 }
  0x5a   : > { %1888 = vmatmul.mubr.bf16.gmra.mrb[20].mxu0 %v3553_v12 }
  0x5b   : > { %1895 = vmatprep.mubr.bf16.mxu0 %v3668_v24 }
  0x5f   : > { %1993 = vmatmul.mubr.bf16.gmra.mrb[24].mxu1 %v3682_v40 }
  0x60   : > { %2000 = vmatprep.mubr.bf16.mxu1 %v3656_v15 }
  0x62   : > { %1896 = vmatmul.mubr.bf16.gmra.mrb[24].mxu0 %v3580_v33 }
  0x63   : > { %1903 = vmatprep.mubr.bf16.mxu0 %v1012_v58  ;;  %v3187_v58 = vld [vmem:[#allocation2 + $0x50] ss:$0 sps:$4 sm:$0x11]  }
  0x64   : > { %v1199_v2 = vshll.u32 %v3187_v58, 16 }
  0x66   : > { %v1201_v1 = vrot.slane %v1199_v2, 1 }
  0x67   : > { %2001 = vmatmul.mubr.bf16.gmra.mrb[28].mxu1 %v1041_v63  ;;  %v1197_v63 = vor.u32 %v1195_v60, %v1193_v45 }
  0x68   : > { %2138 = vmatprep.mubr.bf16.mxu1 %v1146_v49  ;;  %v1064_v49 = vshrl.u32 %v3656_v15, 16 }
  0x6a   : > { %1904 = vmatmul.mubr.bf16.gmra.mrb[28].mxu0 %v3638_v61 }
  0x6b   : > { %2041 = vmatprep.mubr.bf16.mxu0 %v1078_v9  ;;  %v3188_v9 = vld [vmem:[#allocation2 + $0x48] sm:$0xff]  }
  0x6f   : > { %2139 = vmatmul.mubr.bf16.vlgmr.msra.gmra.mrb[32].mxu1 %v3429_v50  ;;  %v1162_v50 = vsel %vm944_vm8, %v1157_v8, %v1161_v18  ;;  %v1222_v8 = vsel %vm1024_vm9, %v1219_v46, %v1221_v7 }
  0x70   : > { %2146 = vmatprep.mubr.bf16.mxu1 %v1154_v13  ;;  %3079 = vmatpush3.bf16.msra.mxu1 %v3629_v62  ;;  %v1225_v13 = vrot.slane %v3745_v36, 1 }
  0x71   : > { %3072 = vmatprep.subr.bf16.mxu1 %v3176_v14 }
  0x72   : > { %2042 = vmatmul.mubr.bf16.vlgmr.msra.gmra.mrb[32].mxu0 %v3479_v23  ;;  %v1165_v23 = vor.u32 %v1163_v25, %v1161_v18 }
  0x73   : > { %3040 = vmatpush3.bf16.msra.mxu0 %v3629_v62  ;;  %2049 = vmatprep.mubr.bf16.mxu0 %v3544_v3  ;;  %v1169_v3 = vrot.slane %v1167_v26, 1  ;;  %v3731_v62 = vld [vmem:[#allocation2 + $0x38] sm:$0xff]  }
  0x74   : > { %3041 = vmatprep.subr.bf16.mxu0 %v3176_v14  ;;  %3080 = vmatpush3.bf16.msra.mxu1 %v3176_v14  ;;  %v1175_v30 = vshll.u32 %v3731_v62, 16  ;;  %v1179_v42 = vshrl.u32 %v3731_v62, 16 }
  0x75   : > { %3073 = vmatprep.subr.bf16.mxu1 %v3178_v21 }
  0x76   : > { %v1177_v35 = vrot.slane %v1175_v30, 1 }
  0x77   : > { %2147 = vmatmul.mubr.bf16.gmra.mrb[36].mxu1 %v3485_v28  ;;  %3042 = vmatpush3.bf16.msra.mxu0 %v3176_v14  ;;  %v1170_v28 = vsel %vm944_vm8, %v1165_v23, %v1169_v3  ;;  %v1227_v14 = vrot.slane %v3185_v47, 1 }
  0x78   : > { %2154 = vmatprep.mubr.bf16.mxu1 %v1162_v50  ;;  %3043 = vmatprep.subr.bf16.mxu0 %v3178_v21 }
  0x79   : > { %3081 = vmatpush3.bf16.msra.mxu1 %v3178_v21 }
  0x7a   : > { %2050 = vmatmul.mubr.bf16.gmra.mrb[36].mxu0 %v3519_v57  ;;  %3074 = vmatprep.subr.bf16.mxu1 %v3180_v39  ;;  %v3184_v57 = vld [vmem:[%s3893_s1 + $0x228] sm:$0xff]  }
  0x7b   : > { %2057 = vmatprep.mubr.bf16.mxu0 %v3588_v37  ;;  %3044 = vmatpush3.bf16.msra.mxu0 %v3178_v21  ;;  %v1173_v37 = vor.u32 %v1171_v29, %v1169_v3 }
  0x7c   : > { %3045 = vmatprep.subr.bf16.mxu0 %v3180_v39 }
  0x7d   : > { %3082 = vmatpush3.bf16.msra.mxu1 %v3180_v39 }
  0x7e   : > { %3075 = vmatprep.subr.bf16.mxu1 %v3182_v5 }
  0x7f   : > { %2155 = vmatmul.mubr.bf16.gmra.mrb[40].mxu1 %v3489_v31  ;;  %3046 = vmatpush3.bf16.msra.mxu0 %v3180_v39  ;;  %v1178_v31 = vsel %vm944_vm8, %v1173_v37, %v1177_v35 }
  0x80   : > { %2162 = vmatprep.mubr.bf16.mxu1 %v1170_v28  ;;  %3047 = vmatprep.subr.bf16.mxu0 %v3182_v5 }
  0x81   : > { %3083 = vmatpush3.bf16.msra.mxu1 %v3182_v5 }
  0x82   : > { %2058 = vmatmul.mubr.bf16.gmra.mrb[40].mxu0 %v3562_v19  ;;  %3076 = vmatprep.subr.bf16.mxu1 %v3184_v57  ;;  %v3190_v19 = vld [vmem:[%s3893_s1 + $0x238] sm:$0xff]  }
  0x83   : > { %2065 = vmatprep.mubr.bf16.mxu0 %v3636_v59  ;;  %3048 = vmatpush3.bf16.msra.mxu0 %v3182_v5  ;;  %v1181_v59 = vor.u32 %v1179_v42, %v1177_v35 }
  0x84   : > { %3049 = vmatprep.subr.bf16.mxu0 %v3184_v57 }
  0x85   : > { %3084 = vmatpush3.bf16.msra.mxu1 %v3184_v57  ;;  %v1186_v48 = vsel %vm944_vm8, %v1181_v59, %v1185_v44 }
  0x86   : > { %3077 = vmatprep.subr.bf16.mxu1 %v3186_v41 }
  0x87   : > { %2163 = vmatmul.mubr.bf16.gmra.mrb[44].mxu1 %v3553_v12  ;;  %3050 = vmatpush3.bf16.msra.mxu0 %v3184_v57  ;;  %v1189_v12 = vor.u32 %v1187_v51, %v1185_v44 }
  0x88   : > { %2170 = vmatprep.mubr.bf16.mxu1 %v1178_v31  ;;  %3051 = vmatprep.subr.bf16.mxu0 %v3186_v41 }
  0x89   : > { %3085 = vmatpush3.bf16.msra.mxu1 %v3186_v41 }
  0x8a   : > { %2066 = vmatmul.mubr.bf16.gmra.mrb[44].mxu0 %v3615_v53  ;;  %3078 = vmatprep.subr.bf16.mxu1 %v3190_v19  ;;  %v1079_v53 = vrot.slane %v3656_v15, 1 }
  0x8b   : > { %2073 = vmatprep.mubr.bf16.mxu0 %v3654_v11  ;;  %3052 = vmatpush3.bf16.msra.mxu0 %v3186_v41  ;;  %v1194_v11 = vsel %vm944_vm8, %v1189_v12, %v1193_v45 }
  0x8c   : > { %3053 = vmatprep.subr.bf16.mxu0 %v3190_v19 }
  0x8d   : > { %3086 = vmatpush3.bf16.msra.mxu1 %v3190_v19 }
  0x8f   : > { %2171 = vmatmul.mubr.bf16.gmra.mrb[48].mxu1 %v3580_v33  ;;  %3054 = vmatpush3.bf16.msra.mxu0 %v3190_v19  ;;  %v1080_v33 = vsel %vm1024_vm9, %v3662_v20, %v1079_v53  ;;  %v1223_v20 = vrot.slane %v3731_v62, 1 }
  0x90   : > { %2178 = vmatprep.mubr.bf16.mxu1 %v1186_v48 }
  0x91   : > { %v1224_v43 = vsel %vm1024_vm9, %v1221_v7, %v1223_v20  ;;  %v1226_v16 = vsel %vm1024_vm9, %v1223_v20, %v1225_v13 }
  0x92   : > { %2074 = vmatmul.mubr.bf16.gmra.mrb[48].mxu0 %v3645_v0  ;;  %v1081_v0 = vrot.slane %v3189_v38, 1 }
  0x93   : > { %2081 = vmatprep.mubr.bf16.mxu0 %v3682_v40  ;;  %v1202_v40 = vsel %vm944_vm8, %v1197_v63, %v1201_v1 }
  0x97   : > { %2179 = vmatmul.mubr.bf16.gmra.mrb[52].mxu1 %v3638_v61  ;;  %v1082_v61 = vsel %vm1024_vm9, %v1079_v53, %v1081_v0 }
  0x98   : > { %2186 = vmatprep.mubr.bf16.mxu1 %v1194_v11 }
  0x9a   : > { %2082 = vmatmul.mubr.bf16.gmra.mrb[52].mxu0 %v3668_v24  ;;  %v1066_v24 = vor.u32 %v1064_v49, %v3670_v27  ;;  %v1229_v27 = vrot.slane %v3187_v58, 1 }
  0x9b   : > { %2089 = vmatprep.mubr.bf16.mxu0 %v1080_v33 }
  0x9c   : > { %v1230_v17 = vsel %vm1024_vm9, %v1227_v14, %v1229_v27 }
  0x9f   : > { %2187 = vmatmul.mubr.bf16.gmra.mrb[56].mxu1 %v3656_v15  ;;  %v1071_v15 = vsel %vm944_vm8, %v1066_v24, %v1070_v10 }
  0xa0   : > { %2194 = vmatprep.mubr.bf16.mxu1 %v1202_v40 }
  0xa2   : > { %2090 = vmatmul.mubr.bf16.gmra.mrb[56].mxu0 %v3677_v32  ;;  %v1228_v32 = vsel %vm1024_vm9, %v1225_v13, %v1227_v14 }
  0xa3   : > { %2097 = vmatprep.mubr.bf16.mxu0 %v1082_v61 }
  0xa7   : > { %2195 = vmatmul.mubr.bf16.gmra.mrb[60].mxu1 %v3188_v9 }
  0xa8   : > { %3063 = vmatprep.mubr.bf16.mxu1 %v1224_v43 }
  0xaa   : > { %2098 = vmatmul.mubr.bf16.gmra.mrb[60].mxu0 %v1071_v15 }
  0xab   : > { %3055 = vmatprep.mubr.bf16.mxu0 %v3691_v55 }
  0xaf   : > { %3064 = vmatmul.mubr.bf16.vlgmr.msra.gmra.mrb[64].mxu1 %v1226_v16 }
  0xb0   : > { %3067 = vmatprep.mubr.bf16.mxu1 %v1228_v32 }
  0xb2   : > { %3056 = vmatmul.mubr.bf16.vlgmr.msra.gmra.mrb[64].mxu0 %v3686_v52 }
  0xb3   : > { %3059 = vmatprep.mubr.bf16.mxu0 %v3696_v56 }
  0xb7   : > { %3068 = vmatmul.mubr.bf16.gmra.mrb[68].mxu1 %v1230_v17 }
  0xba   : > { %3060 = vmatmul.mubr.bf16.gmra.mrb[68].mxu0 %v1222_v8 }
 0x102   : > { %v2847_v55 = vpop.f32.mrb[0].mxu1 }
 0x103   : > { %v2848_v18 = vpop.f32.mrb[1].mxu1 }
 0x104   : > { %v2849_v21 = vadd.f32 %v2848_v18, %v2847_v55  ;;  %v2850_v22 = vpop.f32.mrb[2].mxu1 }
 0x105   : > { %v2783_v50 = vpop.f32.mrb[0].mxu0  ;;  %v2851_v25 = vpop.f32.mrb[3].mxu1 }
 0x106   : > { %v2784_v26 = vpop.f32.mrb[1].mxu0  ;;  %v2852_v39 = vadd.f32 %v2851_v25, %v2850_v22 }
 0x107   : > { %v2785_v23 = vadd.f32 %v2784_v26, %v2783_v50  ;;  %v2786_v52 = vpop.f32.mrb[2].mxu0 }
 0x108   : > { %v2787_v3 = vpop.f32.mrb[3].mxu0 }
 0x109   : > { %v3792_v56 = vadd.f32 %v2849_v21, %v2785_v23  ;;  %v2788_v62 = vadd.f32 %v2787_v3, %v2786_v52 }
 0x10a   : > { %v2853_v5 = vpop.f32.mrb[4].mxu1 }
 0x10b   : > { %v3794_v28 = vadd.f32 %v2852_v39, %v2788_v62  ;;  %v2854_v4 = vpop.f32.mrb[5].mxu1 }
 0x10c   : > { %v2855_v46 = vadd.f32 %v2854_v4, %v2853_v5  ;;  %v2856_v29 = vpop.f32.mrb[6].mxu1 }
 0x10d   : > { %v2789_v30 = vpop.f32.mrb[4].mxu0  ;;  %v2857_v57 = vpop.f32.mrb[7].mxu1 }
 0x10e   : > { %v2790_v37 = vpop.f32.mrb[5].mxu0  ;;  %v2858_v35 = vadd.f32 %v2857_v57, %v2856_v29 }
 0x10f   : > { %v2791_v36 = vadd.f32 %v2790_v37, %v2789_v30  ;;  %v2792_v41 = vpop.f32.mrb[6].mxu0 }
 0x110   : > { %v2793_v31 = vpop.f32.mrb[7].mxu0 }
 0x111   : > { %v3796_v42 = vadd.f32 %v2855_v46, %v2791_v36  ;;  %v2794_v34 = vadd.f32 %v2793_v31, %v2792_v41 }
 0x112   : > { %v2859_v19 = vpop.f32.mrb[8].mxu1 }
 0x113   : > { %v3798_v59 = vadd.f32 %v2858_v35, %v2794_v34  ;;  %v2860_v44 = vpop.f32.mrb[9].mxu1 }
 0x114   : > { %v2861_v47 = vadd.f32 %v2860_v44, %v2859_v19  ;;  %v2862_v48 = vpop.f32.mrb[10].mxu1 }
 0x115   : > { %v2795_v51 = vpop.f32.mrb[8].mxu0  ;;  %v2863_v54 = vpop.f32.mrb[11].mxu1 }
 0x116   : > { %v2796_v12 = vpop.f32.mrb[9].mxu0  ;;  %v2864_v45 = vadd.f32 %v2863_v54, %v2862_v48 }
 0x117   : > { %v2797_v58 = vadd.f32 %v2796_v12, %v2795_v51  ;;  %v2798_v53 = vpop.f32.mrb[10].mxu0 }
 0x118   : > { %v2799_v11 = vpop.f32.mrb[11].mxu0 }
 0x119   : > { %v3800_v60 = vadd.f32 %v2861_v47, %v2797_v58  ;;  %v2800_v2 = vadd.f32 %v2799_v11, %v2798_v53 }
 0x11a   : > { %v2865_v33 = vpop.f32.mrb[12].mxu1 }
 0x11b   : > { %v3802_v38 = vadd.f32 %v2864_v45, %v2800_v2  ;;  %v2866_v63 = vpop.f32.mrb[13].mxu1 }
 0x11c   : > { %v2867_v1 = vadd.f32 %v2866_v63, %v2865_v33  ;;  %v2868_v0 = vpop.f32.mrb[14].mxu1 }
 0x11d   : > { %v2801_v40 = vpop.f32.mrb[12].mxu0  ;;  %v2869_v49 = vpop.f32.mrb[15].mxu1 }
 0x11e   : > { %v2802_v6 = vpop.f32.mrb[13].mxu0  ;;  %v2870_v61 = vadd.f32 %v2869_v49, %v2868_v0 }
 0x11f   : > { %v2803_v7 = vadd.f32 %v2802_v6, %v2801_v40  ;;  %v2804_v20 = vpop.f32.mrb[14].mxu0 }
 0x120   : > { %v2805_v9 = vpop.f32.mrb[15].mxu0 }
 0x121   : > { %v3804_v24 = vadd.f32 %v2867_v1, %v2803_v7  ;;  %v2806_v10 = vadd.f32 %v2805_v9, %v2804_v20 }
 0x122   : > { %v2871_v43 = vpop.f32.mrb[16].mxu1 }
 0x123   : > { %v3806_v15 = vadd.f32 %v2870_v61, %v2806_v10  ;;  %v2872_v13 = vpop.f32.mrb[17].mxu1 }
 0x124   : > { %v2873_v14 = vadd.f32 %v2872_v13, %v2871_v43  ;;  %v2874_v16 = vpop.f32.mrb[18].mxu1 }
 0x125   : > { %v2807_v32 = vpop.f32.mrb[16].mxu0  ;;  %v2875_v27 = vpop.f32.mrb[19].mxu1 }
 0x126   : > { %v2808_v17 = vpop.f32.mrb[17].mxu0  ;;  %v2876_v8 = vadd.f32 %v2875_v27, %v2874_v16 }
 0x127   : > { %v2809_v55 = vadd.f32 %v2808_v17, %v2807_v32  ;;  %v2810_v18 = vpop.f32.mrb[18].mxu0 }
 0x128   : > { %v2811_v21 = vpop.f32.mrb[19].mxu0 }
 0x129   : > { %v3808_v22 = vadd.f32 %v2873_v14, %v2809_v55  ;;  %v2812_v50 = vadd.f32 %v2811_v21, %v2810_v18 }
 0x12a   : > { %v2877_v25 = vpop.f32.mrb[20].mxu1 }
 0x12b   : > { %v3810_v26 = vadd.f32 %v2876_v8, %v2812_v50  ;;  %v2878_v39 = vpop.f32.mrb[21].mxu1 }
 0x12c   : > { %v2879_v23 = vadd.f32 %v2878_v39, %v2877_v25  ;;  %v2880_v52 = vpop.f32.mrb[22].mxu1 }
 0x12d   : > { %v2813_v3 = vpop.f32.mrb[20].mxu0  ;;  %v2881_v62 = vpop.f32.mrb[23].mxu1 }
 0x12e   : > { %v2814_v5 = vpop.f32.mrb[21].mxu0  ;;  %v2882_v4 = vadd.f32 %v2881_v62, %v2880_v52 }
 0x12f   : > { %v2815_v46 = vadd.f32 %v2814_v5, %v2813_v3  ;;  %v2816_v29 = vpop.f32.mrb[22].mxu0 }
 0x130   : > { %v2817_v30 = vpop.f32.mrb[23].mxu0 }
 0x131   : > { %v3812_v57 = vadd.f32 %v2879_v23, %v2815_v46  ;;  %v2818_v37 = vadd.f32 %v2817_v30, %v2816_v29 }
 0x132   : > { %v2883_v35 = vpop.f32.mrb[24].mxu1 }
 0x133   : > { %v3814_v36 = vadd.f32 %v2882_v4, %v2818_v37  ;;  %v2884_v41 = vpop.f32.mrb[25].mxu1 }
 0x134   : > { %v2885_v31 = vadd.f32 %v2884_v41, %v2883_v35  ;;  %v2886_v34 = vpop.f32.mrb[26].mxu1 }
 0x135   : > { %v2819_v19 = vpop.f32.mrb[24].mxu0  ;;  %v2887_v44 = vpop.f32.mrb[27].mxu1 }
 0x136   : > { %v2820_v47 = vpop.f32.mrb[25].mxu0  ;;  %v2888_v48 = vadd.f32 %v2887_v44, %v2886_v34 }
 0x137   : > { %v2821_v51 = vadd.f32 %v2820_v47, %v2819_v19  ;;  %v2822_v54 = vpop.f32.mrb[26].mxu0 }
 0x138   : > { %v2823_v12 = vpop.f32.mrb[27].mxu0 }
 0x139   : > { %v3816_v45 = vadd.f32 %v2885_v31, %v2821_v51  ;;  %v2824_v58 = vadd.f32 %v2823_v12, %v2822_v54 }
 0x13a   : > { %v2889_v53 = vpop.f32.mrb[28].mxu1 }
 0x13b   : > { %v3818_v11 = vadd.f32 %v2888_v48, %v2824_v58  ;;  %v2890_v2 = vpop.f32.mrb[29].mxu1 }
 0x13c   : > { %v2891_v33 = vadd.f32 %v2890_v2, %v2889_v53  ;;  %v2892_v63 = vpop.f32.mrb[30].mxu1 }
 0x13d   : > { %v2825_v1 = vpop.f32.mrb[28].mxu0  ;;  %v2893_v0 = vpop.f32.mrb[31].mxu1 }
 0x13e   : > { %v2826_v40 = vpop.f32.mrb[29].mxu0  ;;  %v2894_v49 = vadd.f32 %v2893_v0, %v2892_v63 }
 0x13f   : > { %v2827_v6 = vadd.f32 %v2826_v40, %v2825_v1  ;;  %v2828_v61 = vpop.f32.mrb[30].mxu0 }
 0x140   : > { %v2829_v7 = vpop.f32.mrb[31].mxu0 }
 0x141   : > { %v3820_v20 = vadd.f32 %v2891_v33, %v2827_v6  ;;  %v2830_v9 = vadd.f32 %v2829_v7, %v2828_v61 }
 0x142   : > { %v2975_v10 = vpop.f32.mrb[32].mxu1 }
 0x143   : > { %v3822_v43 = vadd.f32 %v2894_v49, %v2830_v9  ;;  %v2976_v13 = vpop.f32.mrb[33].mxu1 }
 0x144   : > { %v2977_v14 = vadd.f32 %v2976_v13, %v2975_v10  ;;  %v2978_v16 = vpop.f32.mrb[34].mxu1 }
 0x145   : > { %v2911_v32 = vpop.f32.mrb[32].mxu0  ;;  %v2979_v27 = vpop.f32.mrb[35].mxu1 }
 0x146   : > { %v2912_v17 = vpop.f32.mrb[33].mxu0  ;;  %v2980_v8 = vadd.f32 %v2979_v27, %v2978_v16 }
 0x147   : > { %v2913_v55 = vadd.f32 %v2912_v17, %v2911_v32  ;;  %v2914_v18 = vpop.f32.mrb[34].mxu0 }
 0x148   : > { %v2915_v21 = vpop.f32.mrb[35].mxu0 }
 0x149   : > { %v2044_v50 = vadd.f32 %v2913_v55, %v3792_v56  ;;  %v2916_v25 = vadd.f32 %v2915_v21, %v2914_v18 }
 0x14a   : > { %v2981_v39 = vpop.f32.mrb[36].mxu1 }
 0x14b   : > { %v2047_v23 = vadd.f32 %v2916_v25, %v3794_v28  ;;  %v2982_v52 = vpop.f32.mrb[37].mxu1  ;;  %v3826_v3 = vadd.f32 %v2977_v14, %v2044_v50 }
 0x14c   : > { %v2983_v62 = vadd.f32 %v2982_v52, %v2981_v39  ;;  %v2984_v5 = vpop.f32.mrb[38].mxu1 }
 0x14d   : > { %v2917_v4 = vpop.f32.mrb[36].mxu0  ;;  %v2985_v46 = vpop.f32.mrb[39].mxu1  ;;  %v3828_v29 = vadd.f32 %v2980_v8, %v2047_v23 }
 0x14e   : > { %v2918_v30 = vpop.f32.mrb[37].mxu0  ;;  %v2986_v37 = vadd.f32 %v2985_v46, %v2984_v5 }
 0x14f   : > { %v2919_v35 = vadd.f32 %v2918_v30, %v2917_v4  ;;  %v2920_v41 = vpop.f32.mrb[38].mxu0 }
 0x150   : > { %v2921_v31 = vpop.f32.mrb[39].mxu0 }
 0x151   : > { %v2052_v56 = vadd.f32 %v2919_v35, %v3796_v42  ;;  %v2922_v34 = vadd.f32 %v2921_v31, %v2920_v41 }
 0x152   : > { %v2987_v19 = vpop.f32.mrb[40].mxu1 }
 0x153   : > { %v2055_v28 = vadd.f32 %v2922_v34, %v3798_v59  ;;  %v2988_v44 = vpop.f32.mrb[41].mxu1  ;;  %v3832_v47 = vadd.f32 %v2983_v62, %v2052_v56 }
 0x154   : > { %v2989_v48 = vadd.f32 %v2988_v44, %v2987_v19  ;;  %v2990_v51 = vpop.f32.mrb[42].mxu1 }
 0x155   : > { %v2923_v54 = vpop.f32.mrb[40].mxu0  ;;  %v2991_v12 = vpop.f32.mrb[43].mxu1  ;;  %v3834_v58 = vadd.f32 %v2986_v37, %v2055_v28 }
 0x156   : > { %v2924_v53 = vpop.f32.mrb[41].mxu0  ;;  %v2992_v2 = vadd.f32 %v2991_v12, %v2990_v51 }
 0x157   : > { %v2925_v33 = vadd.f32 %v2924_v53, %v2923_v54  ;;  %v2926_v63 = vpop.f32.mrb[42].mxu0 }
 0x158   : > { %v2927_v1 = vpop.f32.mrb[43].mxu0 }
 0x159   : > { %v2060_v42 = vadd.f32 %v2925_v33, %v3800_v60  ;;  %v2928_v0 = vadd.f32 %v2927_v1, %v2926_v63 }
 0x15a   : > { %v2993_v40 = vpop.f32.mrb[44].mxu1 }
 0x15b   : > { %v2063_v59 = vadd.f32 %v2928_v0, %v3802_v38  ;;  %v2994_v49 = vpop.f32.mrb[45].mxu1  ;;  %v3838_v6 = vadd.f32 %v2989_v48, %v2060_v42 }
 0x15c   : > { %v2995_v61 = vadd.f32 %v2994_v49, %v2993_v40  ;;  %v2996_v7 = vpop.f32.mrb[46].mxu1 }
 0x15d   : > { %v2929_v9 = vpop.f32.mrb[44].mxu0  ;;  %v2997_v10 = vpop.f32.mrb[47].mxu1  ;;  %v3840_v13 = vadd.f32 %v2992_v2, %v2063_v59 }
 0x15e   : > { %v2930_v14 = vpop.f32.mrb[45].mxu0  ;;  %v2998_v16 = vadd.f32 %v2997_v10, %v2996_v7 }
 0x15f   : > { %v2931_v32 = vadd.f32 %v2930_v14, %v2929_v9  ;;  %v2932_v27 = vpop.f32.mrb[46].mxu0 }
 0x160   : > { %v2933_v17 = vpop.f32.mrb[47].mxu0 }
 0x161   : > { %v2068_v60 = vadd.f32 %v2931_v32, %v3804_v24  ;;  %v2934_v8 = vadd.f32 %v2933_v17, %v2932_v27 }
 0x162   : > { %v2999_v55 = vpop.f32.mrb[48].mxu1 }
 0x163   : > { %v2071_v38 = vadd.f32 %v2934_v8, %v3806_v15  ;;  %v3000_v18 = vpop.f32.mrb[49].mxu1  ;;  %v3844_v21 = vadd.f32 %v2995_v61, %v2068_v60 }
 0x164   : > { %v3001_v50 = vadd.f32 %v3000_v18, %v2999_v55  ;;  %v3002_v25 = vpop.f32.mrb[50].mxu1 }
 0x165   : > { %v2935_v39 = vpop.f32.mrb[48].mxu0  ;;  %v3003_v23 = vpop.f32.mrb[51].mxu1  ;;  %v3846_v52 = vadd.f32 %v2998_v16, %v2071_v38 }
 0x166   : > { %v2936_v62 = vpop.f32.mrb[49].mxu0  ;;  %v3004_v5 = vadd.f32 %v3003_v23, %v3002_v25 }
 0x167   : > { %v2937_v4 = vadd.f32 %v2936_v62, %v2935_v39  ;;  %v2938_v46 = vpop.f32.mrb[50].mxu0 }
 0x168   : > { %v2939_v30 = vpop.f32.mrb[51].mxu0 }
 0x169   : > { %v2076_v24 = vadd.f32 %v2937_v4, %v3808_v22  ;;  %v2940_v37 = vadd.f32 %v2939_v30, %v2938_v46 }
 0x16a   : > { %v3005_v35 = vpop.f32.mrb[52].mxu1 }
 0x16b   : > { %v2079_v15 = vadd.f32 %v2940_v37, %v3810_v26  ;;  %v3006_v41 = vpop.f32.mrb[53].mxu1  ;;  %v2173_v31 = vadd.f32 %v3001_v50, %v2076_v24 }
 0x16c   : > { %v3007_v56 = vadd.f32 %v3006_v41, %v3005_v35  ;;  %v3008_v34 = vpop.f32.mrb[54].mxu1 }
 0x16d   : > { %v2941_v19 = vpop.f32.mrb[52].mxu0  ;;  %v3009_v28 = vpop.f32.mrb[55].mxu1  ;;  %v2176_v44 = vadd.f32 %v3004_v5, %v2079_v15 }
 0x16e   : > { %v2942_v48 = vpop.f32.mrb[53].mxu0  ;;  %v3010_v51 = vadd.f32 %v3009_v28, %v3008_v34 }
 0x16f   : > { %v2943_v54 = vadd.f32 %v2942_v48, %v2941_v19  ;;  %v2944_v12 = vpop.f32.mrb[54].mxu0 }
 0x170   : > { %v2945_v53 = vpop.f32.mrb[55].mxu0 }
 0x171   : > { %v2084_v2 = vadd.f32 %v2943_v54, %v3812_v57  ;;  %v2946_v33 = vadd.f32 %v2945_v53, %v2944_v12 }
 0x172   : > { %v3011_v22 = vpop.f32.mrb[56].mxu1 }
 0x173   : > { %v2087_v63 = vadd.f32 %v2946_v33, %v3814_v36  ;;  %v3012_v1 = vpop.f32.mrb[57].mxu1  ;;  %v2181_v26 = vadd.f32 %v3007_v56, %v2084_v2 }
 0x174   : > { %v3013_v42 = vadd.f32 %v3012_v1, %v3011_v22  ;;  %v3014_v0 = vpop.f32.mrb[58].mxu1 }
 0x175   : > { %v2947_v40 = vpop.f32.mrb[56].mxu0  ;;  %v3015_v59 = vpop.f32.mrb[59].mxu1  ;;  %v2184_v49 = vadd.f32 %v3010_v51, %v2087_v63 }
 0x176   : > { %v2948_v61 = vpop.f32.mrb[57].mxu0  ;;  %v3016_v7 = vadd.f32 %v3015_v59, %v3014_v0 }
 0x177   : > { %v2949_v9 = vadd.f32 %v2948_v61, %v2947_v40  ;;  %v2950_v10 = vpop.f32.mrb[58].mxu0 }
 0x178   : > { %v2951_v14 = vpop.f32.mrb[59].mxu0 }
 0x179   : > { %v2092_v16 = vadd.f32 %v2949_v9, %v3816_v45  ;;  %v2952_v32 = vadd.f32 %v2951_v14, %v2950_v10 }
 0x17a   : > { %v3017_v57 = vpop.f32.mrb[60].mxu1 }
 0x17b   : > { %v2095_v27 = vadd.f32 %v2952_v32, %v3818_v11  ;;  %v3018_v17 = vpop.f32.mrb[61].mxu1  ;;  %v2189_v36 = vadd.f32 %v3013_v42, %v2092_v16 }
 0x17c   : > { %v3019_v60 = vadd.f32 %v3018_v17, %v3017_v57  ;;  %v3020_v8 = vpop.f32.mrb[62].mxu1 }
 0x17d   : > { %v2953_v55 = vpop.f32.mrb[60].mxu0  ;;  %v3021_v38 = vpop.f32.mrb[63].mxu1  ;;  %v2192_v18 = vadd.f32 %v3016_v7, %v2095_v27 }
 0x17e   : > { %v2954_v50 = vpop.f32.mrb[61].mxu0  ;;  %v3022_v25 = vadd.f32 %v3021_v38, %v3020_v8 }
 0x17f   : > { %v2955_v39 = vadd.f32 %v2954_v50, %v2953_v55  ;;  %v2956_v23 = vpop.f32.mrb[62].mxu0 }
 0x180   : > { %v2957_v62 = vpop.f32.mrb[63].mxu0 }
 0x181   : > { %v2100_v5 = vadd.f32 %v2955_v39, %v3820_v20  ;;  %v2958_v45 = vadd.f32 %v2957_v62, %v2956_v23 }
 0x182   : > { %v3065_v4 = vpop.f32.mrb[64].mxu1 }
 0x183   : > { %v2103_v46 = vadd.f32 %v2958_v45, %v3822_v43  ;;  %v3856_v11 = vadd.f32 %v3065_v4, %v2181_v26  ;;  %v2269_v30 = vpop.f32.mrb[65].mxu1  ;;  %v2197_v24 = vadd.f32 %v3019_v60, %v2100_v5 }
 0x184   : > { %v2270_v37 = vadd.f32 %v2269_v30, %v2173_v31  ;;  %v3066_v35 = vpop.f32.mrb[66].mxu1 }
 0x185   : > { %v2281_v15 = vadd.f32 %v3066_v35, %v2184_v49  ;;  %v3057_v41 = vpop.f32.mrb[64].mxu0  ;;  %v2272_v56 = vpop.f32.mrb[67].mxu1  ;;  %v2200_v34 = vadd.f32 %v3022_v25, %v2103_v46 }
 0x186   : > { %v2246_v20 = vadd.f32 %v3057_v41, %v3832_v47  ;;  %v2273_v43 = vadd.f32 %v2272_v56, %v2176_v44  ;;  %v2237_v19 = vpop.f32.mrb[65].mxu0  ;;  %v2426_v38 = vmul.f32 %v2270_v37, %v2270_v37 }
 0x187   : > { %v2748_v28 = vpack.c.bf16 %v2281_v15, %v3856_v11  ;;  %v2238_v31 = vadd.f32 %v2237_v19, %v3826_v3  ;;  %v3058_v48 = vpop.f32.mrb[66].mxu0 }
 0x188   : > { %v2420_v51 = vmul.f32 %v2246_v20, %v2246_v20  ;;  %v2743_v54 = vpack.c.bf16 %v2273_v43, %v2270_v37  ;;  %v2249_v12 = vadd.f32 %v3058_v48, %v3834_v58  ;;  %v2240_v53 = vpop.f32.mrb[67].mxu0 }
 0x189   : > { %2764 = vst [vmem:[%s3863_s16 + $0x28] sm:$0xff] %v2748_v28   ;;  %v2397_v2 = vadd.f32 %v2246_v20, %v2238_v31  ;;  %v2418_v33 = vmul.f32 %v2238_v31, %v2238_v31  ;;  %v2241_v22 = vadd.f32 %v2240_v53, %v3828_v29 }
 0x18a   : > { %2763 = vst [vmem:[%s3863_s16 + $0x20] sm:$0xff] %v2743_v54   ;;  %v2728_v47 = vpack.c.bf16 %v2249_v12, %v2246_v20  ;;  %v3069_v44 = vpop.f32.mrb[68].mxu1 }
 0x18b   : > { %v2435_v63 = vadd.f32 %v2420_v51, %v2418_v33  ;;  %v2723_v1 = vpack.c.bf16 %v2241_v22, %v2238_v31  ;;  %v2294_v26 = vadd.f32 %v3069_v44, %v2197_v24  ;;  %v2285_v3 = vpop.f32.mrb[69].mxu1 }
 0x18c   : > { %2760 = vst [vmem:[%s3863_s16 + $0x8] sm:$0xff] %v2728_v47   ;;  %v2286_v42 = vadd.f32 %v2285_v3, %v2189_v36  ;;  %v3070_v0 = vpop.f32.mrb[70].mxu1 }
 0x18d   : > { %2724 = vst [vmem:[%s3863_s16] sm:$0xff] %v2723_v1   ;;  %v2297_v58 = vadd.f32 %v3070_v0, %v2200_v34  ;;  %v3061_v40 = vpop.f32.mrb[68].mxu0  ;;  %v2288_v59 = vpop.f32.mrb[71].mxu1  ;;  %v2432_v62 = vmul.f32 %v2294_v26, %v2294_v26 }
 0x18e   : > { %v2262_v49 = vadd.f32 %v3061_v40, %v3844_v21  ;;  %v2289_v61 = vadd.f32 %v2288_v59, %v2192_v18  ;;  %v2253_v29 = vpop.f32.mrb[69].mxu0  ;;  %v2430_v39 = vmul.f32 %v2286_v42, %v2286_v42 }
 0x18f   : > { %v2758_v7 = vpack.c.bf16 %v2297_v58, %v2294_v26  ;;  %v2254_v9 = vadd.f32 %v2253_v29, %v3838_v6  ;;  %v3062_v10 = vpop.f32.mrb[70].mxu0 }
 0x190   : > { %v2753_v14 = vpack.c.bf16 %v2289_v61, %v2286_v42  ;;  %v2265_v16 = vadd.f32 %v3062_v10, %v3846_v52  ;;  %v2256_v32 = vpop.f32.mrb[71].mxu0  ;;  %v2424_v21 = vmul.f32 %v2262_v49, %v2262_v49  ;;  %v2428_v52 = vmul.f32 %v3856_v11, %v3856_v11 }
 0x191   : > { %2766 = vst [vmem:[%s3863_s16 + $0x38] sm:$0xff] %v2758_v7   ;;  %v2399_v57 = vadd.f32 %v2397_v2, %v2254_v9  ;;  %v2422_v27 = vmul.f32 %v2254_v9, %v2254_v9  ;;  %v2257_v17 = vadd.f32 %v2256_v32, %v3840_v13 }
 0x192   : > { %2765 = vst [vmem:[%s3863_s16 + $0x30] sm:$0xff] %v2753_v14   ;;  %v2738_v36 = vpack.c.bf16 %v2265_v16, %v2262_v49 }
 0x193   : > { %v2401_v60 = vadd.f32 %v2399_v57, %v2262_v49  ;;  %v2437_v8 = vadd.f32 %v2435_v63, %v2422_v27  ;;  %v2733_v55 = vpack.c.bf16 %v2257_v17, %v2254_v9 }
 0x194   : > { %2762 = vst [vmem:[%s3863_s16 + $0x18] sm:$0xff] %v2738_v36  }
 0x195   : > { %v2403_v6 = vadd.f32 %v2401_v60, %v2270_v37  ;;  %v2439_v18 = vadd.f32 %v2437_v8, %v2424_v21  ;;  %2761 = vst [vmem:[%s3863_s16 + $0x10] sm:$0xff] %v2733_v55  }
 0x197   : > { %v2405_v50 = vadd.f32 %v2403_v6, %v3856_v11  ;;  %v2441_v25 = vadd.f32 %v2439_v18, %v2426_v38 }
 0x199   : > { %v2407_v13 = vadd.f32 %v2405_v50, %v2286_v42  ;;  %v2443_v23 = vadd.f32 %v2441_v25, %v2428_v52 }
 0x19b   : > { %v2409_v5 = vadd.f32 %v2407_v13, %v2294_v26  ;;  %v2445_v45 = vadd.f32 %v2443_v23, %v2430_v39 }
 0x19d   : > { %v2411_v4 = vrot.slane %v2409_v5, 4  ;;  %v2447_v46 = vadd.f32 %v2445_v45, %v2432_v62 }
 0x19f   : > { %v2412_v30 = vadd.f32 %v2411_v4, %v2409_v5  ;;  %v2449_v24 = vrot.slane %v2447_v46, 4 }
 0x1a1   : > { %v2413_v37 = vrot.slane %v2412_v30, 2  ;;  %v2450_v35 = vadd.f32 %v2449_v24, %v2447_v46 }
 0x1a3   : > { %v2414_v15 = vadd.f32 %v2413_v37, %v2412_v30  ;;  %v2451_v41 = vrot.slane %v2450_v35, 2 }
 0x1a5   : > { %v2415_v56 = vrot.slane %v2414_v15, 1  ;;  %v2452_v34 = vadd.f32 %v2451_v41, %v2450_v35 }
 0x1a7   : > { %v2416_v11 = vadd.f32 %v2415_v56, %v2414_v15  ;;  %v2453_v20 = vrot.slane %v2452_v34, 1 }
 0x1a9   : > { %v2454_v43 = vadd.f32 %v2453_v20, %v2452_v34  ;;  %2456 = vst [vmem:[%s235_s20] sm:$0x1] %v2416_v11 }
 0x1ab   : > { %2457 = vst [vmem:[%s235_s20 + $0x1] sm:$0x1] %v2454_v43 }
 0x1ac PF: > { %s16_s18 = sadd.s32 1, %s3198_s18  }
 0x1ad   : > { %p13_p4 = scmp.ge.s32.totalorder %s16_s18, 4  }
 0x1af   :  { %15 = sbr.rel (!%p13_p4) target bundleno = 1 (0x1), region = 78 }

</bundles_post_ra>
